<compile_context>
chip_gen: v6e
topology: v6e:2x2x1
jax: 0.10.0
libtpu: 0.0.40
codegen_flags: <defaults>
</compile_context>

<pallas_src>
from functools import partial

import jax
import jax.numpy as jnp
from jax import lax
from jax.experimental import pallas as pl
from jax.experimental.pallas import tpu as pltpu


ACT_DTYPE = jnp.bfloat16     # HBM storage dtype for activations
NEG_SLOPE = 0.3              # LeakyReLU(0.3), as in the torch module


def _leaky(x):
    return jnp.where(x > 0, x, NEG_SLOPE * x)


# ----------------------------------------------------------------------------
# Pallas kernels
# ----------------------------------------------------------------------------
def conv3x3_s1_kernel(x_ref, w_ref, b_ref, o_ref, *, leaky):
    """Valid 3x3 conv, stride 1, one batch element.

    x_ref: (Hin, Win, Cin)  w_ref: (3, 3, Cin, Cout)  b_ref: (1, Cout)
    o_ref: (Ho, Wo, Cout) with Ho = Hin - 2, Wo = Win - 2.
    Per output row: 9 shifted (Wo, Cin) x (Cin, Cout) dots, f32 accumulation.
    """
    Ho, Wo, Cout = o_ref.shape
    w = [[w_ref[ky, kx] for kx in range(3)] for ky in range(3)]   # (Cin, Cout) f32
    bias = b_ref[...]                                             # (1, Cout) f32

    def row(ho, carry):
        acc = jnp.zeros((Wo, Cout), jnp.float32)
        for ky in range(3):
            r = x_ref[ho + ky].astype(jnp.float32)                # (Win, Cin)
            for kx in range(3):
                acc = acc + jnp.dot(r[kx:kx + Wo, :], w[ky][kx],
                                    preferred_element_type=jnp.float32)
        acc = acc + bias
        if leaky:
            acc = _leaky(acc)
        o_ref[ho] = acc.astype(o_ref.dtype)
        return carry

    lax.fori_loop(0, Ho, row, 0)


def conv3x3_s2_kernel(xe_ref, xo_ref, w_ref, b_ref, o_ref, *, leaky):
    """Valid 3x3 conv, stride 2, one batch element.

    The width dim is pre-split into even/odd column phases so every in-kernel
    slice is contiguous: output col wo reads input cols
        2*wo   -> xe[wo],   2*wo+1 -> xo[wo],   2*wo+2 -> xe[wo+1].
    xe_ref: (Hin, ceil(Win/2), Cin)   xo_ref: (Hin, Win//2, Cin)
    """
    Ho, Wo, Cout = o_ref.shape
    w = [[w_ref[ky, kx] for kx in range(3)] for ky in range(3)]
    bias = b_ref[...]

    def row(ho, carry):
        h = ho * 2
        acc = jnp.zeros((Wo, Cout), jnp.float32)
        for ky in range(3):
            re = xe_ref[h + ky].astype(jnp.float32)               # (We, Cin)
            ro = xo_ref[h + ky].astype(jnp.float32)               # (Wodd, Cin)
            acc = acc + jnp.dot(re[0:Wo, :], w[ky][0],
                                preferred_element_type=jnp.float32)
            acc = acc + jnp.dot(ro[0:Wo, :], w[ky][1],
                                preferred_element_type=jnp.float32)
            acc = acc + jnp.dot(re[1:1 + Wo, :], w[ky][2],
                                preferred_element_type=jnp.float32)
        acc = acc + bias
        if leaky:
            acc = _leaky(acc)
        o_ref[ho] = acc.astype(o_ref.dtype)
        return carry

    lax.fori_loop(0, Ho, row, 0)


def attn_kernel(q_ref, k_ref, v_ref, pmw_ref, pmb_ref, o_ref):
    """Per-batch:  beta = softmax(q^T k, dim=queries);  o = pm_w @ (v beta^T) + pm_b.

    q_ref: (N, Cq)  k_ref: (M, Cq)  v_ref: (Cv, M)   (bf16 in HBM)
    pmw_ref: (Cout, Cv) f32   pmb_ref: (Cout, 1) f32
    o_ref:  (Cout, N) f32  -- lane-dense over N = H*W; reshapes straight to NCHW.
    """
    q = q_ref[...].astype(jnp.float32)        # (N, Cq)
    k = k_ref[...].astype(jnp.float32)        # (M, Cq)
    v = v_ref[...].astype(jnp.float32)        # (Cv, M)

    # sT[m, n] = sum_c k[m, c] * q[n, c]   (transposed scores)
    sT = lax.dot_general(k, q, (((1,), (1,)), ((), ())),
                         preferred_element_type=jnp.float32)      # (M, N)
    # softmax over the query-position axis (torch: softmax(dim=1) of (N, M))
    mx = jnp.max(sT, axis=1, keepdims=True)
    e = jnp.exp(sT - mx)
    betaT = e * pl.reciprocal(jnp.sum(e, axis=1, keepdims=True), approx=True)

    # post_map folded in:  pm_w @ (v @ beta^T) + pm_b == (pm_w @ v) @ beta^T + pm_b
    vv = jnp.dot(pmw_ref[...], v, preferred_element_type=jnp.float32)   # (Cout, M)
    o = jnp.dot(vv, betaT, preferred_element_type=jnp.float32)          # (Cout, N)
    o_ref[...] = o + pmb_ref[...]


# ----------------------------------------------------------------------------
# Wrappers around pallas_call
# ----------------------------------------------------------------------------
def conv3x3_s1(x, w, b, leaky):
    """x: (B, Hin, Win, Cin) -> (B, Hin-2, Win-2, Cout); valid conv, stride 1."""
    B, Hin, Win, Cin = x.shape
    Cout = w.shape[-1]
    Ho, Wo = Hin - 2, Win - 2
    return pl.pallas_call(
        partial(conv3x3_s1_kernel, leaky=leaky),
        out_shape=jax.ShapeDtypeStruct((B, Ho, Wo, Cout), ACT_DTYPE),
        grid=(B,),
        in_specs=[
            pl.BlockSpec((None, Hin, Win, Cin), lambda bb: (bb, 0, 0, 0)),
            pl.BlockSpec((3, 3, Cin, Cout), lambda bb: (0, 0, 0, 0)),
            pl.BlockSpec((1, Cout), lambda bb: (0, 0)),
        ],
        out_specs=pl.BlockSpec((None, Ho, Wo, Cout), lambda bb: (bb, 0, 0, 0)),
        compiler_params=pltpu.CompilerParams(dimension_semantics=("parallel",)),
    )(x, w.astype(jnp.float32), b.reshape(1, Cout).astype(jnp.float32))


def conv3x3_s2(x, w, b, leaky):
    """x: (B, Hin, Win, Cin) -> valid conv, stride 2 (even/odd W-phase split)."""
    B, Hin, Win, Cin = x.shape
    Cout = w.shape[-1]
    Ho = (Hin - 3) // 2 + 1
    Wo = (Win - 3) // 2 + 1
    xe = x[:, :, 0::2, :]            # even columns: (B, Hin, ceil(Win/2), Cin)
    xo = x[:, :, 1::2, :]            # odd  columns: (B, Hin, Win//2,      Cin)
    We, Wd = xe.shape[2], xo.shape[2]
    return pl.pallas_call(
        partial(conv3x3_s2_kernel, leaky=leaky),
        out_shape=jax.ShapeDtypeStruct((B, Ho, Wo, Cout), ACT_DTYPE),
        grid=(B,),
        in_specs=[
            pl.BlockSpec((None, Hin, We, Cin), lambda bb: (bb, 0, 0, 0)),
            pl.BlockSpec((None, Hin, Wd, Cin), lambda bb: (bb, 0, 0, 0)),
            pl.BlockSpec((3, 3, Cin, Cout), lambda bb: (0, 0, 0, 0)),
            pl.BlockSpec((1, Cout), lambda bb: (0, 0)),
        ],
        out_specs=pl.BlockSpec((None, Ho, Wo, Cout), lambda bb: (bb, 0, 0, 0)),
        compiler_params=pltpu.CompilerParams(dimension_semantics=("parallel",)),
    )(xe, xo, w.astype(jnp.float32), b.reshape(1, Cout).astype(jnp.float32))


def attention_postmap(q, k, v, pm_w, pm_b):
    """q:(B,N,Cq), k:(B,M,Cq), v:(B,Cv,M) -> (B,Cout,N) f32, post_map applied."""
    # TODO(synk): for large H*W, tile over key blocks (flash-style accumulator
    # with @pl.when init/finalize) so the (M, N) score tile stays within the
    # 64 MiB VMEM of v7x; at the small shapes used here a single tile is fine.
    B, N, Cq = q.shape
    M = k.shape[1]
    Cv = v.shape[1]
    Cout = pm_w.shape[0]
    return pl.pallas_call(
        attn_kernel,
        out_shape=jax.ShapeDtypeStruct((B, Cout, N), jnp.float32),
        grid=(B,),
        in_specs=[
            pl.BlockSpec((None, N, Cq), lambda bb: (bb, 0, 0)),
            pl.BlockSpec((None, M, Cq), lambda bb: (bb, 0, 0)),
            pl.BlockSpec((None, Cv, M), lambda bb: (bb, 0, 0)),
            pl.BlockSpec((Cout, Cv), lambda bb: (0, 0)),
            pl.BlockSpec((Cout, 1), lambda bb: (0, 0)),
        ],
        out_specs=pl.BlockSpec((None, Cout, N), lambda bb: (bb, 0, 0)),
        compiler_params=pltpu.CompilerParams(dimension_semantics=("parallel",)),
    )(q, k, v, pm_w.astype(jnp.float32),
      pm_b.reshape(Cout, 1).astype(jnp.float32))


# ----------------------------------------------------------------------------
# JAX glue: padding (XLA) and parameter init
# ----------------------------------------------------------------------------
def boundarypad(x):
    """NHWC. reflect-pad H by 1, then circular-pad W by 1:
    F.pad(F.pad(x, (0,0,1,1), 'reflect'), (1,1,0,0), 'circular')."""
    x = jnp.pad(x, ((0, 0), (1, 1), (0, 0), (0, 0)), mode="reflect")
    x = jnp.pad(x, ((0, 0), (0, 0), (1, 1), (0, 0)), mode="wrap")
    return x


def init_params(key, in_ch, out_ch):
    mid = in_ch // 2
    qc = in_ch // 8
    shapes = {
        "q1_w": (3, 3, in_ch, mid), "q1_b": (mid,),
        "q2_w": (3, 3, mid, qc),    "q2_b": (qc,),
        "q3_w": (3, 3, qc, qc),     "q3_b": (qc,),
        "k1_w": (3, 3, in_ch, mid), "k1_b": (mid,),
        "k2_w": (3, 3, mid, qc),    "k2_b": (qc,),
        "k3_w": (3, 3, qc, qc),     "k3_b": (qc,),
        "v1_w": (3, 3, in_ch, mid), "v1_b": (mid,),
        "v2_w": (3, 3, mid, out_ch), "v2_b": (out_ch,),
        "v3_w": (3, 3, out_ch, out_ch), "v3_b": (out_ch,),
        "pm_w": (out_ch, out_ch),   "pm_b": (out_ch,),   # 1x1 conv: (Cout, Cin)
    }
    params = {}
    for i, (name, shp) in enumerate(sorted(shapes.items())):
        params[name] = 0.1 * jax.random.normal(
            jax.random.fold_in(key, i), shp, dtype=jnp.float32)
    return params


# ----------------------------------------------------------------------------
# Forward pass (matches Self_attn_conv.forward)
# ----------------------------------------------------------------------------
@jax.jit
def self_attn_conv(p, x_nchw):
    x = jnp.transpose(x_nchw, (0, 2, 3, 1))            # NHWC
    B, H, W, _ = x.shape
    xb = x.astype(ACT_DTYPE)

    # query path: boundarypad + 3x3 stride-1 conv, three times (spatial kept)
    q = conv3x3_s1(boundarypad(xb), p["q1_w"], p["q1_b"], leaky=True)
    q = conv3x3_s1(boundarypad(q),  p["q2_w"], p["q2_b"], leaky=True)
    q = conv3x3_s1(boundarypad(q),  p["q3_w"], p["q3_b"], leaky=False)

    # key / value layer 1 share the same input -> one fused conv call
    mid = p["k1_w"].shape[-1]
    kv1_w = jnp.concatenate([p["k1_w"], p["v1_w"]], axis=-1)
    kv1_b = jnp.concatenate([p["k1_b"], p["v1_b"]], axis=0)
    kv1 = conv3x3_s2(xb, kv1_w, kv1_b, leaky=True)
    k1, v1 = kv1[..., :mid], kv1[..., mid:]

    k2 = conv3x3_s2(k1, p["k2_w"], p["k2_b"], leaky=True)
    k3 = conv3x3_s1(k2, p["k3_w"], p["k3_b"], leaky=False)

    v2 = conv3x3_s2(v1, p["v2_w"], p["v2_b"], leaky=True)
    v3 = conv3x3_s1(v2, p["v3_w"], p["v3_b"], leaky=False)
    # TODO(synk): fuse conv2->conv3 of each of the key/value paths into one
    # kernel keeping the intermediate in VMEM scratch (removes two tiny HBM
    # round trips and two kernel launches).

    # attention (+ fused post_map) --------------------------------------------
    Cq = q.shape[-1]
    Cv = v3.shape[-1]
    M = k3.shape[1] * k3.shape[2]
    qf = q.reshape(B, H * W, Cq)                   # (B, N, Cq)  free reshape
    kf = k3.reshape(B, M, Cq)                      # (B, M, Cq)  free reshape
    vf = v3.reshape(B, M, Cv).transpose(0, 2, 1)   # (B, Cv, M)  tiny transpose

    o = attention_postmap(qf, kf, vf, p["pm_w"], p["pm_b"])   # (B, Cout, N)
    return o.reshape(B, -1, H, W)                  # lane-dense -> NCHW directly


# ----------------------------------------------------------------------------
if __name__ == "__main__":
    B, Cin, H, W = 2, 16, 24, 24     # in_channels must be divisible by 8
    Cout = 8

    x = jax.random.normal(jax.random.PRNGKey(0), (B, Cin, H, W),
                          dtype=jnp.float32)
    params = init_params(jax.random.PRNGKey(1), Cin, Cout)

    out = self_attn_conv(params, x)
    out = jax.block_until_ready(out)

    assert out.shape == (B, Cout, H, W), out.shape
    assert bool(jnp.all(jnp.isfinite(out)))
    print("KERNEL_OK")
</pallas_src>

<mosaic_0001>
module attributes {stable_mosaic.version = 11 : i64} {
  func.func @conv3x3_s2_kernel(%arg0: i32, %arg1: memref<1x24x12x16xbf16, #tpu.memory_space<vmem>>, %arg2: memref<1x24x12x16xbf16, #tpu.memory_space<vmem>>, %arg3: memref<3x3x16x16xf32, #tpu.memory_space<vmem>>, %arg4: memref<1x16xf32, #tpu.memory_space<vmem>>, %arg5: memref<1x11x11x16xbf16, #tpu.memory_space<vmem>>) attributes {dimension_semantics = [#tpu.dimension_semantics<parallel>], iteration_bounds = array<i64: 2>, scalar_prefetch = 0 : i64, scratch_operands = 0 : i64, tpu.core_type = #tpu.core_type<tc>, window_params = [{transform_indices = @transform_0, window_bounds = array<i64: 1, 24, 12, 16>}, {transform_indices = @transform_1, window_bounds = array<i64: 1, 24, 12, 16>}, {pipeline_mode = #tpu.pipeline_mode<synchronous>, transform_indices = @transform_2, window_bounds = array<i64: 3, 3, 16, 16>}, {pipeline_mode = #tpu.pipeline_mode<synchronous>, transform_indices = @transform_3, window_bounds = array<i64: 1, 16>}, {transform_indices = @transform_4, window_bounds = array<i64: 1, 11, 11, 16>}]} {
    %c0 = arith.constant 0 : index
    %c0_0 = arith.constant 0 : index
    %c0_1 = arith.constant 0 : index
    %c0_2 = arith.constant 0 : index
    %0 = vector.load %arg3[%c0, %c0_0, %c0_1, %c0_2] : memref<3x3x16x16xf32, #tpu.memory_space<vmem>>, vector<1x1x16x16xf32>
    %1 = vector.shape_cast %0 : vector<1x1x16x16xf32> to vector<16x16xf32>
    %c0_3 = arith.constant 0 : index
    %c1 = arith.constant 1 : index
    %c0_4 = arith.constant 0 : index
    %c0_5 = arith.constant 0 : index
    %2 = vector.load %arg3[%c0_3, %c1, %c0_4, %c0_5] : memref<3x3x16x16xf32, #tpu.memory_space<vmem>>, vector<1x1x16x16xf32>
    %3 = vector.shape_cast %2 : vector<1x1x16x16xf32> to vector<16x16xf32>
    %c0_6 = arith.constant 0 : index
    %c2 = arith.constant 2 : index
    %c0_7 = arith.constant 0 : index
    %c0_8 = arith.constant 0 : index
    %4 = vector.load %arg3[%c0_6, %c2, %c0_7, %c0_8] : memref<3x3x16x16xf32, #tpu.memory_space<vmem>>, vector<1x1x16x16xf32>
    %5 = vector.shape_cast %4 : vector<1x1x16x16xf32> to vector<16x16xf32>
    %c1_9 = arith.constant 1 : index
    %c0_10 = arith.constant 0 : index
    %c0_11 = arith.constant 0 : index
    %c0_12 = arith.constant 0 : index
    %6 = vector.load %arg3[%c1_9, %c0_10, %c0_11, %c0_12] : memref<3x3x16x16xf32, #tpu.memory_space<vmem>>, vector<1x1x16x16xf32>
    %7 = vector.shape_cast %6 : vector<1x1x16x16xf32> to vector<16x16xf32>
    %c1_13 = arith.constant 1 : index
    %c1_14 = arith.constant 1 : index
    %c0_15 = arith.constant 0 : index
    %c0_16 = arith.constant 0 : index
    %8 = vector.load %arg3[%c1_13, %c1_14, %c0_15, %c0_16] : memref<3x3x16x16xf32, #tpu.memory_space<vmem>>, vector<1x1x16x16xf32>
    %9 = vector.shape_cast %8 : vector<1x1x16x16xf32> to vector<16x16xf32>
    %c1_17 = arith.constant 1 : index
    %c2_18 = arith.constant 2 : index
    %c0_19 = arith.constant 0 : index
    %c0_20 = arith.constant 0 : index
    %10 = vector.load %arg3[%c1_17, %c2_18, %c0_19, %c0_20] : memref<3x3x16x16xf32, #tpu.memory_space<vmem>>, vector<1x1x16x16xf32>
    %11 = vector.shape_cast %10 : vector<1x1x16x16xf32> to vector<16x16xf32>
    %c2_21 = arith.constant 2 : index
    %c0_22 = arith.constant 0 : index
    %c0_23 = arith.constant 0 : index
    %c0_24 = arith.constant 0 : index
    %12 = vector.load %arg3[%c2_21, %c0_22, %c0_23, %c0_24] : memref<3x3x16x16xf32, #tpu.memory_space<vmem>>, vector<1x1x16x16xf32>
    %13 = vector.shape_cast %12 : vector<1x1x16x16xf32> to vector<16x16xf32>
    %c2_25 = arith.constant 2 : index
    %c1_26 = arith.constant 1 : index
    %c0_27 = arith.constant 0 : index
    %c0_28 = arith.constant 0 : index
    %14 = vector.load %arg3[%c2_25, %c1_26, %c0_27, %c0_28] : memref<3x3x16x16xf32, #tpu.memory_space<vmem>>, vector<1x1x16x16xf32>
    %15 = vector.shape_cast %14 : vector<1x1x16x16xf32> to vector<16x16xf32>
    %c2_29 = arith.constant 2 : index
    %c2_30 = arith.constant 2 : index
    %c0_31 = arith.constant 0 : index
    %c0_32 = arith.constant 0 : index
    %16 = vector.load %arg3[%c2_29, %c2_30, %c0_31, %c0_32] : memref<3x3x16x16xf32, #tpu.memory_space<vmem>>, vector<1x1x16x16xf32>
    %17 = vector.shape_cast %16 : vector<1x1x16x16xf32> to vector<16x16xf32>
    %c0_33 = arith.constant 0 : index
    %c0_34 = arith.constant 0 : index
    %18 = vector.load %arg4[%c0_33, %c0_34] : memref<1x16xf32, #tpu.memory_space<vmem>>, vector<1x16xf32>
    %c0_i32 = arith.constant 0 : i32
    %c11_i32 = arith.constant 11 : i32
    %19 = arith.addi %c0_i32, %c11_i32 : i32
    %c1_i32 = arith.constant 1 : i32
    scf.for %arg6 = %c0_i32 to %19 step %c1_i32  : i32 {
      %c2_i32 = arith.constant 2 : i32
      %20 = arith.muli %arg6, %c2_i32 : i32
      %cst = arith.constant 0.000000e+00 : f32
      %21 = vector.broadcast %cst : f32 to vector<11x16xf32>
      %c0_i32_36 = arith.constant 0 : i32
      %22 = arith.addi %20, %c0_i32_36 : i32
      %c0_37 = arith.constant 0 : index
      %23 = arith.index_cast %22 : i32 to index
      %c0_38 = arith.constant 0 : index
      %c0_39 = arith.constant 0 : index
      %24 = vector.load %arg1[%c0_37, %23, %c0_38, %c0_39] : memref<1x24x12x16xbf16, #tpu.memory_space<vmem>>, vector<1x1x12x16xbf16>
      %25 = vector.shape_cast %24 : vector<1x1x12x16xbf16> to vector<12x16xbf16>
      %26 = arith.extf %25 : vector<12x16xbf16> to vector<12x16xf32>
      %c0_i32_40 = arith.constant 0 : i32
      %27 = arith.addi %20, %c0_i32_40 : i32
      %c0_41 = arith.constant 0 : index
      %28 = arith.index_cast %27 : i32 to index
      %c0_42 = arith.constant 0 : index
      %c0_43 = arith.constant 0 : index
      %29 = vector.load %arg2[%c0_41, %28, %c0_42, %c0_43] : memref<1x24x12x16xbf16, #tpu.memory_space<vmem>>, vector<1x1x12x16xbf16>
      %30 = vector.shape_cast %29 : vector<1x1x12x16xbf16> to vector<12x16xbf16>
      %31 = arith.extf %30 : vector<12x16xbf16> to vector<12x16xf32>
      %32 = vector.extract_strided_slice %26 {offsets = [0, 0], sizes = [11, 16], strides = [1, 1]} : vector<12x16xf32> to vector<11x16xf32>
      %cst_44 = arith.constant dense<0.000000e+00> : vector<11x16xf32>
      %33 = tpu.matmul %32, %1, %cst_44 {dimension_numbers = #tpu.dot_dimension_numbers<[1], [0], [0], [1], [0, 0, 1, 1], [], []>} : vector<11x16xf32>, vector<16x16xf32>, vector<11x16xf32> -> vector<11x16xf32>
      %34 = arith.addf %21, %33 : vector<11x16xf32>
      %35 = vector.extract_strided_slice %31 {offsets = [0, 0], sizes = [11, 16], strides = [1, 1]} : vector<12x16xf32> to vector<11x16xf32>
      %cst_45 = arith.constant dense<0.000000e+00> : vector<11x16xf32>
      %36 = tpu.matmul %35, %3, %cst_45 {dimension_numbers = #tpu.dot_dimension_numbers<[1], [0], [0], [1], [0, 0, 1, 1], [], []>} : vector<11x16xf32>, vector<16x16xf32>, vector<11x16xf32> -> vector<11x16xf32>
      %37 = arith.addf %34, %36 : vector<11x16xf32>
      %38 = vector.extract_strided_slice %26 {offsets = [1, 0], sizes = [11, 16], strides = [1, 1]} : vector<12x16xf32> to vector<11x16xf32>
      %cst_46 = arith.constant dense<0.000000e+00> : vector<11x16xf32>
      %39 = tpu.matmul %38, %5, %cst_46 {dimension_numbers = #tpu.dot_dimension_numbers<[1], [0], [0], [1], [0, 0, 1, 1], [], []>} : vector<11x16xf32>, vector<16x16xf32>, vector<11x16xf32> -> vector<11x16xf32>
      %40 = arith.addf %37, %39 : vector<11x16xf32>
      %c1_i32_47 = arith.constant 1 : i32
      %41 = arith.addi %20, %c1_i32_47 : i32
      %c0_48 = arith.constant 0 : index
      %42 = arith.index_cast %41 : i32 to index
      %c0_49 = arith.constant 0 : index
      %c0_50 = arith.constant 0 : index
      %43 = vector.load %arg1[%c0_48, %42, %c0_49, %c0_50] : memref<1x24x12x16xbf16, #tpu.memory_space<vmem>>, vector<1x1x12x16xbf16>
      %44 = vector.shape_cast %43 : vector<1x1x12x16xbf16> to vector<12x16xbf16>
      %45 = arith.extf %44 : vector<12x16xbf16> to vector<12x16xf32>
      %c1_i32_51 = arith.constant 1 : i32
      %46 = arith.addi %20, %c1_i32_51 : i32
      %c0_52 = arith.constant 0 : index
      %47 = arith.index_cast %46 : i32 to index
      %c0_53 = arith.constant 0 : index
      %c0_54 = arith.constant 0 : index
      %48 = vector.load %arg2[%c0_52, %47, %c0_53, %c0_54] : memref<1x24x12x16xbf16, #tpu.memory_space<vmem>>, vector<1x1x12x16xbf16>
      %49 = vector.shape_cast %48 : vector<1x1x12x16xbf16> to vector<12x16xbf16>
      %50 = arith.extf %49 : vector<12x16xbf16> to vector<12x16xf32>
      %51 = vector.extract_strided_slice %45 {offsets = [0, 0], sizes = [11, 16], strides = [1, 1]} : vector<12x16xf32> to vector<11x16xf32>
      %cst_55 = arith.constant dense<0.000000e+00> : vector<11x16xf32>
      %52 = tpu.matmul %51, %7, %cst_55 {dimension_numbers = #tpu.dot_dimension_numbers<[1], [0], [0], [1], [0, 0, 1, 1], [], []>} : vector<11x16xf32>, vector<16x16xf32>, vector<11x16xf32> -> vector<11x16xf32>
      %53 = arith.addf %40, %52 : vector<11x16xf32>
      %54 = vector.extract_strided_slice %50 {offsets = [0, 0], sizes = [11, 16], strides = [1, 1]} : vector<12x16xf32> to vector<11x16xf32>
      %cst_56 = arith.constant dense<0.000000e+00> : vector<11x16xf32>
      %55 = tpu.matmul %54, %9, %cst_56 {dimension_numbers = #tpu.dot_dimension_numbers<[1], [0], [0], [1], [0, 0, 1, 1], [], []>} : vector<11x16xf32>, vector<16x16xf32>, vector<11x16xf32> -> vector<11x16xf32>
      %56 = arith.addf %53, %55 : vector<11x16xf32>
      %57 = vector.extract_strided_slice %45 {offsets = [1, 0], sizes = [11, 16], strides = [1, 1]} : vector<12x16xf32> to vector<11x16xf32>
      %cst_57 = arith.constant dense<0.000000e+00> : vector<11x16xf32>
      %58 = tpu.matmul %57, %11, %cst_57 {dimension_numbers = #tpu.dot_dimension_numbers<[1], [0], [0], [1], [0, 0, 1, 1], [], []>} : vector<11x16xf32>, vector<16x16xf32>, vector<11x16xf32> -> vector<11x16xf32>
      %59 = arith.addf %56, %58 : vector<11x16xf32>
      %c2_i32_58 = arith.constant 2 : i32
      %60 = arith.addi %20, %c2_i32_58 : i32
      %c0_59 = arith.constant 0 : index
      %61 = arith.index_cast %60 : i32 to index
      %c0_60 = arith.constant 0 : index
      %c0_61 = arith.constant 0 : index
      %62 = vector.load %arg1[%c0_59, %61, %c0_60, %c0_61] : memref<1x24x12x16xbf16, #tpu.memory_space<vmem>>, vector<1x1x12x16xbf16>
      %63 = vector.shape_cast %62 : vector<1x1x12x16xbf16> to vector<12x16xbf16>
      %64 = arith.extf %63 : vector<12x16xbf16> to vector<12x16xf32>
      %c2_i32_62 = arith.constant 2 : i32
      %65 = arith.addi %20, %c2_i32_62 : i32
      %c0_63 = arith.constant 0 : index
      %66 = arith.index_cast %65 : i32 to index
      %c0_64 = arith.constant 0 : index
      %c0_65 = arith.constant 0 : index
      %67 = vector.load %arg2[%c0_63, %66, %c0_64, %c0_65] : memref<1x24x12x16xbf16, #tpu.memory_space<vmem>>, vector<1x1x12x16xbf16>
      %68 = vector.shape_cast %67 : vector<1x1x12x16xbf16> to vector<12x16xbf16>
      %69 = arith.extf %68 : vector<12x16xbf16> to vector<12x16xf32>
      %70 = vector.extract_strided_slice %64 {offsets = [0, 0], sizes = [11, 16], strides = [1, 1]} : vector<12x16xf32> to vector<11x16xf32>
      %cst_66 = arith.constant dense<0.000000e+00> : vector<11x16xf32>
      %71 = tpu.matmul %70, %13, %cst_66 {dimension_numbers = #tpu.dot_dimension_numbers<[1], [0], [0], [1], [0, 0, 1, 1], [], []>} : vector<11x16xf32>, vector<16x16xf32>, vector<11x16xf32> -> vector<11x16xf32>
      %72 = arith.addf %59, %71 : vector<11x16xf32>
      %73 = vector.extract_strided_slice %69 {offsets = [0, 0], sizes = [11, 16], strides = [1, 1]} : vector<12x16xf32> to vector<11x16xf32>
      %cst_67 = arith.constant dense<0.000000e+00> : vector<11x16xf32>
      %74 = tpu.matmul %73, %15, %cst_67 {dimension_numbers = #tpu.dot_dimension_numbers<[1], [0], [0], [1], [0, 0, 1, 1], [], []>} : vector<11x16xf32>, vector<16x16xf32>, vector<11x16xf32> -> vector<11x16xf32>
      %75 = arith.addf %72, %74 : vector<11x16xf32>
      %76 = vector.extract_strided_slice %64 {offsets = [1, 0], sizes = [11, 16], strides = [1, 1]} : vector<12x16xf32> to vector<11x16xf32>
      %cst_68 = arith.constant dense<0.000000e+00> : vector<11x16xf32>
      %77 = tpu.matmul %76, %17, %cst_68 {dimension_numbers = #tpu.dot_dimension_numbers<[1], [0], [0], [1], [0, 0, 1, 1], [], []>} : vector<11x16xf32>, vector<16x16xf32>, vector<11x16xf32> -> vector<11x16xf32>
      %78 = arith.addf %75, %77 : vector<11x16xf32>
      %79 = vector.broadcast %18 : vector<1x16xf32> to vector<11x16xf32>
      %80 = arith.addf %78, %79 : vector<11x16xf32>
      %cst_69 = arith.constant 0.000000e+00 : f32
      %81 = vector.broadcast %cst_69 : f32 to vector<11x16xf32>
      %82 = arith.cmpf ogt, %80, %81 : vector<11x16xf32>
      %cst_70 = arith.constant 3.000000e-01 : f32
      %83 = vector.broadcast %cst_70 : f32 to vector<11x16xf32>
      %84 = arith.mulf %83, %80 : vector<11x16xf32>
      %85 = arith.select %82, %80, %84 : vector<11x16xi1>, vector<11x16xf32>
      %86 = arith.truncf %85 : vector<11x16xf32> to vector<11x16xbf16>
      %c0_71 = arith.constant 0 : index
      %87 = arith.index_cast %arg6 : i32 to index
      %c0_72 = arith.constant 0 : index
      %c0_73 = arith.constant 0 : index
      %88 = vector.load %arg5[%c0_71, %87, %c0_72, %c0_73] : memref<1x11x11x16xbf16, #tpu.memory_space<vmem>>, vector<1x1x11x16xbf16>
      %89 = vector.shape_cast %88 : vector<1x1x11x16xbf16> to vector<11x16xbf16>
      %90 = vector.shape_cast %86 : vector<11x16xbf16> to vector<1x1x11x16xbf16>
      tpu.vector_store %arg5[%c0_71, %87, %c0_72, %c0_73], %90 {strides = array<i32>} : memref<1x11x11x16xbf16, #tpu.memory_space<vmem>>, vector<1x1x11x16xbf16>,
    }
    %c11_i32_35 = arith.constant 11 : i32
    return
  }
  func.func @transform_0(%arg0: i32) -> (i32, i32, i32, i32) {
    %c0_i32 = arith.constant 0 : i32
    %c0_i32_0 = arith.constant 0 : i32
    %c0_i32_1 = arith.constant 0 : i32
    %c0_i32_2 = arith.constant 0 : i32
    return %arg0, %c0_i32, %c0_i32_0, %c0_i32_1 : i32, i32, i32, i32
  }
  func.func @transform_1(%arg0: i32) -> (i32, i32, i32, i32) {
    %c0_i32 = arith.constant 0 : i32
    %c0_i32_0 = arith.constant 0 : i32
    %c0_i32_1 = arith.constant 0 : i32
    %c0_i32_2 = arith.constant 0 : i32
    return %arg0, %c0_i32, %c0_i32_0, %c0_i32_1 : i32, i32, i32, i32
  }
  func.func @transform_2(%arg0: i32) -> (i32, i32, i32, i32) {
    %c0_i32 = arith.constant 0 : i32
    %c0_i32_0 = arith.constant 0 : i32
    %c0_i32_1 = arith.constant 0 : i32
    %c0_i32_2 = arith.constant 0 : i32
    %c0_i32_3 = arith.constant 0 : i32
    return %c0_i32, %c0_i32_0, %c0_i32_1, %c0_i32_2 : i32, i32, i32, i32
  }
  func.func @transform_3(%arg0: i32) -> (i32, i32) {
    %c0_i32 = arith.constant 0 : i32
    %c0_i32_0 = arith.constant 0 : i32
    %c0_i32_1 = arith.constant 0 : i32
    return %c0_i32, %c0_i32_0 : i32, i32
  }
  func.func @transform_4(%arg0: i32) -> (i32, i32, i32, i32) {
    %c0_i32 = arith.constant 0 : i32
    %c0_i32_0 = arith.constant 0 : i32
    %c0_i32_1 = arith.constant 0 : i32
    %c0_i32_2 = arith.constant 0 : i32
    return %arg0, %c0_i32, %c0_i32_0, %c0_i32_1 : i32, i32, i32, i32
  }
}

module attributes {stable_mosaic.version = 11 : i64} {
  func.func @conv3x3_s2_kernel(%arg0: i32, %arg1: memref<1x11x6x8xbf16, #tpu.memory_space<vmem>>, %arg2: memref<1x11x5x8xbf16, #tpu.memory_space<vmem>>, %arg3: memref<3x3x8x8xf32, #tpu.memory_space<vmem>>, %arg4: memref<1x8xf32, #tpu.memory_space<vmem>>, %arg5: memref<1x5x5x8xbf16, #tpu.memory_space<vmem>>) attributes {dimension_semantics = [#tpu.dimension_semantics<parallel>], iteration_bounds = array<i64: 2>, scalar_prefetch = 0 : i64, scratch_operands = 0 : i64, tpu.core_type = #tpu.core_type<tc>, window_params = [{transform_indices = @transform_0, window_bounds = array<i64: 1, 11, 6, 8>}, {transform_indices = @transform_1, window_bounds = array<i64: 1, 11, 5, 8>}, {pipeline_mode = #tpu.pipeline_mode<synchronous>, transform_indices = @transform_2, window_bounds = array<i64: 3, 3, 8, 8>}, {pipeline_mode = #tpu.pipeline_mode<synchronous>, transform_indices = @transform_3, window_bounds = array<i64: 1, 8>}, {transform_indices = @transform_4, window_bounds = array<i64: 1, 5, 5, 8>}]} {
    %c0 = arith.constant 0 : index
    %c0_0 = arith.constant 0 : index
    %c0_1 = arith.constant 0 : index
    %c0_2 = arith.constant 0 : index
    %0 = vector.load %arg3[%c0, %c0_0, %c0_1, %c0_2] : memref<3x3x8x8xf32, #tpu.memory_space<vmem>>, vector<1x1x8x8xf32>
    %1 = vector.shape_cast %0 : vector<1x1x8x8xf32> to vector<8x8xf32>
    %c0_3 = arith.constant 0 : index
    %c1 = arith.constant 1 : index
    %c0_4 = arith.constant 0 : index
    %c0_5 = arith.constant 0 : index
    %2 = vector.load %arg3[%c0_3, %c1, %c0_4, %c0_5] : memref<3x3x8x8xf32, #tpu.memory_space<vmem>>, vector<1x1x8x8xf32>
    %3 = vector.shape_cast %2 : vector<1x1x8x8xf32> to vector<8x8xf32>
    %c0_6 = arith.constant 0 : index
    %c2 = arith.constant 2 : index
    %c0_7 = arith.constant 0 : index
    %c0_8 = arith.constant 0 : index
    %4 = vector.load %arg3[%c0_6, %c2, %c0_7, %c0_8] : memref<3x3x8x8xf32, #tpu.memory_space<vmem>>, vector<1x1x8x8xf32>
    %5 = vector.shape_cast %4 : vector<1x1x8x8xf32> to vector<8x8xf32>
    %c1_9 = arith.constant 1 : index
    %c0_10 = arith.constant 0 : index
    %c0_11 = arith.constant 0 : index
    %c0_12 = arith.constant 0 : index
    %6 = vector.load %arg3[%c1_9, %c0_10, %c0_11, %c0_12] : memref<3x3x8x8xf32, #tpu.memory_space<vmem>>, vector<1x1x8x8xf32>
    %7 = vector.shape_cast %6 : vector<1x1x8x8xf32> to vector<8x8xf32>
    %c1_13 = arith.constant 1 : index
    %c1_14 = arith.constant 1 : index
    %c0_15 = arith.constant 0 : index
    %c0_16 = arith.constant 0 : index
    %8 = vector.load %arg3[%c1_13, %c1_14, %c0_15, %c0_16] : memref<3x3x8x8xf32, #tpu.memory_space<vmem>>, vector<1x1x8x8xf32>
    %9 = vector.shape_cast %8 : vector<1x1x8x8xf32> to vector<8x8xf32>
    %c1_17 = arith.constant 1 : index
    %c2_18 = arith.constant 2 : index
    %c0_19 = arith.constant 0 : index
    %c0_20 = arith.constant 0 : index
    %10 = vector.load %arg3[%c1_17, %c2_18, %c0_19, %c0_20] : memref<3x3x8x8xf32, #tpu.memory_space<vmem>>, vector<1x1x8x8xf32>
    %11 = vector.shape_cast %10 : vector<1x1x8x8xf32> to vector<8x8xf32>
    %c2_21 = arith.constant 2 : index
    %c0_22 = arith.constant 0 : index
    %c0_23 = arith.constant 0 : index
    %c0_24 = arith.constant 0 : index
    %12 = vector.load %arg3[%c2_21, %c0_22, %c0_23, %c0_24] : memref<3x3x8x8xf32, #tpu.memory_space<vmem>>, vector<1x1x8x8xf32>
    %13 = vector.shape_cast %12 : vector<1x1x8x8xf32> to vector<8x8xf32>
    %c2_25 = arith.constant 2 : index
    %c1_26 = arith.constant 1 : index
    %c0_27 = arith.constant 0 : index
    %c0_28 = arith.constant 0 : index
    %14 = vector.load %arg3[%c2_25, %c1_26, %c0_27, %c0_28] : memref<3x3x8x8xf32, #tpu.memory_space<vmem>>, vector<1x1x8x8xf32>
    %15 = vector.shape_cast %14 : vector<1x1x8x8xf32> to vector<8x8xf32>
    %c2_29 = arith.constant 2 : index
    %c2_30 = arith.constant 2 : index
    %c0_31 = arith.constant 0 : index
    %c0_32 = arith.constant 0 : index
    %16 = vector.load %arg3[%c2_29, %c2_30, %c0_31, %c0_32] : memref<3x3x8x8xf32, #tpu.memory_space<vmem>>, vector<1x1x8x8xf32>
    %17 = vector.shape_cast %16 : vector<1x1x8x8xf32> to vector<8x8xf32>
    %c0_33 = arith.constant 0 : index
    %c0_34 = arith.constant 0 : index
    %18 = vector.load %arg4[%c0_33, %c0_34] : memref<1x8xf32, #tpu.memory_space<vmem>>, vector<1x8xf32>
    %c0_i32 = arith.constant 0 : i32
    %c5_i32 = arith.constant 5 : i32
    %19 = arith.addi %c0_i32, %c5_i32 : i32
    %c1_i32 = arith.constant 1 : i32
    scf.for %arg6 = %c0_i32 to %19 step %c1_i32  : i32 {
      %c2_i32 = arith.constant 2 : i32
      %20 = arith.muli %arg6, %c2_i32 : i32
      %cst = arith.constant 0.000000e+00 : f32
      %21 = vector.broadcast %cst : f32 to vector<5x8xf32>
      %c0_i32_36 = arith.constant 0 : i32
      %22 = arith.addi %20, %c0_i32_36 : i32
      %c0_37 = arith.constant 0 : index
      %23 = arith.index_cast %22 : i32 to index
      %c0_38 = arith.constant 0 : index
      %c0_39 = arith.constant 0 : index
      %24 = vector.load %arg1[%c0_37, %23, %c0_38, %c0_39] : memref<1x11x6x8xbf16, #tpu.memory_space<vmem>>, vector<1x1x6x8xbf16>
      %25 = vector.shape_cast %24 : vector<1x1x6x8xbf16> to vector<6x8xbf16>
      %26 = arith.extf %25 : vector<6x8xbf16> to vector<6x8xf32>
      %c0_i32_40 = arith.constant 0 : i32
      %27 = arith.addi %20, %c0_i32_40 : i32
      %c0_41 = arith.constant 0 : index
      %28 = arith.index_cast %27 : i32 to index
      %c0_42 = arith.constant 0 : index
      %c0_43 = arith.constant 0 : index
      %29 = vector.load %arg2[%c0_41, %28, %c0_42, %c0_43] : memref<1x11x5x8xbf16, #tpu.memory_space<vmem>>, vector<1x1x5x8xbf16>
      %30 = vector.shape_cast %29 : vector<1x1x5x8xbf16> to vector<5x8xbf16>
      %31 = arith.extf %30 : vector<5x8xbf16> to vector<5x8xf32>
      %32 = vector.extract_strided_slice %26 {offsets = [0, 0], sizes = [5, 8], strides = [1, 1]} : vector<6x8xf32> to vector<5x8xf32>
      %cst_44 = arith.constant dense<0.000000e+00> : vector<5x8xf32>
      %33 = tpu.matmul %32, %1, %cst_44 {dimension_numbers = #tpu.dot_dimension_numbers<[1], [0], [0], [1], [0, 0, 1, 1], [], []>} : vector<5x8xf32>, vector<8x8xf32>, vector<5x8xf32> -> vector<5x8xf32>
      %34 = arith.addf %21, %33 : vector<5x8xf32>
      %cst_45 = arith.constant dense<0.000000e+00> : vector<5x8xf32>
      %35 = tpu.matmul %31, %3, %cst_45 {dimension_numbers = #tpu.dot_dimension_numbers<[1], [0], [0], [1], [0, 0, 1, 1], [], []>} : vector<5x8xf32>, vector<8x8xf32>, vector<5x8xf32> -> vector<5x8xf32>
      %36 = arith.addf %34, %35 : vector<5x8xf32>
      %37 = vector.extract_strided_slice %26 {offsets = [1, 0], sizes = [5, 8], strides = [1, 1]} : vector<6x8xf32> to vector<5x8xf32>
      %cst_46 = arith.constant dense<0.000000e+00> : vector<5x8xf32>
      %38 = tpu.matmul %37, %5, %cst_46 {dimension_numbers = #tpu.dot_dimension_numbers<[1], [0], [0], [1], [0, 0, 1, 1], [], []>} : vector<5x8xf32>, vector<8x8xf32>, vector<5x8xf32> -> vector<5x8xf32>
      %39 = arith.addf %36, %38 : vector<5x8xf32>
      %c1_i32_47 = arith.constant 1 : i32
      %40 = arith.addi %20, %c1_i32_47 : i32
      %c0_48 = arith.constant 0 : index
      %41 = arith.index_cast %40 : i32 to index
      %c0_49 = arith.constant 0 : index
      %c0_50 = arith.constant 0 : index
      %42 = vector.load %arg1[%c0_48, %41, %c0_49, %c0_50] : memref<1x11x6x8xbf16, #tpu.memory_space<vmem>>, vector<1x1x6x8xbf16>
      %43 = vector.shape_cast %42 : vector<1x1x6x8xbf16> to vector<6x8xbf16>
      %44 = arith.extf %43 : vector<6x8xbf16> to vector<6x8xf32>
      %c1_i32_51 = arith.constant 1 : i32
      %45 = arith.addi %20, %c1_i32_51 : i32
      %c0_52 = arith.constant 0 : index
      %46 = arith.index_cast %45 : i32 to index
      %c0_53 = arith.constant 0 : index
      %c0_54 = arith.constant 0 : index
      %47 = vector.load %arg2[%c0_52, %46, %c0_53, %c0_54] : memref<1x11x5x8xbf16, #tpu.memory_space<vmem>>, vector<1x1x5x8xbf16>
      %48 = vector.shape_cast %47 : vector<1x1x5x8xbf16> to vector<5x8xbf16>
      %49 = arith.extf %48 : vector<5x8xbf16> to vector<5x8xf32>
      %50 = vector.extract_strided_slice %44 {offsets = [0, 0], sizes = [5, 8], strides = [1, 1]} : vector<6x8xf32> to vector<5x8xf32>
      %cst_55 = arith.constant dense<0.000000e+00> : vector<5x8xf32>
      %51 = tpu.matmul %50, %7, %cst_55 {dimension_numbers = #tpu.dot_dimension_numbers<[1], [0], [0], [1], [0, 0, 1, 1], [], []>} : vector<5x8xf32>, vector<8x8xf32>, vector<5x8xf32> -> vector<5x8xf32>
      %52 = arith.addf %39, %51 : vector<5x8xf32>
      %cst_56 = arith.constant dense<0.000000e+00> : vector<5x8xf32>
      %53 = tpu.matmul %49, %9, %cst_56 {dimension_numbers = #tpu.dot_dimension_numbers<[1], [0], [0], [1], [0, 0, 1, 1], [], []>} : vector<5x8xf32>, vector<8x8xf32>, vector<5x8xf32> -> vector<5x8xf32>
      %54 = arith.addf %52, %53 : vector<5x8xf32>
      %55 = vector.extract_strided_slice %44 {offsets = [1, 0], sizes = [5, 8], strides = [1, 1]} : vector<6x8xf32> to vector<5x8xf32>
      %cst_57 = arith.constant dense<0.000000e+00> : vector<5x8xf32>
      %56 = tpu.matmul %55, %11, %cst_57 {dimension_numbers = #tpu.dot_dimension_numbers<[1], [0], [0], [1], [0, 0, 1, 1], [], []>} : vector<5x8xf32>, vector<8x8xf32>, vector<5x8xf32> -> vector<5x8xf32>
      %57 = arith.addf %54, %56 : vector<5x8xf32>
      %c2_i32_58 = arith.constant 2 : i32
      %58 = arith.addi %20, %c2_i32_58 : i32
      %c0_59 = arith.constant 0 : index
      %59 = arith.index_cast %58 : i32 to index
      %c0_60 = arith.constant 0 : index
      %c0_61 = arith.constant 0 : index
      %60 = vector.load %arg1[%c0_59, %59, %c0_60, %c0_61] : memref<1x11x6x8xbf16, #tpu.memory_space<vmem>>, vector<1x1x6x8xbf16>
      %61 = vector.shape_cast %60 : vector<1x1x6x8xbf16> to vector<6x8xbf16>
      %62 = arith.extf %61 : vector<6x8xbf16> to vector<6x8xf32>
      %c2_i32_62 = arith.constant 2 : i32
      %63 = arith.addi %20, %c2_i32_62 : i32
      %c0_63 = arith.constant 0 : index
      %64 = arith.index_cast %63 : i32 to index
      %c0_64 = arith.constant 0 : index
      %c0_65 = arith.constant 0 : index
      %65 = vector.load %arg2[%c0_63, %64, %c0_64, %c0_65] : memref<1x11x5x8xbf16, #tpu.memory_space<vmem>>, vector<1x1x5x8xbf16>
      %66 = vector.shape_cast %65 : vector<1x1x5x8xbf16> to vector<5x8xbf16>
      %67 = arith.extf %66 : vector<5x8xbf16> to vector<5x8xf32>
      %68 = vector.extract_strided_slice %62 {offsets = [0, 0], sizes = [5, 8], strides = [1, 1]} : vector<6x8xf32> to vector<5x8xf32>
      %cst_66 = arith.constant dense<0.000000e+00> : vector<5x8xf32>
      %69 = tpu.matmul %68, %13, %cst_66 {dimension_numbers = #tpu.dot_dimension_numbers<[1], [0], [0], [1], [0, 0, 1, 1], [], []>} : vector<5x8xf32>, vector<8x8xf32>, vector<5x8xf32> -> vector<5x8xf32>
      %70 = arith.addf %57, %69 : vector<5x8xf32>
      %cst_67 = arith.constant dense<0.000000e+00> : vector<5x8xf32>
      %71 = tpu.matmul %67, %15, %cst_67 {dimension_numbers = #tpu.dot_dimension_numbers<[1], [0], [0], [1], [0, 0, 1, 1], [], []>} : vector<5x8xf32>, vector<8x8xf32>, vector<5x8xf32> -> vector<5x8xf32>
      %72 = arith.addf %70, %71 : vector<5x8xf32>
      %73 = vector.extract_strided_slice %62 {offsets = [1, 0], sizes = [5, 8], strides = [1, 1]} : vector<6x8xf32> to vector<5x8xf32>
      %cst_68 = arith.constant dense<0.000000e+00> : vector<5x8xf32>
      %74 = tpu.matmul %73, %17, %cst_68 {dimension_numbers = #tpu.dot_dimension_numbers<[1], [0], [0], [1], [0, 0, 1, 1], [], []>} : vector<5x8xf32>, vector<8x8xf32>, vector<5x8xf32> -> vector<5x8xf32>
      %75 = arith.addf %72, %74 : vector<5x8xf32>
      %76 = vector.broadcast %18 : vector<1x8xf32> to vector<5x8xf32>
      %77 = arith.addf %75, %76 : vector<5x8xf32>
      %cst_69 = arith.constant 0.000000e+00 : f32
      %78 = vector.broadcast %cst_69 : f32 to vector<5x8xf32>
      %79 = arith.cmpf ogt, %77, %78 : vector<5x8xf32>
      %cst_70 = arith.constant 3.000000e-01 : f32
      %80 = vector.broadcast %cst_70 : f32 to vector<5x8xf32>
      %81 = arith.mulf %80, %77 : vector<5x8xf32>
      %82 = arith.select %79, %77, %81 : vector<5x8xi1>, vector<5x8xf32>
      %83 = arith.truncf %82 : vector<5x8xf32> to vector<5x8xbf16>
      %c0_71 = arith.constant 0 : index
      %84 = arith.index_cast %arg6 : i32 to index
      %c0_72 = arith.constant 0 : index
      %c0_73 = arith.constant 0 : index
      %85 = vector.load %arg5[%c0_71, %84, %c0_72, %c0_73] : memref<1x5x5x8xbf16, #tpu.memory_space<vmem>>, vector<1x1x5x8xbf16>
      %86 = vector.shape_cast %85 : vector<1x1x5x8xbf16> to vector<5x8xbf16>
      %87 = vector.shape_cast %83 : vector<5x8xbf16> to vector<1x1x5x8xbf16>
      tpu.vector_store %arg5[%c0_71, %84, %c0_72, %c0_73], %87 {strides = array<i32>} : memref<1x5x5x8xbf16, #tpu.memory_space<vmem>>, vector<1x1x5x8xbf16>,
    }
    %c5_i32_35 = arith.constant 5 : i32
    return
  }
  func.func @transform_0(%arg0: i32) -> (i32, i32, i32, i32) {
    %c0_i32 = arith.constant 0 : i32
    %c0_i32_0 = arith.constant 0 : i32
    %c0_i32_1 = arith.constant 0 : i32
    %c0_i32_2 = arith.constant 0 : i32
    return %arg0, %c0_i32, %c0_i32_0, %c0_i32_1 : i32, i32, i32, i32
  }
  func.func @transform_1(%arg0: i32) -> (i32, i32, i32, i32) {
    %c0_i32 = arith.constant 0 : i32
    %c0_i32_0 = arith.constant 0 : i32
    %c0_i32_1 = arith.constant 0 : i32
    %c0_i32_2 = arith.constant 0 : i32
    return %arg0, %c0_i32, %c0_i32_0, %c0_i32_1 : i32, i32, i32, i32
  }
  func.func @transform_2(%arg0: i32) -> (i32, i32, i32, i32) {
    %c0_i32 = arith.constant 0 : i32
    %c0_i32_0 = arith.constant 0 : i32
    %c0_i32_1 = arith.constant 0 : i32
    %c0_i32_2 = arith.constant 0 : i32
    %c0_i32_3 = arith.constant 0 : i32
    return %c0_i32, %c0_i32_0, %c0_i32_1, %c0_i32_2 : i32, i32, i32, i32
  }
  func.func @transform_3(%arg0: i32) -> (i32, i32) {
    %c0_i32 = arith.constant 0 : i32
    %c0_i32_0 = arith.constant 0 : i32
    %c0_i32_1 = arith.constant 0 : i32
    return %c0_i32, %c0_i32_0 : i32, i32
  }
  func.func @transform_4(%arg0: i32) -> (i32, i32, i32, i32) {
    %c0_i32 = arith.constant 0 : i32
    %c0_i32_0 = arith.constant 0 : i32
    %c0_i32_1 = arith.constant 0 : i32
    %c0_i32_2 = arith.constant 0 : i32
    return %arg0, %c0_i32, %c0_i32_0, %c0_i32_1 : i32, i32, i32, i32
  }
}

module attributes {stable_mosaic.version = 11 : i64} {
  func.func @conv3x3_s1_kernel(%arg0: i32, %arg1: memref<1x5x5x8xbf16, #tpu.memory_space<vmem>>, %arg2: memref<3x3x8x8xf32, #tpu.memory_space<vmem>>, %arg3: memref<1x8xf32, #tpu.memory_space<vmem>>, %arg4: memref<1x3x3x8xbf16, #tpu.memory_space<vmem>>) attributes {dimension_semantics = [#tpu.dimension_semantics<parallel>], iteration_bounds = array<i64: 2>, scalar_prefetch = 0 : i64, scratch_operands = 0 : i64, tpu.core_type = #tpu.core_type<tc>, window_params = [{transform_indices = @transform_0, window_bounds = array<i64: 1, 5, 5, 8>}, {pipeline_mode = #tpu.pipeline_mode<synchronous>, transform_indices = @transform_1, window_bounds = array<i64: 3, 3, 8, 8>}, {pipeline_mode = #tpu.pipeline_mode<synchronous>, transform_indices = @transform_2, window_bounds = array<i64: 1, 8>}, {transform_indices = @transform_3, window_bounds = array<i64: 1, 3, 3, 8>}]} {
    %c0 = arith.constant 0 : index
    %c0_0 = arith.constant 0 : index
    %c0_1 = arith.constant 0 : index
    %c0_2 = arith.constant 0 : index
    %0 = vector.load %arg2[%c0, %c0_0, %c0_1, %c0_2] : memref<3x3x8x8xf32, #tpu.memory_space<vmem>>, vector<1x1x8x8xf32>
    %1 = vector.shape_cast %0 : vector<1x1x8x8xf32> to vector<8x8xf32>
    %c0_3 = arith.constant 0 : index
    %c1 = arith.constant 1 : index
    %c0_4 = arith.constant 0 : index
    %c0_5 = arith.constant 0 : index
    %2 = vector.load %arg2[%c0_3, %c1, %c0_4, %c0_5] : memref<3x3x8x8xf32, #tpu.memory_space<vmem>>, vector<1x1x8x8xf32>
    %3 = vector.shape_cast %2 : vector<1x1x8x8xf32> to vector<8x8xf32>
    %c0_6 = arith.constant 0 : index
    %c2 = arith.constant 2 : index
    %c0_7 = arith.constant 0 : index
    %c0_8 = arith.constant 0 : index
    %4 = vector.load %arg2[%c0_6, %c2, %c0_7, %c0_8] : memref<3x3x8x8xf32, #tpu.memory_space<vmem>>, vector<1x1x8x8xf32>
    %5 = vector.shape_cast %4 : vector<1x1x8x8xf32> to vector<8x8xf32>
    %c1_9 = arith.constant 1 : index
    %c0_10 = arith.constant 0 : index
    %c0_11 = arith.constant 0 : index
    %c0_12 = arith.constant 0 : index
    %6 = vector.load %arg2[%c1_9, %c0_10, %c0_11, %c0_12] : memref<3x3x8x8xf32, #tpu.memory_space<vmem>>, vector<1x1x8x8xf32>
    %7 = vector.shape_cast %6 : vector<1x1x8x8xf32> to vector<8x8xf32>
    %c1_13 = arith.constant 1 : index
    %c1_14 = arith.constant 1 : index
    %c0_15 = arith.constant 0 : index
    %c0_16 = arith.constant 0 : index
    %8 = vector.load %arg2[%c1_13, %c1_14, %c0_15, %c0_16] : memref<3x3x8x8xf32, #tpu.memory_space<vmem>>, vector<1x1x8x8xf32>
    %9 = vector.shape_cast %8 : vector<1x1x8x8xf32> to vector<8x8xf32>
    %c1_17 = arith.constant 1 : index
    %c2_18 = arith.constant 2 : index
    %c0_19 = arith.constant 0 : index
    %c0_20 = arith.constant 0 : index
    %10 = vector.load %arg2[%c1_17, %c2_18, %c0_19, %c0_20] : memref<3x3x8x8xf32, #tpu.memory_space<vmem>>, vector<1x1x8x8xf32>
    %11 = vector.shape_cast %10 : vector<1x1x8x8xf32> to vector<8x8xf32>
    %c2_21 = arith.constant 2 : index
    %c0_22 = arith.constant 0 : index
    %c0_23 = arith.constant 0 : index
    %c0_24 = arith.constant 0 : index
    %12 = vector.load %arg2[%c2_21, %c0_22, %c0_23, %c0_24] : memref<3x3x8x8xf32, #tpu.memory_space<vmem>>, vector<1x1x8x8xf32>
    %13 = vector.shape_cast %12 : vector<1x1x8x8xf32> to vector<8x8xf32>
    %c2_25 = arith.constant 2 : index
    %c1_26 = arith.constant 1 : index
    %c0_27 = arith.constant 0 : index
    %c0_28 = arith.constant 0 : index
    %14 = vector.load %arg2[%c2_25, %c1_26, %c0_27, %c0_28] : memref<3x3x8x8xf32, #tpu.memory_space<vmem>>, vector<1x1x8x8xf32>
    %15 = vector.shape_cast %14 : vector<1x1x8x8xf32> to vector<8x8xf32>
    %c2_29 = arith.constant 2 : index
    %c2_30 = arith.constant 2 : index
    %c0_31 = arith.constant 0 : index
    %c0_32 = arith.constant 0 : index
    %16 = vector.load %arg2[%c2_29, %c2_30, %c0_31, %c0_32] : memref<3x3x8x8xf32, #tpu.memory_space<vmem>>, vector<1x1x8x8xf32>
    %17 = vector.shape_cast %16 : vector<1x1x8x8xf32> to vector<8x8xf32>
    %c0_33 = arith.constant 0 : index
    %c0_34 = arith.constant 0 : index
    %18 = vector.load %arg3[%c0_33, %c0_34] : memref<1x8xf32, #tpu.memory_space<vmem>>, vector<1x8xf32>
    %c0_i32 = arith.constant 0 : i32
    %c3_i32 = arith.constant 3 : i32
    %19 = arith.addi %c0_i32, %c3_i32 : i32
    %c1_i32 = arith.constant 1 : i32
    scf.for %arg5 = %c0_i32 to %19 step %c1_i32  : i32 {
      %cst = arith.constant 0.000000e+00 : f32
      %20 = vector.broadcast %cst : f32 to vector<3x8xf32>
      %c0_i32_36 = arith.constant 0 : i32
      %21 = arith.addi %arg5, %c0_i32_36 : i32
      %c0_37 = arith.constant 0 : index
      %22 = arith.index_cast %21 : i32 to index
      %c0_38 = arith.constant 0 : index
      %c0_39 = arith.constant 0 : index
      %23 = vector.load %arg1[%c0_37, %22, %c0_38, %c0_39] : memref<1x5x5x8xbf16, #tpu.memory_space<vmem>>, vector<1x1x5x8xbf16>
      %24 = vector.shape_cast %23 : vector<1x1x5x8xbf16> to vector<5x8xbf16>
      %25 = arith.extf %24 : vector<5x8xbf16> to vector<5x8xf32>
      %26 = vector.extract_strided_slice %25 {offsets = [0, 0], sizes = [3, 8], strides = [1, 1]} : vector<5x8xf32> to vector<3x8xf32>
      %cst_40 = arith.constant dense<0.000000e+00> : vector<3x8xf32>
      %27 = tpu.matmul %26, %1, %cst_40 {dimension_numbers = #tpu.dot_dimension_numbers<[1], [0], [0], [1], [0, 0, 1, 1], [], []>} : vector<3x8xf32>, vector<8x8xf32>, vector<3x8xf32> -> vector<3x8xf32>
      %28 = arith.addf %20, %27 : vector<3x8xf32>
      %29 = vector.extract_strided_slice %25 {offsets = [1, 0], sizes = [3, 8], strides = [1, 1]} : vector<5x8xf32> to vector<3x8xf32>
      %cst_41 = arith.constant dense<0.000000e+00> : vector<3x8xf32>
      %30 = tpu.matmul %29, %3, %cst_41 {dimension_numbers = #tpu.dot_dimension_numbers<[1], [0], [0], [1], [0, 0, 1, 1], [], []>} : vector<3x8xf32>, vector<8x8xf32>, vector<3x8xf32> -> vector<3x8xf32>
      %31 = arith.addf %28, %30 : vector<3x8xf32>
      %32 = vector.extract_strided_slice %25 {offsets = [2, 0], sizes = [3, 8], strides = [1, 1]} : vector<5x8xf32> to vector<3x8xf32>
      %cst_42 = arith.constant dense<0.000000e+00> : vector<3x8xf32>
      %33 = tpu.matmul %32, %5, %cst_42 {dimension_numbers = #tpu.dot_dimension_numbers<[1], [0], [0], [1], [0, 0, 1, 1], [], []>} : vector<3x8xf32>, vector<8x8xf32>, vector<3x8xf32> -> vector<3x8xf32>
      %34 = arith.addf %31, %33 : vector<3x8xf32>
      %c1_i32_43 = arith.constant 1 : i32
      %35 = arith.addi %arg5, %c1_i32_43 : i32
      %c0_44 = arith.constant 0 : index
      %36 = arith.index_cast %35 : i32 to index
      %c0_45 = arith.constant 0 : index
      %c0_46 = arith.constant 0 : index
      %37 = vector.load %arg1[%c0_44, %36, %c0_45, %c0_46] : memref<1x5x5x8xbf16, #tpu.memory_space<vmem>>, vector<1x1x5x8xbf16>
      %38 = vector.shape_cast %37 : vector<1x1x5x8xbf16> to vector<5x8xbf16>
      %39 = arith.extf %38 : vector<5x8xbf16> to vector<5x8xf32>
      %40 = vector.extract_strided_slice %39 {offsets = [0, 0], sizes = [3, 8], strides = [1, 1]} : vector<5x8xf32> to vector<3x8xf32>
      %cst_47 = arith.constant dense<0.000000e+00> : vector<3x8xf32>
      %41 = tpu.matmul %40, %7, %cst_47 {dimension_numbers = #tpu.dot_dimension_numbers<[1], [0], [0], [1], [0, 0, 1, 1], [], []>} : vector<3x8xf32>, vector<8x8xf32>, vector<3x8xf32> -> vector<3x8xf32>
      %42 = arith.addf %34, %41 : vector<3x8xf32>
      %43 = vector.extract_strided_slice %39 {offsets = [1, 0], sizes = [3, 8], strides = [1, 1]} : vector<5x8xf32> to vector<3x8xf32>
      %cst_48 = arith.constant dense<0.000000e+00> : vector<3x8xf32>
      %44 = tpu.matmul %43, %9, %cst_48 {dimension_numbers = #tpu.dot_dimension_numbers<[1], [0], [0], [1], [0, 0, 1, 1], [], []>} : vector<3x8xf32>, vector<8x8xf32>, vector<3x8xf32> -> vector<3x8xf32>
      %45 = arith.addf %42, %44 : vector<3x8xf32>
      %46 = vector.extract_strided_slice %39 {offsets = [2, 0], sizes = [3, 8], strides = [1, 1]} : vector<5x8xf32> to vector<3x8xf32>
      %cst_49 = arith.constant dense<0.000000e+00> : vector<3x8xf32>
      %47 = tpu.matmul %46, %11, %cst_49 {dimension_numbers = #tpu.dot_dimension_numbers<[1], [0], [0], [1], [0, 0, 1, 1], [], []>} : vector<3x8xf32>, vector<8x8xf32>, vector<3x8xf32> -> vector<3x8xf32>
      %48 = arith.addf %45, %47 : vector<3x8xf32>
      %c2_i32 = arith.constant 2 : i32
      %49 = arith.addi %arg5, %c2_i32 : i32
      %c0_50 = arith.constant 0 : index
      %50 = arith.index_cast %49 : i32 to index
      %c0_51 = arith.constant 0 : index
      %c0_52 = arith.constant 0 : index
      %51 = vector.load %arg1[%c0_50, %50, %c0_51, %c0_52] : memref<1x5x5x8xbf16, #tpu.memory_space<vmem>>, vector<1x1x5x8xbf16>
      %52 = vector.shape_cast %51 : vector<1x1x5x8xbf16> to vector<5x8xbf16>
      %53 = arith.extf %52 : vector<5x8xbf16> to vector<5x8xf32>
      %54 = vector.extract_strided_slice %53 {offsets = [0, 0], sizes = [3, 8], strides = [1, 1]} : vector<5x8xf32> to vector<3x8xf32>
      %cst_53 = arith.constant dense<0.000000e+00> : vector<3x8xf32>
      %55 = tpu.matmul %54, %13, %cst_53 {dimension_numbers = #tpu.dot_dimension_numbers<[1], [0], [0], [1], [0, 0, 1, 1], [], []>} : vector<3x8xf32>, vector<8x8xf32>, vector<3x8xf32> -> vector<3x8xf32>
      %56 = arith.addf %48, %55 : vector<3x8xf32>
      %57 = vector.extract_strided_slice %53 {offsets = [1, 0], sizes = [3, 8], strides = [1, 1]} : vector<5x8xf32> to vector<3x8xf32>
      %cst_54 = arith.constant dense<0.000000e+00> : vector<3x8xf32>
      %58 = tpu.matmul %57, %15, %cst_54 {dimension_numbers = #tpu.dot_dimension_numbers<[1], [0], [0], [1], [0, 0, 1, 1], [], []>} : vector<3x8xf32>, vector<8x8xf32>, vector<3x8xf32> -> vector<3x8xf32>
      %59 = arith.addf %56, %58 : vector<3x8xf32>
      %60 = vector.extract_strided_slice %53 {offsets = [2, 0], sizes = [3, 8], strides = [1, 1]} : vector<5x8xf32> to vector<3x8xf32>
      %cst_55 = arith.constant dense<0.000000e+00> : vector<3x8xf32>
      %61 = tpu.matmul %60, %17, %cst_55 {dimension_numbers = #tpu.dot_dimension_numbers<[1], [0], [0], [1], [0, 0, 1, 1], [], []>} : vector<3x8xf32>, vector<8x8xf32>, vector<3x8xf32> -> vector<3x8xf32>
      %62 = arith.addf %59, %61 : vector<3x8xf32>
      %63 = vector.broadcast %18 : vector<1x8xf32> to vector<3x8xf32>
      %64 = arith.addf %62, %63 : vector<3x8xf32>
      %65 = arith.truncf %64 : vector<3x8xf32> to vector<3x8xbf16>
      %c0_56 = arith.constant 0 : index
      %66 = arith.index_cast %arg5 : i32 to index
      %c0_57 = arith.constant 0 : index
      %c0_58 = arith.constant 0 : index
      %67 = vector.load %arg4[%c0_56, %66, %c0_57, %c0_58] : memref<1x3x3x8xbf16, #tpu.memory_space<vmem>>, vector<1x1x3x8xbf16>
      %68 = vector.shape_cast %67 : vector<1x1x3x8xbf16> to vector<3x8xbf16>
      %69 = vector.shape_cast %65 : vector<3x8xbf16> to vector<1x1x3x8xbf16>
      tpu.vector_store %arg4[%c0_56, %66, %c0_57, %c0_58], %69 {strides = array<i32>} : memref<1x3x3x8xbf16, #tpu.memory_space<vmem>>, vector<1x1x3x8xbf16>,
    }
    %c3_i32_35 = arith.constant 3 : i32
    return
  }
  func.func @transform_0(%arg0: i32) -> (i32, i32, i32, i32) {
    %c0_i32 = arith.constant 0 : i32
    %c0_i32_0 = arith.constant 0 : i32
    %c0_i32_1 = arith.constant 0 : i32
    %c0_i32_2 = arith.constant 0 : i32
    return %arg0, %c0_i32, %c0_i32_0, %c0_i32_1 : i32, i32, i32, i32
  }
  func.func @transform_1(%arg0: i32) -> (i32, i32, i32, i32) {
    %c0_i32 = arith.constant 0 : i32
    %c0_i32_0 = arith.constant 0 : i32
    %c0_i32_1 = arith.constant 0 : i32
    %c0_i32_2 = arith.constant 0 : i32
    %c0_i32_3 = arith.constant 0 : i32
    return %c0_i32, %c0_i32_0, %c0_i32_1, %c0_i32_2 : i32, i32, i32, i32
  }
  func.func @transform_2(%arg0: i32) -> (i32, i32) {
    %c0_i32 = arith.constant 0 : i32
    %c0_i32_0 = arith.constant 0 : i32
    %c0_i32_1 = arith.constant 0 : i32
    return %c0_i32, %c0_i32_0 : i32, i32
  }
  func.func @transform_3(%arg0: i32) -> (i32, i32, i32, i32) {
    %c0_i32 = arith.constant 0 : i32
    %c0_i32_0 = arith.constant 0 : i32
    %c0_i32_1 = arith.constant 0 : i32
    %c0_i32_2 = arith.constant 0 : i32
    return %arg0, %c0_i32, %c0_i32_0, %c0_i32_1 : i32, i32, i32, i32
  }
}

module attributes {stable_mosaic.version = 11 : i64} {
  func.func @conv3x3_s2_kernel(%arg0: i32, %arg1: memref<1x11x6x8xbf16, #tpu.memory_space<vmem>>, %arg2: memref<1x11x5x8xbf16, #tpu.memory_space<vmem>>, %arg3: memref<3x3x8x2xf32, #tpu.memory_space<vmem>>, %arg4: memref<1x2xf32, #tpu.memory_space<vmem>>, %arg5: memref<1x5x5x2xbf16, #tpu.memory_space<vmem>>) attributes {dimension_semantics = [#tpu.dimension_semantics<parallel>], iteration_bounds = array<i64: 2>, scalar_prefetch = 0 : i64, scratch_operands = 0 : i64, tpu.core_type = #tpu.core_type<tc>, window_params = [{transform_indices = @transform_0, window_bounds = array<i64: 1, 11, 6, 8>}, {transform_indices = @transform_1, window_bounds = array<i64: 1, 11, 5, 8>}, {pipeline_mode = #tpu.pipeline_mode<synchronous>, transform_indices = @transform_2, window_bounds = array<i64: 3, 3, 8, 2>}, {pipeline_mode = #tpu.pipeline_mode<synchronous>, transform_indices = @transform_3, window_bounds = array<i64: 1, 2>}, {transform_indices = @transform_4, window_bounds = array<i64: 1, 5, 5, 2>}]} {
    %c0 = arith.constant 0 : index
    %c0_0 = arith.constant 0 : index
    %c0_1 = arith.constant 0 : index
    %c0_2 = arith.constant 0 : index
    %0 = vector.load %arg3[%c0, %c0_0, %c0_1, %c0_2] : memref<3x3x8x2xf32, #tpu.memory_space<vmem>>, vector<1x1x8x2xf32>
    %1 = vector.shape_cast %0 : vector<1x1x8x2xf32> to vector<8x2xf32>
    %c0_3 = arith.constant 0 : index
    %c1 = arith.constant 1 : index
    %c0_4 = arith.constant 0 : index
    %c0_5 = arith.constant 0 : index
    %2 = vector.load %arg3[%c0_3, %c1, %c0_4, %c0_5] : memref<3x3x8x2xf32, #tpu.memory_space<vmem>>, vector<1x1x8x2xf32>
    %3 = vector.shape_cast %2 : vector<1x1x8x2xf32> to vector<8x2xf32>
    %c0_6 = arith.constant 0 : index
    %c2 = arith.constant 2 : index
    %c0_7 = arith.constant 0 : index
    %c0_8 = arith.constant 0 : index
    %4 = vector.load %arg3[%c0_6, %c2, %c0_7, %c0_8] : memref<3x3x8x2xf32, #tpu.memory_space<vmem>>, vector<1x1x8x2xf32>
    %5 = vector.shape_cast %4 : vector<1x1x8x2xf32> to vector<8x2xf32>
    %c1_9 = arith.constant 1 : index
    %c0_10 = arith.constant 0 : index
    %c0_11 = arith.constant 0 : index
    %c0_12 = arith.constant 0 : index
    %6 = vector.load %arg3[%c1_9, %c0_10, %c0_11, %c0_12] : memref<3x3x8x2xf32, #tpu.memory_space<vmem>>, vector<1x1x8x2xf32>
    %7 = vector.shape_cast %6 : vector<1x1x8x2xf32> to vector<8x2xf32>
    %c1_13 = arith.constant 1 : index
    %c1_14 = arith.constant 1 : index
    %c0_15 = arith.constant 0 : index
    %c0_16 = arith.constant 0 : index
    %8 = vector.load %arg3[%c1_13, %c1_14, %c0_15, %c0_16] : memref<3x3x8x2xf32, #tpu.memory_space<vmem>>, vector<1x1x8x2xf32>
    %9 = vector.shape_cast %8 : vector<1x1x8x2xf32> to vector<8x2xf32>
    %c1_17 = arith.constant 1 : index
    %c2_18 = arith.constant 2 : index
    %c0_19 = arith.constant 0 : index
    %c0_20 = arith.constant 0 : index
    %10 = vector.load %arg3[%c1_17, %c2_18, %c0_19, %c0_20] : memref<3x3x8x2xf32, #tpu.memory_space<vmem>>, vector<1x1x8x2xf32>
    %11 = vector.shape_cast %10 : vector<1x1x8x2xf32> to vector<8x2xf32>
    %c2_21 = arith.constant 2 : index
    %c0_22 = arith.constant 0 : index
    %c0_23 = arith.constant 0 : index
    %c0_24 = arith.constant 0 : index
    %12 = vector.load %arg3[%c2_21, %c0_22, %c0_23, %c0_24] : memref<3x3x8x2xf32, #tpu.memory_space<vmem>>, vector<1x1x8x2xf32>
    %13 = vector.shape_cast %12 : vector<1x1x8x2xf32> to vector<8x2xf32>
    %c2_25 = arith.constant 2 : index
    %c1_26 = arith.constant 1 : index
    %c0_27 = arith.constant 0 : index
    %c0_28 = arith.constant 0 : index
    %14 = vector.load %arg3[%c2_25, %c1_26, %c0_27, %c0_28] : memref<3x3x8x2xf32, #tpu.memory_space<vmem>>, vector<1x1x8x2xf32>
    %15 = vector.shape_cast %14 : vector<1x1x8x2xf32> to vector<8x2xf32>
    %c2_29 = arith.constant 2 : index
    %c2_30 = arith.constant 2 : index
    %c0_31 = arith.constant 0 : index
    %c0_32 = arith.constant 0 : index
    %16 = vector.load %arg3[%c2_29, %c2_30, %c0_31, %c0_32] : memref<3x3x8x2xf32, #tpu.memory_space<vmem>>, vector<1x1x8x2xf32>
    %17 = vector.shape_cast %16 : vector<1x1x8x2xf32> to vector<8x2xf32>
    %c0_33 = arith.constant 0 : index
    %c0_34 = arith.constant 0 : index
    %18 = vector.load %arg4[%c0_33, %c0_34] : memref<1x2xf32, #tpu.memory_space<vmem>>, vector<1x2xf32>
    %c0_i32 = arith.constant 0 : i32
    %c5_i32 = arith.constant 5 : i32
    %19 = arith.addi %c0_i32, %c5_i32 : i32
    %c1_i32 = arith.constant 1 : i32
    scf.for %arg6 = %c0_i32 to %19 step %c1_i32  : i32 {
      %c2_i32 = arith.constant 2 : i32
      %20 = arith.muli %arg6, %c2_i32 : i32
      %cst = arith.constant 0.000000e+00 : f32
      %21 = vector.broadcast %cst : f32 to vector<5x2xf32>
      %c0_i32_36 = arith.constant 0 : i32
      %22 = arith.addi %20, %c0_i32_36 : i32
      %c0_37 = arith.constant 0 : index
      %23 = arith.index_cast %22 : i32 to index
      %c0_38 = arith.constant 0 : index
      %c0_39 = arith.constant 0 : index
      %24 = vector.load %arg1[%c0_37, %23, %c0_38, %c0_39] : memref<1x11x6x8xbf16, #tpu.memory_space<vmem>>, vector<1x1x6x8xbf16>
      %25 = vector.shape_cast %24 : vector<1x1x6x8xbf16> to vector<6x8xbf16>
      %26 = arith.extf %25 : vector<6x8xbf16> to vector<6x8xf32>
      %c0_i32_40 = arith.constant 0 : i32
      %27 = arith.addi %20, %c0_i32_40 : i32
      %c0_41 = arith.constant 0 : index
      %28 = arith.index_cast %27 : i32 to index
      %c0_42 = arith.constant 0 : index
      %c0_43 = arith.constant 0 : index
      %29 = vector.load %arg2[%c0_41, %28, %c0_42, %c0_43] : memref<1x11x5x8xbf16, #tpu.memory_space<vmem>>, vector<1x1x5x8xbf16>
      %30 = vector.shape_cast %29 : vector<1x1x5x8xbf16> to vector<5x8xbf16>
      %31 = arith.extf %30 : vector<5x8xbf16> to vector<5x8xf32>
      %32 = vector.extract_strided_slice %26 {offsets = [0, 0], sizes = [5, 8], strides = [1, 1]} : vector<6x8xf32> to vector<5x8xf32>
      %cst_44 = arith.constant dense<0.000000e+00> : vector<5x2xf32>
      %33 = tpu.matmul %32, %1, %cst_44 {dimension_numbers = #tpu.dot_dimension_numbers<[1], [0], [0], [1], [0, 0, 1, 1], [], []>} : vector<5x8xf32>, vector<8x2xf32>, vector<5x2xf32> -> vector<5x2xf32>
      %34 = arith.addf %21, %33 : vector<5x2xf32>
      %cst_45 = arith.constant dense<0.000000e+00> : vector<5x2xf32>
      %35 = tpu.matmul %31, %3, %cst_45 {dimension_numbers = #tpu.dot_dimension_numbers<[1], [0], [0], [1], [0, 0, 1, 1], [], []>} : vector<5x8xf32>, vector<8x2xf32>, vector<5x2xf32> -> vector<5x2xf32>
      %36 = arith.addf %34, %35 : vector<5x2xf32>
      %37 = vector.extract_strided_slice %26 {offsets = [1, 0], sizes = [5, 8], strides = [1, 1]} : vector<6x8xf32> to vector<5x8xf32>
      %cst_46 = arith.constant dense<0.000000e+00> : vector<5x2xf32>
      %38 = tpu.matmul %37, %5, %cst_46 {dimension_numbers = #tpu.dot_dimension_numbers<[1], [0], [0], [1], [0, 0, 1, 1], [], []>} : vector<5x8xf32>, vector<8x2xf32>, vector<5x2xf32> -> vector<5x2xf32>
      %39 = arith.addf %36, %38 : vector<5x2xf32>
      %c1_i32_47 = arith.constant 1 : i32
      %40 = arith.addi %20, %c1_i32_47 : i32
      %c0_48 = arith.constant 0 : index
      %41 = arith.index_cast %40 : i32 to index
      %c0_49 = arith.constant 0 : index
      %c0_50 = arith.constant 0 : index
      %42 = vector.load %arg1[%c0_48, %41, %c0_49, %c0_50] : memref<1x11x6x8xbf16, #tpu.memory_space<vmem>>, vector<1x1x6x8xbf16>
      %43 = vector.shape_cast %42 : vector<1x1x6x8xbf16> to vector<6x8xbf16>
      %44 = arith.extf %43 : vector<6x8xbf16> to vector<6x8xf32>
      %c1_i32_51 = arith.constant 1 : i32
      %45 = arith.addi %20, %c1_i32_51 : i32
      %c0_52 = arith.constant 0 : index
      %46 = arith.index_cast %45 : i32 to index
      %c0_53 = arith.constant 0 : index
      %c0_54 = arith.constant 0 : index
      %47 = vector.load %arg2[%c0_52, %46, %c0_53, %c0_54] : memref<1x11x5x8xbf16, #tpu.memory_space<vmem>>, vector<1x1x5x8xbf16>
      %48 = vector.shape_cast %47 : vector<1x1x5x8xbf16> to vector<5x8xbf16>
      %49 = arith.extf %48 : vector<5x8xbf16> to vector<5x8xf32>
      %50 = vector.extract_strided_slice %44 {offsets = [0, 0], sizes = [5, 8], strides = [1, 1]} : vector<6x8xf32> to vector<5x8xf32>
      %cst_55 = arith.constant dense<0.000000e+00> : vector<5x2xf32>
      %51 = tpu.matmul %50, %7, %cst_55 {dimension_numbers = #tpu.dot_dimension_numbers<[1], [0], [0], [1], [0, 0, 1, 1], [], []>} : vector<5x8xf32>, vector<8x2xf32>, vector<5x2xf32> -> vector<5x2xf32>
      %52 = arith.addf %39, %51 : vector<5x2xf32>
      %cst_56 = arith.constant dense<0.000000e+00> : vector<5x2xf32>
      %53 = tpu.matmul %49, %9, %cst_56 {dimension_numbers = #tpu.dot_dimension_numbers<[1], [0], [0], [1], [0, 0, 1, 1], [], []>} : vector<5x8xf32>, vector<8x2xf32>, vector<5x2xf32> -> vector<5x2xf32>
      %54 = arith.addf %52, %53 : vector<5x2xf32>
      %55 = vector.extract_strided_slice %44 {offsets = [1, 0], sizes = [5, 8], strides = [1, 1]} : vector<6x8xf32> to vector<5x8xf32>
      %cst_57 = arith.constant dense<0.000000e+00> : vector<5x2xf32>
      %56 = tpu.matmul %55, %11, %cst_57 {dimension_numbers = #tpu.dot_dimension_numbers<[1], [0], [0], [1], [0, 0, 1, 1], [], []>} : vector<5x8xf32>, vector<8x2xf32>, vector<5x2xf32> -> vector<5x2xf32>
      %57 = arith.addf %54, %56 : vector<5x2xf32>
      %c2_i32_58 = arith.constant 2 : i32
      %58 = arith.addi %20, %c2_i32_58 : i32
      %c0_59 = arith.constant 0 : index
      %59 = arith.index_cast %58 : i32 to index
      %c0_60 = arith.constant 0 : index
      %c0_61 = arith.constant 0 : index
      %60 = vector.load %arg1[%c0_59, %59, %c0_60, %c0_61] : memref<1x11x6x8xbf16, #tpu.memory_space<vmem>>, vector<1x1x6x8xbf16>
      %61 = vector.shape_cast %60 : vector<1x1x6x8xbf16> to vector<6x8xbf16>
      %62 = arith.extf %61 : vector<6x8xbf16> to vector<6x8xf32>
      %c2_i32_62 = arith.constant 2 : i32
      %63 = arith.addi %20, %c2_i32_62 : i32
      %c0_63 = arith.constant 0 : index
      %64 = arith.index_cast %63 : i32 to index
      %c0_64 = arith.constant 0 : index
      %c0_65 = arith.constant 0 : index
      %65 = vector.load %arg2[%c0_63, %64, %c0_64, %c0_65] : memref<1x11x5x8xbf16, #tpu.memory_space<vmem>>, vector<1x1x5x8xbf16>
      %66 = vector.shape_cast %65 : vector<1x1x5x8xbf16> to vector<5x8xbf16>
      %67 = arith.extf %66 : vector<5x8xbf16> to vector<5x8xf32>
      %68 = vector.extract_strided_slice %62 {offsets = [0, 0], sizes = [5, 8], strides = [1, 1]} : vector<6x8xf32> to vector<5x8xf32>
      %cst_66 = arith.constant dense<0.000000e+00> : vector<5x2xf32>
      %69 = tpu.matmul %68, %13, %cst_66 {dimension_numbers = #tpu.dot_dimension_numbers<[1], [0], [0], [1], [0, 0, 1, 1], [], []>} : vector<5x8xf32>, vector<8x2xf32>, vector<5x2xf32> -> vector<5x2xf32>
      %70 = arith.addf %57, %69 : vector<5x2xf32>
      %cst_67 = arith.constant dense<0.000000e+00> : vector<5x2xf32>
      %71 = tpu.matmul %67, %15, %cst_67 {dimension_numbers = #tpu.dot_dimension_numbers<[1], [0], [0], [1], [0, 0, 1, 1], [], []>} : vector<5x8xf32>, vector<8x2xf32>, vector<5x2xf32> -> vector<5x2xf32>
      %72 = arith.addf %70, %71 : vector<5x2xf32>
      %73 = vector.extract_strided_slice %62 {offsets = [1, 0], sizes = [5, 8], strides = [1, 1]} : vector<6x8xf32> to vector<5x8xf32>
      %cst_68 = arith.constant dense<0.000000e+00> : vector<5x2xf32>
      %74 = tpu.matmul %73, %17, %cst_68 {dimension_numbers = #tpu.dot_dimension_numbers<[1], [0], [0], [1], [0, 0, 1, 1], [], []>} : vector<5x8xf32>, vector<8x2xf32>, vector<5x2xf32> -> vector<5x2xf32>
      %75 = arith.addf %72, %74 : vector<5x2xf32>
      %76 = vector.broadcast %18 : vector<1x2xf32> to vector<5x2xf32>
      %77 = arith.addf %75, %76 : vector<5x2xf32>
      %cst_69 = arith.constant 0.000000e+00 : f32
      %78 = vector.broadcast %cst_69 : f32 to vector<5x2xf32>
      %79 = arith.cmpf ogt, %77, %78 : vector<5x2xf32>
      %cst_70 = arith.constant 3.000000e-01 : f32
      %80 = vector.broadcast %cst_70 : f32 to vector<5x2xf32>
      %81 = arith.mulf %80, %77 : vector<5x2xf32>
      %82 = arith.select %79, %77, %81 : vector<5x2xi1>, vector<5x2xf32>
      %83 = arith.truncf %82 : vector<5x2xf32> to vector<5x2xbf16>
      %c0_71 = arith.constant 0 : index
      %84 = arith.index_cast %arg6 : i32 to index
      %c0_72 = arith.constant 0 : index
      %c0_73 = arith.constant 0 : index
      %85 = vector.load %arg5[%c0_71, %84, %c0_72, %c0_73] : memref<1x5x5x2xbf16, #tpu.memory_space<vmem>>, vector<1x1x5x2xbf16>
      %86 = vector.shape_cast %85 : vector<1x1x5x2xbf16> to vector<5x2xbf16>
      %87 = vector.shape_cast %83 : vector<5x2xbf16> to vector<1x1x5x2xbf16>
      tpu.vector_store %arg5[%c0_71, %84, %c0_72, %c0_73], %87 {strides = array<i32>} : memref<1x5x5x2xbf16, #tpu.memory_space<vmem>>, vector<1x1x5x2xbf16>,
    }
    %c5_i32_35 = arith.constant 5 : i32
    return
  }
  func.func @transform_0(%arg0: i32) -> (i32, i32, i32, i32) {
    %c0_i32 = arith.constant 0 : i32
    %c0_i32_0 = arith.constant 0 : i32
    %c0_i32_1 = arith.constant 0 : i32
    %c0_i32_2 = arith.constant 0 : i32
    return %arg0, %c0_i32, %c0_i32_0, %c0_i32_1 : i32, i32, i32, i32
  }
  func.func @transform_1(%arg0: i32) -> (i32, i32, i32, i32) {
    %c0_i32 = arith.constant 0 : i32
    %c0_i32_0 = arith.constant 0 : i32
    %c0_i32_1 = arith.constant 0 : i32
    %c0_i32_2 = arith.constant 0 : i32
    return %arg0, %c0_i32, %c0_i32_0, %c0_i32_1 : i32, i32, i32, i32
  }
  func.func @transform_2(%arg0: i32) -> (i32, i32, i32, i32) {
    %c0_i32 = arith.constant 0 : i32
    %c0_i32_0 = arith.constant 0 : i32
    %c0_i32_1 = arith.constant 0 : i32
    %c0_i32_2 = arith.constant 0 : i32
    %c0_i32_3 = arith.constant 0 : i32
    return %c0_i32, %c0_i32_0, %c0_i32_1, %c0_i32_2 : i32, i32, i32, i32
  }
  func.func @transform_3(%arg0: i32) -> (i32, i32) {
    %c0_i32 = arith.constant 0 : i32
    %c0_i32_0 = arith.constant 0 : i32
    %c0_i32_1 = arith.constant 0 : i32
    return %c0_i32, %c0_i32_0 : i32, i32
  }
  func.func @transform_4(%arg0: i32) -> (i32, i32, i32, i32) {
    %c0_i32 = arith.constant 0 : i32
    %c0_i32_0 = arith.constant 0 : i32
    %c0_i32_1 = arith.constant 0 : i32
    %c0_i32_2 = arith.constant 0 : i32
    return %arg0, %c0_i32, %c0_i32_0, %c0_i32_1 : i32, i32, i32, i32
  }
}

module attributes {stable_mosaic.version = 11 : i64} {
  func.func @conv3x3_s1_kernel(%arg0: i32, %arg1: memref<1x5x5x2xbf16, #tpu.memory_space<vmem>>, %arg2: memref<3x3x2x2xf32, #tpu.memory_space<vmem>>, %arg3: memref<1x2xf32, #tpu.memory_space<vmem>>, %arg4: memref<1x3x3x2xbf16, #tpu.memory_space<vmem>>) attributes {dimension_semantics = [#tpu.dimension_semantics<parallel>], iteration_bounds = array<i64: 2>, scalar_prefetch = 0 : i64, scratch_operands = 0 : i64, tpu.core_type = #tpu.core_type<tc>, window_params = [{transform_indices = @transform_0, window_bounds = array<i64: 1, 5, 5, 2>}, {pipeline_mode = #tpu.pipeline_mode<synchronous>, transform_indices = @transform_1, window_bounds = array<i64: 3, 3, 2, 2>}, {pipeline_mode = #tpu.pipeline_mode<synchronous>, transform_indices = @transform_2, window_bounds = array<i64: 1, 2>}, {transform_indices = @transform_3, window_bounds = array<i64: 1, 3, 3, 2>}]} {
    %c0 = arith.constant 0 : index
    %c0_0 = arith.constant 0 : index
    %c0_1 = arith.constant 0 : index
    %c0_2 = arith.constant 0 : index
    %0 = vector.load %arg2[%c0, %c0_0, %c0_1, %c0_2] : memref<3x3x2x2xf32, #tpu.memory_space<vmem>>, vector<1x1x2x2xf32>
    %1 = vector.shape_cast %0 : vector<1x1x2x2xf32> to vector<2x2xf32>
    %c0_3 = arith.constant 0 : index
    %c1 = arith.constant 1 : index
    %c0_4 = arith.constant 0 : index
    %c0_5 = arith.constant 0 : index
    %2 = vector.load %arg2[%c0_3, %c1, %c0_4, %c0_5] : memref<3x3x2x2xf32, #tpu.memory_space<vmem>>, vector<1x1x2x2xf32>
    %3 = vector.shape_cast %2 : vector<1x1x2x2xf32> to vector<2x2xf32>
    %c0_6 = arith.constant 0 : index
    %c2 = arith.constant 2 : index
    %c0_7 = arith.constant 0 : index
    %c0_8 = arith.constant 0 : index
    %4 = vector.load %arg2[%c0_6, %c2, %c0_7, %c0_8] : memref<3x3x2x2xf32, #tpu.memory_space<vmem>>, vector<1x1x2x2xf32>
    %5 = vector.shape_cast %4 : vector<1x1x2x2xf32> to vector<2x2xf32>
    %c1_9 = arith.constant 1 : index
    %c0_10 = arith.constant 0 : index
    %c0_11 = arith.constant 0 : index
    %c0_12 = arith.constant 0 : index
    %6 = vector.load %arg2[%c1_9, %c0_10, %c0_11, %c0_12] : memref<3x3x2x2xf32, #tpu.memory_space<vmem>>, vector<1x1x2x2xf32>
    %7 = vector.shape_cast %6 : vector<1x1x2x2xf32> to vector<2x2xf32>
    %c1_13 = arith.constant 1 : index
    %c1_14 = arith.constant 1 : index
    %c0_15 = arith.constant 0 : index
    %c0_16 = arith.constant 0 : index
    %8 = vector.load %arg2[%c1_13, %c1_14, %c0_15, %c0_16] : memref<3x3x2x2xf32, #tpu.memory_space<vmem>>, vector<1x1x2x2xf32>
    %9 = vector.shape_cast %8 : vector<1x1x2x2xf32> to vector<2x2xf32>
    %c1_17 = arith.constant 1 : index
    %c2_18 = arith.constant 2 : index
    %c0_19 = arith.constant 0 : index
    %c0_20 = arith.constant 0 : index
    %10 = vector.load %arg2[%c1_17, %c2_18, %c0_19, %c0_20] : memref<3x3x2x2xf32, #tpu.memory_space<vmem>>, vector<1x1x2x2xf32>
    %11 = vector.shape_cast %10 : vector<1x1x2x2xf32> to vector<2x2xf32>
    %c2_21 = arith.constant 2 : index
    %c0_22 = arith.constant 0 : index
    %c0_23 = arith.constant 0 : index
    %c0_24 = arith.constant 0 : index
    %12 = vector.load %arg2[%c2_21, %c0_22, %c0_23, %c0_24] : memref<3x3x2x2xf32, #tpu.memory_space<vmem>>, vector<1x1x2x2xf32>
    %13 = vector.shape_cast %12 : vector<1x1x2x2xf32> to vector<2x2xf32>
    %c2_25 = arith.constant 2 : index
    %c1_26 = arith.constant 1 : index
    %c0_27 = arith.constant 0 : index
    %c0_28 = arith.constant 0 : index
    %14 = vector.load %arg2[%c2_25, %c1_26, %c0_27, %c0_28] : memref<3x3x2x2xf32, #tpu.memory_space<vmem>>, vector<1x1x2x2xf32>
    %15 = vector.shape_cast %14 : vector<1x1x2x2xf32> to vector<2x2xf32>
    %c2_29 = arith.constant 2 : index
    %c2_30 = arith.constant 2 : index
    %c0_31 = arith.constant 0 : index
    %c0_32 = arith.constant 0 : index
    %16 = vector.load %arg2[%c2_29, %c2_30, %c0_31, %c0_32] : memref<3x3x2x2xf32, #tpu.memory_space<vmem>>, vector<1x1x2x2xf32>
    %17 = vector.shape_cast %16 : vector<1x1x2x2xf32> to vector<2x2xf32>
    %c0_33 = arith.constant 0 : index
    %c0_34 = arith.constant 0 : index
    %18 = vector.load %arg3[%c0_33, %c0_34] : memref<1x2xf32, #tpu.memory_space<vmem>>, vector<1x2xf32>
    %c0_i32 = arith.constant 0 : i32
    %c3_i32 = arith.constant 3 : i32
    %19 = arith.addi %c0_i32, %c3_i32 : i32
    %c1_i32 = arith.constant 1 : i32
    scf.for %arg5 = %c0_i32 to %19 step %c1_i32  : i32 {
      %cst = arith.constant 0.000000e+00 : f32
      %20 = vector.broadcast %cst : f32 to vector<3x2xf32>
      %c0_i32_36 = arith.constant 0 : i32
      %21 = arith.addi %arg5, %c0_i32_36 : i32
      %c0_37 = arith.constant 0 : index
      %22 = arith.index_cast %21 : i32 to index
      %c0_38 = arith.constant 0 : index
      %c0_39 = arith.constant 0 : index
      %23 = vector.load %arg1[%c0_37, %22, %c0_38, %c0_39] : memref<1x5x5x2xbf16, #tpu.memory_space<vmem>>, vector<1x1x5x2xbf16>
      %24 = vector.shape_cast %23 : vector<1x1x5x2xbf16> to vector<5x2xbf16>
      %25 = arith.extf %24 : vector<5x2xbf16> to vector<5x2xf32>
      %26 = vector.extract_strided_slice %25 {offsets = [0, 0], sizes = [3, 2], strides = [1, 1]} : vector<5x2xf32> to vector<3x2xf32>
      %cst_40 = arith.constant dense<0.000000e+00> : vector<3x2xf32>
      %27 = tpu.matmul %26, %1, %cst_40 {dimension_numbers = #tpu.dot_dimension_numbers<[1], [0], [0], [1], [0, 0, 1, 1], [], []>} : vector<3x2xf32>, vector<2x2xf32>, vector<3x2xf32> -> vector<3x2xf32>
      %28 = arith.addf %20, %27 : vector<3x2xf32>
      %29 = vector.extract_strided_slice %25 {offsets = [1, 0], sizes = [3, 2], strides = [1, 1]} : vector<5x2xf32> to vector<3x2xf32>
      %cst_41 = arith.constant dense<0.000000e+00> : vector<3x2xf32>
      %30 = tpu.matmul %29, %3, %cst_41 {dimension_numbers = #tpu.dot_dimension_numbers<[1], [0], [0], [1], [0, 0, 1, 1], [], []>} : vector<3x2xf32>, vector<2x2xf32>, vector<3x2xf32> -> vector<3x2xf32>
      %31 = arith.addf %28, %30 : vector<3x2xf32>
      %32 = vector.extract_strided_slice %25 {offsets = [2, 0], sizes = [3, 2], strides = [1, 1]} : vector<5x2xf32> to vector<3x2xf32>
      %cst_42 = arith.constant dense<0.000000e+00> : vector<3x2xf32>
      %33 = tpu.matmul %32, %5, %cst_42 {dimension_numbers = #tpu.dot_dimension_numbers<[1], [0], [0], [1], [0, 0, 1, 1], [], []>} : vector<3x2xf32>, vector<2x2xf32>, vector<3x2xf32> -> vector<3x2xf32>
      %34 = arith.addf %31, %33 : vector<3x2xf32>
      %c1_i32_43 = arith.constant 1 : i32
      %35 = arith.addi %arg5, %c1_i32_43 : i32
      %c0_44 = arith.constant 0 : index
      %36 = arith.index_cast %35 : i32 to index
      %c0_45 = arith.constant 0 : index
      %c0_46 = arith.constant 0 : index
      %37 = vector.load %arg1[%c0_44, %36, %c0_45, %c0_46] : memref<1x5x5x2xbf16, #tpu.memory_space<vmem>>, vector<1x1x5x2xbf16>
      %38 = vector.shape_cast %37 : vector<1x1x5x2xbf16> to vector<5x2xbf16>
      %39 = arith.extf %38 : vector<5x2xbf16> to vector<5x2xf32>
      %40 = vector.extract_strided_slice %39 {offsets = [0, 0], sizes = [3, 2], strides = [1, 1]} : vector<5x2xf32> to vector<3x2xf32>
      %cst_47 = arith.constant dense<0.000000e+00> : vector<3x2xf32>
      %41 = tpu.matmul %40, %7, %cst_47 {dimension_numbers = #tpu.dot_dimension_numbers<[1], [0], [0], [1], [0, 0, 1, 1], [], []>} : vector<3x2xf32>, vector<2x2xf32>, vector<3x2xf32> -> vector<3x2xf32>
      %42 = arith.addf %34, %41 : vector<3x2xf32>
      %43 = vector.extract_strided_slice %39 {offsets = [1, 0], sizes = [3, 2], strides = [1, 1]} : vector<5x2xf32> to vector<3x2xf32>
      %cst_48 = arith.constant dense<0.000000e+00> : vector<3x2xf32>
      %44 = tpu.matmul %43, %9, %cst_48 {dimension_numbers = #tpu.dot_dimension_numbers<[1], [0], [0], [1], [0, 0, 1, 1], [], []>} : vector<3x2xf32>, vector<2x2xf32>, vector<3x2xf32> -> vector<3x2xf32>
      %45 = arith.addf %42, %44 : vector<3x2xf32>
      %46 = vector.extract_strided_slice %39 {offsets = [2, 0], sizes = [3, 2], strides = [1, 1]} : vector<5x2xf32> to vector<3x2xf32>
      %cst_49 = arith.constant dense<0.000000e+00> : vector<3x2xf32>
      %47 = tpu.matmul %46, %11, %cst_49 {dimension_numbers = #tpu.dot_dimension_numbers<[1], [0], [0], [1], [0, 0, 1, 1], [], []>} : vector<3x2xf32>, vector<2x2xf32>, vector<3x2xf32> -> vector<3x2xf32>
      %48 = arith.addf %45, %47 : vector<3x2xf32>
      %c2_i32 = arith.constant 2 : i32
      %49 = arith.addi %arg5, %c2_i32 : i32
      %c0_50 = arith.constant 0 : index
      %50 = arith.index_cast %49 : i32 to index
      %c0_51 = arith.constant 0 : index
      %c0_52 = arith.constant 0 : index
      %51 = vector.load %arg1[%c0_50, %50, %c0_51, %c0_52] : memref<1x5x5x2xbf16, #tpu.memory_space<vmem>>, vector<1x1x5x2xbf16>
      %52 = vector.shape_cast %51 : vector<1x1x5x2xbf16> to vector<5x2xbf16>
      %53 = arith.extf %52 : vector<5x2xbf16> to vector<5x2xf32>
      %54 = vector.extract_strided_slice %53 {offsets = [0, 0], sizes = [3, 2], strides = [1, 1]} : vector<5x2xf32> to vector<3x2xf32>
      %cst_53 = arith.constant dense<0.000000e+00> : vector<3x2xf32>
      %55 = tpu.matmul %54, %13, %cst_53 {dimension_numbers = #tpu.dot_dimension_numbers<[1], [0], [0], [1], [0, 0, 1, 1], [], []>} : vector<3x2xf32>, vector<2x2xf32>, vector<3x2xf32> -> vector<3x2xf32>
      %56 = arith.addf %48, %55 : vector<3x2xf32>
      %57 = vector.extract_strided_slice %53 {offsets = [1, 0], sizes = [3, 2], strides = [1, 1]} : vector<5x2xf32> to vector<3x2xf32>
      %cst_54 = arith.constant dense<0.000000e+00> : vector<3x2xf32>
      %58 = tpu.matmul %57, %15, %cst_54 {dimension_numbers = #tpu.dot_dimension_numbers<[1], [0], [0], [1], [0, 0, 1, 1], [], []>} : vector<3x2xf32>, vector<2x2xf32>, vector<3x2xf32> -> vector<3x2xf32>
      %59 = arith.addf %56, %58 : vector<3x2xf32>
      %60 = vector.extract_strided_slice %53 {offsets = [2, 0], sizes = [3, 2], strides = [1, 1]} : vector<5x2xf32> to vector<3x2xf32>
      %cst_55 = arith.constant dense<0.000000e+00> : vector<3x2xf32>
      %61 = tpu.matmul %60, %17, %cst_55 {dimension_numbers = #tpu.dot_dimension_numbers<[1], [0], [0], [1], [0, 0, 1, 1], [], []>} : vector<3x2xf32>, vector<2x2xf32>, vector<3x2xf32> -> vector<3x2xf32>
      %62 = arith.addf %59, %61 : vector<3x2xf32>
      %63 = vector.broadcast %18 : vector<1x2xf32> to vector<3x2xf32>
      %64 = arith.addf %62, %63 : vector<3x2xf32>
      %65 = arith.truncf %64 : vector<3x2xf32> to vector<3x2xbf16>
      %c0_56 = arith.constant 0 : index
      %66 = arith.index_cast %arg5 : i32 to index
      %c0_57 = arith.constant 0 : index
      %c0_58 = arith.constant 0 : index
      %67 = vector.load %arg4[%c0_56, %66, %c0_57, %c0_58] : memref<1x3x3x2xbf16, #tpu.memory_space<vmem>>, vector<1x1x3x2xbf16>
      %68 = vector.shape_cast %67 : vector<1x1x3x2xbf16> to vector<3x2xbf16>
      %69 = vector.shape_cast %65 : vector<3x2xbf16> to vector<1x1x3x2xbf16>
      tpu.vector_store %arg4[%c0_56, %66, %c0_57, %c0_58], %69 {strides = array<i32>} : memref<1x3x3x2xbf16, #tpu.memory_space<vmem>>, vector<1x1x3x2xbf16>,
    }
    %c3_i32_35 = arith.constant 3 : i32
    return
  }
  func.func @transform_0(%arg0: i32) -> (i32, i32, i32, i32) {
    %c0_i32 = arith.constant 0 : i32
    %c0_i32_0 = arith.constant 0 : i32
    %c0_i32_1 = arith.constant 0 : i32
    %c0_i32_2 = arith.constant 0 : i32
    return %arg0, %c0_i32, %c0_i32_0, %c0_i32_1 : i32, i32, i32, i32
  }
  func.func @transform_1(%arg0: i32) -> (i32, i32, i32, i32) {
    %c0_i32 = arith.constant 0 : i32
    %c0_i32_0 = arith.constant 0 : i32
    %c0_i32_1 = arith.constant 0 : i32
    %c0_i32_2 = arith.constant 0 : i32
    %c0_i32_3 = arith.constant 0 : i32
    return %c0_i32, %c0_i32_0, %c0_i32_1, %c0_i32_2 : i32, i32, i32, i32
  }
  func.func @transform_2(%arg0: i32) -> (i32, i32) {
    %c0_i32 = arith.constant 0 : i32
    %c0_i32_0 = arith.constant 0 : i32
    %c0_i32_1 = arith.constant 0 : i32
    return %c0_i32, %c0_i32_0 : i32, i32
  }
  func.func @transform_3(%arg0: i32) -> (i32, i32, i32, i32) {
    %c0_i32 = arith.constant 0 : i32
    %c0_i32_0 = arith.constant 0 : i32
    %c0_i32_1 = arith.constant 0 : i32
    %c0_i32_2 = arith.constant 0 : i32
    return %arg0, %c0_i32, %c0_i32_0, %c0_i32_1 : i32, i32, i32, i32
  }
}

module attributes {stable_mosaic.version = 11 : i64} {
  func.func @conv3x3_s1_kernel(%arg0: i32, %arg1: memref<1x26x26x16xbf16, #tpu.memory_space<vmem>>, %arg2: memref<3x3x16x8xf32, #tpu.memory_space<vmem>>, %arg3: memref<1x8xf32, #tpu.memory_space<vmem>>, %arg4: memref<1x24x24x8xbf16, #tpu.memory_space<vmem>>) attributes {dimension_semantics = [#tpu.dimension_semantics<parallel>], iteration_bounds = array<i64: 2>, scalar_prefetch = 0 : i64, scratch_operands = 0 : i64, tpu.core_type = #tpu.core_type<tc>, window_params = [{transform_indices = @transform_0, window_bounds = array<i64: 1, 26, 26, 16>}, {pipeline_mode = #tpu.pipeline_mode<synchronous>, transform_indices = @transform_1, window_bounds = array<i64: 3, 3, 16, 8>}, {pipeline_mode = #tpu.pipeline_mode<synchronous>, transform_indices = @transform_2, window_bounds = array<i64: 1, 8>}, {transform_indices = @transform_3, window_bounds = array<i64: 1, 24, 24, 8>}]} {
    %c0 = arith.constant 0 : index
    %c0_0 = arith.constant 0 : index
    %c0_1 = arith.constant 0 : index
    %c0_2 = arith.constant 0 : index
    %0 = vector.load %arg2[%c0, %c0_0, %c0_1, %c0_2] : memref<3x3x16x8xf32, #tpu.memory_space<vmem>>, vector<1x1x16x8xf32>
    %1 = vector.shape_cast %0 : vector<1x1x16x8xf32> to vector<16x8xf32>
    %c0_3 = arith.constant 0 : index
    %c1 = arith.constant 1 : index
    %c0_4 = arith.constant 0 : index
    %c0_5 = arith.constant 0 : index
    %2 = vector.load %arg2[%c0_3, %c1, %c0_4, %c0_5] : memref<3x3x16x8xf32, #tpu.memory_space<vmem>>, vector<1x1x16x8xf32>
    %3 = vector.shape_cast %2 : vector<1x1x16x8xf32> to vector<16x8xf32>
    %c0_6 = arith.constant 0 : index
    %c2 = arith.constant 2 : index
    %c0_7 = arith.constant 0 : index
    %c0_8 = arith.constant 0 : index
    %4 = vector.load %arg2[%c0_6, %c2, %c0_7, %c0_8] : memref<3x3x16x8xf32, #tpu.memory_space<vmem>>, vector<1x1x16x8xf32>
    %5 = vector.shape_cast %4 : vector<1x1x16x8xf32> to vector<16x8xf32>
    %c1_9 = arith.constant 1 : index
    %c0_10 = arith.constant 0 : index
    %c0_11 = arith.constant 0 : index
    %c0_12 = arith.constant 0 : index
    %6 = vector.load %arg2[%c1_9, %c0_10, %c0_11, %c0_12] : memref<3x3x16x8xf32, #tpu.memory_space<vmem>>, vector<1x1x16x8xf32>
    %7 = vector.shape_cast %6 : vector<1x1x16x8xf32> to vector<16x8xf32>
    %c1_13 = arith.constant 1 : index
    %c1_14 = arith.constant 1 : index
    %c0_15 = arith.constant 0 : index
    %c0_16 = arith.constant 0 : index
    %8 = vector.load %arg2[%c1_13, %c1_14, %c0_15, %c0_16] : memref<3x3x16x8xf32, #tpu.memory_space<vmem>>, vector<1x1x16x8xf32>
    %9 = vector.shape_cast %8 : vector<1x1x16x8xf32> to vector<16x8xf32>
    %c1_17 = arith.constant 1 : index
    %c2_18 = arith.constant 2 : index
    %c0_19 = arith.constant 0 : index
    %c0_20 = arith.constant 0 : index
    %10 = vector.load %arg2[%c1_17, %c2_18, %c0_19, %c0_20] : memref<3x3x16x8xf32, #tpu.memory_space<vmem>>, vector<1x1x16x8xf32>
    %11 = vector.shape_cast %10 : vector<1x1x16x8xf32> to vector<16x8xf32>
    %c2_21 = arith.constant 2 : index
    %c0_22 = arith.constant 0 : index
    %c0_23 = arith.constant 0 : index
    %c0_24 = arith.constant 0 : index
    %12 = vector.load %arg2[%c2_21, %c0_22, %c0_23, %c0_24] : memref<3x3x16x8xf32, #tpu.memory_space<vmem>>, vector<1x1x16x8xf32>
    %13 = vector.shape_cast %12 : vector<1x1x16x8xf32> to vector<16x8xf32>
    %c2_25 = arith.constant 2 : index
    %c1_26 = arith.constant 1 : index
    %c0_27 = arith.constant 0 : index
    %c0_28 = arith.constant 0 : index
    %14 = vector.load %arg2[%c2_25, %c1_26, %c0_27, %c0_28] : memref<3x3x16x8xf32, #tpu.memory_space<vmem>>, vector<1x1x16x8xf32>
    %15 = vector.shape_cast %14 : vector<1x1x16x8xf32> to vector<16x8xf32>
    %c2_29 = arith.constant 2 : index
    %c2_30 = arith.constant 2 : index
    %c0_31 = arith.constant 0 : index
    %c0_32 = arith.constant 0 : index
    %16 = vector.load %arg2[%c2_29, %c2_30, %c0_31, %c0_32] : memref<3x3x16x8xf32, #tpu.memory_space<vmem>>, vector<1x1x16x8xf32>
    %17 = vector.shape_cast %16 : vector<1x1x16x8xf32> to vector<16x8xf32>
    %c0_33 = arith.constant 0 : index
    %c0_34 = arith.constant 0 : index
    %18 = vector.load %arg3[%c0_33, %c0_34] : memref<1x8xf32, #tpu.memory_space<vmem>>, vector<1x8xf32>
    %c0_i32 = arith.constant 0 : i32
    %c24_i32 = arith.constant 24 : i32
    %19 = arith.addi %c0_i32, %c24_i32 : i32
    %c1_i32 = arith.constant 1 : i32
    scf.for %arg5 = %c0_i32 to %19 step %c1_i32  : i32 {
      %cst = arith.constant 0.000000e+00 : f32
      %20 = vector.broadcast %cst : f32 to vector<24x8xf32>
      %c0_i32_36 = arith.constant 0 : i32
      %21 = arith.addi %arg5, %c0_i32_36 : i32
      %c0_37 = arith.constant 0 : index
      %22 = arith.index_cast %21 : i32 to index
      %c0_38 = arith.constant 0 : index
      %c0_39 = arith.constant 0 : index
      %23 = vector.load %arg1[%c0_37, %22, %c0_38, %c0_39] : memref<1x26x26x16xbf16, #tpu.memory_space<vmem>>, vector<1x1x26x16xbf16>
      %24 = vector.shape_cast %23 : vector<1x1x26x16xbf16> to vector<26x16xbf16>
      %25 = arith.extf %24 : vector<26x16xbf16> to vector<26x16xf32>
      %26 = vector.extract_strided_slice %25 {offsets = [0, 0], sizes = [24, 16], strides = [1, 1]} : vector<26x16xf32> to vector<24x16xf32>
      %cst_40 = arith.constant dense<0.000000e+00> : vector<24x8xf32>
      %27 = tpu.matmul %26, %1, %cst_40 {dimension_numbers = #tpu.dot_dimension_numbers<[1], [0], [0], [1], [0, 0, 1, 1], [], []>} : vector<24x16xf32>, vector<16x8xf32>, vector<24x8xf32> -> vector<24x8xf32>
      %28 = arith.addf %20, %27 : vector<24x8xf32>
      %29 = vector.extract_strided_slice %25 {offsets = [1, 0], sizes = [24, 16], strides = [1, 1]} : vector<26x16xf32> to vector<24x16xf32>
      %cst_41 = arith.constant dense<0.000000e+00> : vector<24x8xf32>
      %30 = tpu.matmul %29, %3, %cst_41 {dimension_numbers = #tpu.dot_dimension_numbers<[1], [0], [0], [1], [0, 0, 1, 1], [], []>} : vector<24x16xf32>, vector<16x8xf32>, vector<24x8xf32> -> vector<24x8xf32>
      %31 = arith.addf %28, %30 : vector<24x8xf32>
      %32 = vector.extract_strided_slice %25 {offsets = [2, 0], sizes = [24, 16], strides = [1, 1]} : vector<26x16xf32> to vector<24x16xf32>
      %cst_42 = arith.constant dense<0.000000e+00> : vector<24x8xf32>
      %33 = tpu.matmul %32, %5, %cst_42 {dimension_numbers = #tpu.dot_dimension_numbers<[1], [0], [0], [1], [0, 0, 1, 1], [], []>} : vector<24x16xf32>, vector<16x8xf32>, vector<24x8xf32> -> vector<24x8xf32>
      %34 = arith.addf %31, %33 : vector<24x8xf32>
      %c1_i32_43 = arith.constant 1 : i32
      %35 = arith.addi %arg5, %c1_i32_43 : i32
      %c0_44 = arith.constant 0 : index
      %36 = arith.index_cast %35 : i32 to index
      %c0_45 = arith.constant 0 : index
      %c0_46 = arith.constant 0 : index
      %37 = vector.load %arg1[%c0_44, %36, %c0_45, %c0_46] : memref<1x26x26x16xbf16, #tpu.memory_space<vmem>>, vector<1x1x26x16xbf16>
      %38 = vector.shape_cast %37 : vector<1x1x26x16xbf16> to vector<26x16xbf16>
      %39 = arith.extf %38 : vector<26x16xbf16> to vector<26x16xf32>
      %40 = vector.extract_strided_slice %39 {offsets = [0, 0], sizes = [24, 16], strides = [1, 1]} : vector<26x16xf32> to vector<24x16xf32>
      %cst_47 = arith.constant dense<0.000000e+00> : vector<24x8xf32>
      %41 = tpu.matmul %40, %7, %cst_47 {dimension_numbers = #tpu.dot_dimension_numbers<[1], [0], [0], [1], [0, 0, 1, 1], [], []>} : vector<24x16xf32>, vector<16x8xf32>, vector<24x8xf32> -> vector<24x8xf32>
      %42 = arith.addf %34, %41 : vector<24x8xf32>
      %43 = vector.extract_strided_slice %39 {offsets = [1, 0], sizes = [24, 16], strides = [1, 1]} : vector<26x16xf32> to vector<24x16xf32>
      %cst_48 = arith.constant dense<0.000000e+00> : vector<24x8xf32>
      %44 = tpu.matmul %43, %9, %cst_48 {dimension_numbers = #tpu.dot_dimension_numbers<[1], [0], [0], [1], [0, 0, 1, 1], [], []>} : vector<24x16xf32>, vector<16x8xf32>, vector<24x8xf32> -> vector<24x8xf32>
      %45 = arith.addf %42, %44 : vector<24x8xf32>
      %46 = vector.extract_strided_slice %39 {offsets = [2, 0], sizes = [24, 16], strides = [1, 1]} : vector<26x16xf32> to vector<24x16xf32>
      %cst_49 = arith.constant dense<0.000000e+00> : vector<24x8xf32>
      %47 = tpu.matmul %46, %11, %cst_49 {dimension_numbers = #tpu.dot_dimension_numbers<[1], [0], [0], [1], [0, 0, 1, 1], [], []>} : vector<24x16xf32>, vector<16x8xf32>, vector<24x8xf32> -> vector<24x8xf32>
      %48 = arith.addf %45, %47 : vector<24x8xf32>
      %c2_i32 = arith.constant 2 : i32
      %49 = arith.addi %arg5, %c2_i32 : i32
      %c0_50 = arith.constant 0 : index
      %50 = arith.index_cast %49 : i32 to index
      %c0_51 = arith.constant 0 : index
      %c0_52 = arith.constant 0 : index
      %51 = vector.load %arg1[%c0_50, %50, %c0_51, %c0_52] : memref<1x26x26x16xbf16, #tpu.memory_space<vmem>>, vector<1x1x26x16xbf16>
      %52 = vector.shape_cast %51 : vector<1x1x26x16xbf16> to vector<26x16xbf16>
      %53 = arith.extf %52 : vector<26x16xbf16> to vector<26x16xf32>
      %54 = vector.extract_strided_slice %53 {offsets = [0, 0], sizes = [24, 16], strides = [1, 1]} : vector<26x16xf32> to vector<24x16xf32>
      %cst_53 = arith.constant dense<0.000000e+00> : vector<24x8xf32>
      %55 = tpu.matmul %54, %13, %cst_53 {dimension_numbers = #tpu.dot_dimension_numbers<[1], [0], [0], [1], [0, 0, 1, 1], [], []>} : vector<24x16xf32>, vector<16x8xf32>, vector<24x8xf32> -> vector<24x8xf32>
      %56 = arith.addf %48, %55 : vector<24x8xf32>
      %57 = vector.extract_strided_slice %53 {offsets = [1, 0], sizes = [24, 16], strides = [1, 1]} : vector<26x16xf32> to vector<24x16xf32>
      %cst_54 = arith.constant dense<0.000000e+00> : vector<24x8xf32>
      %58 = tpu.matmul %57, %15, %cst_54 {dimension_numbers = #tpu.dot_dimension_numbers<[1], [0], [0], [1], [0, 0, 1, 1], [], []>} : vector<24x16xf32>, vector<16x8xf32>, vector<24x8xf32> -> vector<24x8xf32>
      %59 = arith.addf %56, %58 : vector<24x8xf32>
      %60 = vector.extract_strided_slice %53 {offsets = [2, 0], sizes = [24, 16], strides = [1, 1]} : vector<26x16xf32> to vector<24x16xf32>
      %cst_55 = arith.constant dense<0.000000e+00> : vector<24x8xf32>
      %61 = tpu.matmul %60, %17, %cst_55 {dimension_numbers = #tpu.dot_dimension_numbers<[1], [0], [0], [1], [0, 0, 1, 1], [], []>} : vector<24x16xf32>, vector<16x8xf32>, vector<24x8xf32> -> vector<24x8xf32>
      %62 = arith.addf %59, %61 : vector<24x8xf32>
      %63 = vector.broadcast %18 : vector<1x8xf32> to vector<24x8xf32>
      %64 = arith.addf %62, %63 : vector<24x8xf32>
      %cst_56 = arith.constant 0.000000e+00 : f32
      %65 = vector.broadcast %cst_56 : f32 to vector<24x8xf32>
      %66 = arith.cmpf ogt, %64, %65 : vector<24x8xf32>
      %cst_57 = arith.constant 3.000000e-01 : f32
      %67 = vector.broadcast %cst_57 : f32 to vector<24x8xf32>
      %68 = arith.mulf %67, %64 : vector<24x8xf32>
      %69 = arith.select %66, %64, %68 : vector<24x8xi1>, vector<24x8xf32>
      %70 = arith.truncf %69 : vector<24x8xf32> to vector<24x8xbf16>
      %c0_58 = arith.constant 0 : index
      %71 = arith.index_cast %arg5 : i32 to index
      %c0_59 = arith.constant 0 : index
      %c0_60 = arith.constant 0 : index
      %72 = vector.load %arg4[%c0_58, %71, %c0_59, %c0_60] : memref<1x24x24x8xbf16, #tpu.memory_space<vmem>>, vector<1x1x24x8xbf16>
      %73 = vector.shape_cast %72 : vector<1x1x24x8xbf16> to vector<24x8xbf16>
      %74 = vector.shape_cast %70 : vector<24x8xbf16> to vector<1x1x24x8xbf16>
      tpu.vector_store %arg4[%c0_58, %71, %c0_59, %c0_60], %74 {strides = array<i32>} : memref<1x24x24x8xbf16, #tpu.memory_space<vmem>>, vector<1x1x24x8xbf16>,
    }
    %c24_i32_35 = arith.constant 24 : i32
    return
  }
  func.func @transform_0(%arg0: i32) -> (i32, i32, i32, i32) {
    %c0_i32 = arith.constant 0 : i32
    %c0_i32_0 = arith.constant 0 : i32
    %c0_i32_1 = arith.constant 0 : i32
    %c0_i32_2 = arith.constant 0 : i32
    return %arg0, %c0_i32, %c0_i32_0, %c0_i32_1 : i32, i32, i32, i32
  }
  func.func @transform_1(%arg0: i32) -> (i32, i32, i32, i32) {
    %c0_i32 = arith.constant 0 : i32
    %c0_i32_0 = arith.constant 0 : i32
    %c0_i32_1 = arith.constant 0 : i32
    %c0_i32_2 = arith.constant 0 : i32
    %c0_i32_3 = arith.constant 0 : i32
    return %c0_i32, %c0_i32_0, %c0_i32_1, %c0_i32_2 : i32, i32, i32, i32
  }
  func.func @transform_2(%arg0: i32) -> (i32, i32) {
    %c0_i32 = arith.constant 0 : i32
    %c0_i32_0 = arith.constant 0 : i32
    %c0_i32_1 = arith.constant 0 : i32
    return %c0_i32, %c0_i32_0 : i32, i32
  }
  func.func @transform_3(%arg0: i32) -> (i32, i32, i32, i32) {
    %c0_i32 = arith.constant 0 : i32
    %c0_i32_0 = arith.constant 0 : i32
    %c0_i32_1 = arith.constant 0 : i32
    %c0_i32_2 = arith.constant 0 : i32
    return %arg0, %c0_i32, %c0_i32_0, %c0_i32_1 : i32, i32, i32, i32
  }
}

module attributes {stable_mosaic.version = 11 : i64} {
  func.func @conv3x3_s1_kernel(%arg0: i32, %arg1: memref<1x26x26x8xbf16, #tpu.memory_space<vmem>>, %arg2: memref<3x3x8x2xf32, #tpu.memory_space<vmem>>, %arg3: memref<1x2xf32, #tpu.memory_space<vmem>>, %arg4: memref<1x24x24x2xbf16, #tpu.memory_space<vmem>>) attributes {dimension_semantics = [#tpu.dimension_semantics<parallel>], iteration_bounds = array<i64: 2>, scalar_prefetch = 0 : i64, scratch_operands = 0 : i64, tpu.core_type = #tpu.core_type<tc>, window_params = [{transform_indices = @transform_0, window_bounds = array<i64: 1, 26, 26, 8>}, {pipeline_mode = #tpu.pipeline_mode<synchronous>, transform_indices = @transform_1, window_bounds = array<i64: 3, 3, 8, 2>}, {pipeline_mode = #tpu.pipeline_mode<synchronous>, transform_indices = @transform_2, window_bounds = array<i64: 1, 2>}, {transform_indices = @transform_3, window_bounds = array<i64: 1, 24, 24, 2>}]} {
    %c0 = arith.constant 0 : index
    %c0_0 = arith.constant 0 : index
    %c0_1 = arith.constant 0 : index
    %c0_2 = arith.constant 0 : index
    %0 = vector.load %arg2[%c0, %c0_0, %c0_1, %c0_2] : memref<3x3x8x2xf32, #tpu.memory_space<vmem>>, vector<1x1x8x2xf32>
    %1 = vector.shape_cast %0 : vector<1x1x8x2xf32> to vector<8x2xf32>
    %c0_3 = arith.constant 0 : index
    %c1 = arith.constant 1 : index
    %c0_4 = arith.constant 0 : index
    %c0_5 = arith.constant 0 : index
    %2 = vector.load %arg2[%c0_3, %c1, %c0_4, %c0_5] : memref<3x3x8x2xf32, #tpu.memory_space<vmem>>, vector<1x1x8x2xf32>
    %3 = vector.shape_cast %2 : vector<1x1x8x2xf32> to vector<8x2xf32>
    %c0_6 = arith.constant 0 : index
    %c2 = arith.constant 2 : index
    %c0_7 = arith.constant 0 : index
    %c0_8 = arith.constant 0 : index
    %4 = vector.load %arg2[%c0_6, %c2, %c0_7, %c0_8] : memref<3x3x8x2xf32, #tpu.memory_space<vmem>>, vector<1x1x8x2xf32>
    %5 = vector.shape_cast %4 : vector<1x1x8x2xf32> to vector<8x2xf32>
    %c1_9 = arith.constant 1 : index
    %c0_10 = arith.constant 0 : index
    %c0_11 = arith.constant 0 : index
    %c0_12 = arith.constant 0 : index
    %6 = vector.load %arg2[%c1_9, %c0_10, %c0_11, %c0_12] : memref<3x3x8x2xf32, #tpu.memory_space<vmem>>, vector<1x1x8x2xf32>
    %7 = vector.shape_cast %6 : vector<1x1x8x2xf32> to vector<8x2xf32>
    %c1_13 = arith.constant 1 : index
    %c1_14 = arith.constant 1 : index
    %c0_15 = arith.constant 0 : index
    %c0_16 = arith.constant 0 : index
    %8 = vector.load %arg2[%c1_13, %c1_14, %c0_15, %c0_16] : memref<3x3x8x2xf32, #tpu.memory_space<vmem>>, vector<1x1x8x2xf32>
    %9 = vector.shape_cast %8 : vector<1x1x8x2xf32> to vector<8x2xf32>
    %c1_17 = arith.constant 1 : index
    %c2_18 = arith.constant 2 : index
    %c0_19 = arith.constant 0 : index
    %c0_20 = arith.constant 0 : index
    %10 = vector.load %arg2[%c1_17, %c2_18, %c0_19, %c0_20] : memref<3x3x8x2xf32, #tpu.memory_space<vmem>>, vector<1x1x8x2xf32>
    %11 = vector.shape_cast %10 : vector<1x1x8x2xf32> to vector<8x2xf32>
    %c2_21 = arith.constant 2 : index
    %c0_22 = arith.constant 0 : index
    %c0_23 = arith.constant 0 : index
    %c0_24 = arith.constant 0 : index
    %12 = vector.load %arg2[%c2_21, %c0_22, %c0_23, %c0_24] : memref<3x3x8x2xf32, #tpu.memory_space<vmem>>, vector<1x1x8x2xf32>
    %13 = vector.shape_cast %12 : vector<1x1x8x2xf32> to vector<8x2xf32>
    %c2_25 = arith.constant 2 : index
    %c1_26 = arith.constant 1 : index
    %c0_27 = arith.constant 0 : index
    %c0_28 = arith.constant 0 : index
    %14 = vector.load %arg2[%c2_25, %c1_26, %c0_27, %c0_28] : memref<3x3x8x2xf32, #tpu.memory_space<vmem>>, vector<1x1x8x2xf32>
    %15 = vector.shape_cast %14 : vector<1x1x8x2xf32> to vector<8x2xf32>
    %c2_29 = arith.constant 2 : index
    %c2_30 = arith.constant 2 : index
    %c0_31 = arith.constant 0 : index
    %c0_32 = arith.constant 0 : index
    %16 = vector.load %arg2[%c2_29, %c2_30, %c0_31, %c0_32] : memref<3x3x8x2xf32, #tpu.memory_space<vmem>>, vector<1x1x8x2xf32>
    %17 = vector.shape_cast %16 : vector<1x1x8x2xf32> to vector<8x2xf32>
    %c0_33 = arith.constant 0 : index
    %c0_34 = arith.constant 0 : index
    %18 = vector.load %arg3[%c0_33, %c0_34] : memref<1x2xf32, #tpu.memory_space<vmem>>, vector<1x2xf32>
    %c0_i32 = arith.constant 0 : i32
    %c24_i32 = arith.constant 24 : i32
    %19 = arith.addi %c0_i32, %c24_i32 : i32
    %c1_i32 = arith.constant 1 : i32
    scf.for %arg5 = %c0_i32 to %19 step %c1_i32  : i32 {
      %cst = arith.constant 0.000000e+00 : f32
      %20 = vector.broadcast %cst : f32 to vector<24x2xf32>
      %c0_i32_36 = arith.constant 0 : i32
      %21 = arith.addi %arg5, %c0_i32_36 : i32
      %c0_37 = arith.constant 0 : index
      %22 = arith.index_cast %21 : i32 to index
      %c0_38 = arith.constant 0 : index
      %c0_39 = arith.constant 0 : index
      %23 = vector.load %arg1[%c0_37, %22, %c0_38, %c0_39] : memref<1x26x26x8xbf16, #tpu.memory_space<vmem>>, vector<1x1x26x8xbf16>
      %24 = vector.shape_cast %23 : vector<1x1x26x8xbf16> to vector<26x8xbf16>
      %25 = arith.extf %24 : vector<26x8xbf16> to vector<26x8xf32>
      %26 = vector.extract_strided_slice %25 {offsets = [0, 0], sizes = [24, 8], strides = [1, 1]} : vector<26x8xf32> to vector<24x8xf32>
      %cst_40 = arith.constant dense<0.000000e+00> : vector<24x2xf32>
      %27 = tpu.matmul %26, %1, %cst_40 {dimension_numbers = #tpu.dot_dimension_numbers<[1], [0], [0], [1], [0, 0, 1, 1], [], []>} : vector<24x8xf32>, vector<8x2xf32>, vector<24x2xf32> -> vector<24x2xf32>
      %28 = arith.addf %20, %27 : vector<24x2xf32>
      %29 = vector.extract_strided_slice %25 {offsets = [1, 0], sizes = [24, 8], strides = [1, 1]} : vector<26x8xf32> to vector<24x8xf32>
      %cst_41 = arith.constant dense<0.000000e+00> : vector<24x2xf32>
      %30 = tpu.matmul %29, %3, %cst_41 {dimension_numbers = #tpu.dot_dimension_numbers<[1], [0], [0], [1], [0, 0, 1, 1], [], []>} : vector<24x8xf32>, vector<8x2xf32>, vector<24x2xf32> -> vector<24x2xf32>
      %31 = arith.addf %28, %30 : vector<24x2xf32>
      %32 = vector.extract_strided_slice %25 {offsets = [2, 0], sizes = [24, 8], strides = [1, 1]} : vector<26x8xf32> to vector<24x8xf32>
      %cst_42 = arith.constant dense<0.000000e+00> : vector<24x2xf32>
      %33 = tpu.matmul %32, %5, %cst_42 {dimension_numbers = #tpu.dot_dimension_numbers<[1], [0], [0], [1], [0, 0, 1, 1], [], []>} : vector<24x8xf32>, vector<8x2xf32>, vector<24x2xf32> -> vector<24x2xf32>
      %34 = arith.addf %31, %33 : vector<24x2xf32>
      %c1_i32_43 = arith.constant 1 : i32
      %35 = arith.addi %arg5, %c1_i32_43 : i32
      %c0_44 = arith.constant 0 : index
      %36 = arith.index_cast %35 : i32 to index
      %c0_45 = arith.constant 0 : index
      %c0_46 = arith.constant 0 : index
      %37 = vector.load %arg1[%c0_44, %36, %c0_45, %c0_46] : memref<1x26x26x8xbf16, #tpu.memory_space<vmem>>, vector<1x1x26x8xbf16>
      %38 = vector.shape_cast %37 : vector<1x1x26x8xbf16> to vector<26x8xbf16>
      %39 = arith.extf %38 : vector<26x8xbf16> to vector<26x8xf32>
      %40 = vector.extract_strided_slice %39 {offsets = [0, 0], sizes = [24, 8], strides = [1, 1]} : vector<26x8xf32> to vector<24x8xf32>
      %cst_47 = arith.constant dense<0.000000e+00> : vector<24x2xf32>
      %41 = tpu.matmul %40, %7, %cst_47 {dimension_numbers = #tpu.dot_dimension_numbers<[1], [0], [0], [1], [0, 0, 1, 1], [], []>} : vector<24x8xf32>, vector<8x2xf32>, vector<24x2xf32> -> vector<24x2xf32>
      %42 = arith.addf %34, %41 : vector<24x2xf32>
      %43 = vector.extract_strided_slice %39 {offsets = [1, 0], sizes = [24, 8], strides = [1, 1]} : vector<26x8xf32> to vector<24x8xf32>
      %cst_48 = arith.constant dense<0.000000e+00> : vector<24x2xf32>
      %44 = tpu.matmul %43, %9, %cst_48 {dimension_numbers = #tpu.dot_dimension_numbers<[1], [0], [0], [1], [0, 0, 1, 1], [], []>} : vector<24x8xf32>, vector<8x2xf32>, vector<24x2xf32> -> vector<24x2xf32>
      %45 = arith.addf %42, %44 : vector<24x2xf32>
      %46 = vector.extract_strided_slice %39 {offsets = [2, 0], sizes = [24, 8], strides = [1, 1]} : vector<26x8xf32> to vector<24x8xf32>
      %cst_49 = arith.constant dense<0.000000e+00> : vector<24x2xf32>
      %47 = tpu.matmul %46, %11, %cst_49 {dimension_numbers = #tpu.dot_dimension_numbers<[1], [0], [0], [1], [0, 0, 1, 1], [], []>} : vector<24x8xf32>, vector<8x2xf32>, vector<24x2xf32> -> vector<24x2xf32>
      %48 = arith.addf %45, %47 : vector<24x2xf32>
      %c2_i32 = arith.constant 2 : i32
      %49 = arith.addi %arg5, %c2_i32 : i32
      %c0_50 = arith.constant 0 : index
      %50 = arith.index_cast %49 : i32 to index
      %c0_51 = arith.constant 0 : index
      %c0_52 = arith.constant 0 : index
      %51 = vector.load %arg1[%c0_50, %50, %c0_51, %c0_52] : memref<1x26x26x8xbf16, #tpu.memory_space<vmem>>, vector<1x1x26x8xbf16>
      %52 = vector.shape_cast %51 : vector<1x1x26x8xbf16> to vector<26x8xbf16>
      %53 = arith.extf %52 : vector<26x8xbf16> to vector<26x8xf32>
      %54 = vector.extract_strided_slice %53 {offsets = [0, 0], sizes = [24, 8], strides = [1, 1]} : vector<26x8xf32> to vector<24x8xf32>
      %cst_53 = arith.constant dense<0.000000e+00> : vector<24x2xf32>
      %55 = tpu.matmul %54, %13, %cst_53 {dimension_numbers = #tpu.dot_dimension_numbers<[1], [0], [0], [1], [0, 0, 1, 1], [], []>} : vector<24x8xf32>, vector<8x2xf32>, vector<24x2xf32> -> vector<24x2xf32>
      %56 = arith.addf %48, %55 : vector<24x2xf32>
      %57 = vector.extract_strided_slice %53 {offsets = [1, 0], sizes = [24, 8], strides = [1, 1]} : vector<26x8xf32> to vector<24x8xf32>
      %cst_54 = arith.constant dense<0.000000e+00> : vector<24x2xf32>
      %58 = tpu.matmul %57, %15, %cst_54 {dimension_numbers = #tpu.dot_dimension_numbers<[1], [0], [0], [1], [0, 0, 1, 1], [], []>} : vector<24x8xf32>, vector<8x2xf32>, vector<24x2xf32> -> vector<24x2xf32>
      %59 = arith.addf %56, %58 : vector<24x2xf32>
      %60 = vector.extract_strided_slice %53 {offsets = [2, 0], sizes = [24, 8], strides = [1, 1]} : vector<26x8xf32> to vector<24x8xf32>
      %cst_55 = arith.constant dense<0.000000e+00> : vector<24x2xf32>
      %61 = tpu.matmul %60, %17, %cst_55 {dimension_numbers = #tpu.dot_dimension_numbers<[1], [0], [0], [1], [0, 0, 1, 1], [], []>} : vector<24x8xf32>, vector<8x2xf32>, vector<24x2xf32> -> vector<24x2xf32>
      %62 = arith.addf %59, %61 : vector<24x2xf32>
      %63 = vector.broadcast %18 : vector<1x2xf32> to vector<24x2xf32>
      %64 = arith.addf %62, %63 : vector<24x2xf32>
      %cst_56 = arith.constant 0.000000e+00 : f32
      %65 = vector.broadcast %cst_56 : f32 to vector<24x2xf32>
      %66 = arith.cmpf ogt, %64, %65 : vector<24x2xf32>
      %cst_57 = arith.constant 3.000000e-01 : f32
      %67 = vector.broadcast %cst_57 : f32 to vector<24x2xf32>
      %68 = arith.mulf %67, %64 : vector<24x2xf32>
      %69 = arith.select %66, %64, %68 : vector<24x2xi1>, vector<24x2xf32>
      %70 = arith.truncf %69 : vector<24x2xf32> to vector<24x2xbf16>
      %c0_58 = arith.constant 0 : index
      %71 = arith.index_cast %arg5 : i32 to index
      %c0_59 = arith.constant 0 : index
      %c0_60 = arith.constant 0 : index
      %72 = vector.load %arg4[%c0_58, %71, %c0_59, %c0_60] : memref<1x24x24x2xbf16, #tpu.memory_space<vmem>>, vector<1x1x24x2xbf16>
      %73 = vector.shape_cast %72 : vector<1x1x24x2xbf16> to vector<24x2xbf16>
      %74 = vector.shape_cast %70 : vector<24x2xbf16> to vector<1x1x24x2xbf16>
      tpu.vector_store %arg4[%c0_58, %71, %c0_59, %c0_60], %74 {strides = array<i32>} : memref<1x24x24x2xbf16, #tpu.memory_space<vmem>>, vector<1x1x24x2xbf16>,
    }
    %c24_i32_35 = arith.constant 24 : i32
    return
  }
  func.func @transform_0(%arg0: i32) -> (i32, i32, i32, i32) {
    %c0_i32 = arith.constant 0 : i32
    %c0_i32_0 = arith.constant 0 : i32
    %c0_i32_1 = arith.constant 0 : i32
    %c0_i32_2 = arith.constant 0 : i32
    return %arg0, %c0_i32, %c0_i32_0, %c0_i32_1 : i32, i32, i32, i32
  }
  func.func @transform_1(%arg0: i32) -> (i32, i32, i32, i32) {
    %c0_i32 = arith.constant 0 : i32
    %c0_i32_0 = arith.constant 0 : i32
    %c0_i32_1 = arith.constant 0 : i32
    %c0_i32_2 = arith.constant 0 : i32
    %c0_i32_3 = arith.constant 0 : i32
    return %c0_i32, %c0_i32_0, %c0_i32_1, %c0_i32_2 : i32, i32, i32, i32
  }
  func.func @transform_2(%arg0: i32) -> (i32, i32) {
    %c0_i32 = arith.constant 0 : i32
    %c0_i32_0 = arith.constant 0 : i32
    %c0_i32_1 = arith.constant 0 : i32
    return %c0_i32, %c0_i32_0 : i32, i32
  }
  func.func @transform_3(%arg0: i32) -> (i32, i32, i32, i32) {
    %c0_i32 = arith.constant 0 : i32
    %c0_i32_0 = arith.constant 0 : i32
    %c0_i32_1 = arith.constant 0 : i32
    %c0_i32_2 = arith.constant 0 : i32
    return %arg0, %c0_i32, %c0_i32_0, %c0_i32_1 : i32, i32, i32, i32
  }
}

module attributes {stable_mosaic.version = 11 : i64} {
  func.func @conv3x3_s1_kernel(%arg0: i32, %arg1: memref<1x26x26x2xbf16, #tpu.memory_space<vmem>>, %arg2: memref<3x3x2x2xf32, #tpu.memory_space<vmem>>, %arg3: memref<1x2xf32, #tpu.memory_space<vmem>>, %arg4: memref<1x24x24x2xbf16, #tpu.memory_space<vmem>>) attributes {dimension_semantics = [#tpu.dimension_semantics<parallel>], iteration_bounds = array<i64: 2>, scalar_prefetch = 0 : i64, scratch_operands = 0 : i64, tpu.core_type = #tpu.core_type<tc>, window_params = [{transform_indices = @transform_0, window_bounds = array<i64: 1, 26, 26, 2>}, {pipeline_mode = #tpu.pipeline_mode<synchronous>, transform_indices = @transform_1, window_bounds = array<i64: 3, 3, 2, 2>}, {pipeline_mode = #tpu.pipeline_mode<synchronous>, transform_indices = @transform_2, window_bounds = array<i64: 1, 2>}, {transform_indices = @transform_3, window_bounds = array<i64: 1, 24, 24, 2>}]} {
    %c0 = arith.constant 0 : index
    %c0_0 = arith.constant 0 : index
    %c0_1 = arith.constant 0 : index
    %c0_2 = arith.constant 0 : index
    %0 = vector.load %arg2[%c0, %c0_0, %c0_1, %c0_2] : memref<3x3x2x2xf32, #tpu.memory_space<vmem>>, vector<1x1x2x2xf32>
    %1 = vector.shape_cast %0 : vector<1x1x2x2xf32> to vector<2x2xf32>
    %c0_3 = arith.constant 0 : index
    %c1 = arith.constant 1 : index
    %c0_4 = arith.constant 0 : index
    %c0_5 = arith.constant 0 : index
    %2 = vector.load %arg2[%c0_3, %c1, %c0_4, %c0_5] : memref<3x3x2x2xf32, #tpu.memory_space<vmem>>, vector<1x1x2x2xf32>
    %3 = vector.shape_cast %2 : vector<1x1x2x2xf32> to vector<2x2xf32>
    %c0_6 = arith.constant 0 : index
    %c2 = arith.constant 2 : index
    %c0_7 = arith.constant 0 : index
    %c0_8 = arith.constant 0 : index
    %4 = vector.load %arg2[%c0_6, %c2, %c0_7, %c0_8] : memref<3x3x2x2xf32, #tpu.memory_space<vmem>>, vector<1x1x2x2xf32>
    %5 = vector.shape_cast %4 : vector<1x1x2x2xf32> to vector<2x2xf32>
    %c1_9 = arith.constant 1 : index
    %c0_10 = arith.constant 0 : index
    %c0_11 = arith.constant 0 : index
    %c0_12 = arith.constant 0 : index
    %6 = vector.load %arg2[%c1_9, %c0_10, %c0_11, %c0_12] : memref<3x3x2x2xf32, #tpu.memory_space<vmem>>, vector<1x1x2x2xf32>
    %7 = vector.shape_cast %6 : vector<1x1x2x2xf32> to vector<2x2xf32>
    %c1_13 = arith.constant 1 : index
    %c1_14 = arith.constant 1 : index
    %c0_15 = arith.constant 0 : index
    %c0_16 = arith.constant 0 : index
    %8 = vector.load %arg2[%c1_13, %c1_14, %c0_15, %c0_16] : memref<3x3x2x2xf32, #tpu.memory_space<vmem>>, vector<1x1x2x2xf32>
    %9 = vector.shape_cast %8 : vector<1x1x2x2xf32> to vector<2x2xf32>
    %c1_17 = arith.constant 1 : index
    %c2_18 = arith.constant 2 : index
    %c0_19 = arith.constant 0 : index
    %c0_20 = arith.constant 0 : index
    %10 = vector.load %arg2[%c1_17, %c2_18, %c0_19, %c0_20] : memref<3x3x2x2xf32, #tpu.memory_space<vmem>>, vector<1x1x2x2xf32>
    %11 = vector.shape_cast %10 : vector<1x1x2x2xf32> to vector<2x2xf32>
    %c2_21 = arith.constant 2 : index
    %c0_22 = arith.constant 0 : index
    %c0_23 = arith.constant 0 : index
    %c0_24 = arith.constant 0 : index
    %12 = vector.load %arg2[%c2_21, %c0_22, %c0_23, %c0_24] : memref<3x3x2x2xf32, #tpu.memory_space<vmem>>, vector<1x1x2x2xf32>
    %13 = vector.shape_cast %12 : vector<1x1x2x2xf32> to vector<2x2xf32>
    %c2_25 = arith.constant 2 : index
    %c1_26 = arith.constant 1 : index
    %c0_27 = arith.constant 0 : index
    %c0_28 = arith.constant 0 : index
    %14 = vector.load %arg2[%c2_25, %c1_26, %c0_27, %c0_28] : memref<3x3x2x2xf32, #tpu.memory_space<vmem>>, vector<1x1x2x2xf32>
    %15 = vector.shape_cast %14 : vector<1x1x2x2xf32> to vector<2x2xf32>
    %c2_29 = arith.constant 2 : index
    %c2_30 = arith.constant 2 : index
    %c0_31 = arith.constant 0 : index
    %c0_32 = arith.constant 0 : index
    %16 = vector.load %arg2[%c2_29, %c2_30, %c0_31, %c0_32] : memref<3x3x2x2xf32, #tpu.memory_space<vmem>>, vector<1x1x2x2xf32>
    %17 = vector.shape_cast %16 : vector<1x1x2x2xf32> to vector<2x2xf32>
    %c0_33 = arith.constant 0 : index
    %c0_34 = arith.constant 0 : index
    %18 = vector.load %arg3[%c0_33, %c0_34] : memref<1x2xf32, #tpu.memory_space<vmem>>, vector<1x2xf32>
    %c0_i32 = arith.constant 0 : i32
    %c24_i32 = arith.constant 24 : i32
    %19 = arith.addi %c0_i32, %c24_i32 : i32
    %c1_i32 = arith.constant 1 : i32
    scf.for %arg5 = %c0_i32 to %19 step %c1_i32  : i32 {
      %cst = arith.constant 0.000000e+00 : f32
      %20 = vector.broadcast %cst : f32 to vector<24x2xf32>
      %c0_i32_36 = arith.constant 0 : i32
      %21 = arith.addi %arg5, %c0_i32_36 : i32
      %c0_37 = arith.constant 0 : index
      %22 = arith.index_cast %21 : i32 to index
      %c0_38 = arith.constant 0 : index
      %c0_39 = arith.constant 0 : index
      %23 = vector.load %arg1[%c0_37, %22, %c0_38, %c0_39] : memref<1x26x26x2xbf16, #tpu.memory_space<vmem>>, vector<1x1x26x2xbf16>
      %24 = vector.shape_cast %23 : vector<1x1x26x2xbf16> to vector<26x2xbf16>
      %25 = arith.extf %24 : vector<26x2xbf16> to vector<26x2xf32>
      %26 = vector.extract_strided_slice %25 {offsets = [0, 0], sizes = [24, 2], strides = [1, 1]} : vector<26x2xf32> to vector<24x2xf32>
      %cst_40 = arith.constant dense<0.000000e+00> : vector<24x2xf32>
      %27 = tpu.matmul %26, %1, %cst_40 {dimension_numbers = #tpu.dot_dimension_numbers<[1], [0], [0], [1], [0, 0, 1, 1], [], []>} : vector<24x2xf32>, vector<2x2xf32>, vector<24x2xf32> -> vector<24x2xf32>
      %28 = arith.addf %20, %27 : vector<24x2xf32>
      %29 = vector.extract_strided_slice %25 {offsets = [1, 0], sizes = [24, 2], strides = [1, 1]} : vector<26x2xf32> to vector<24x2xf32>
      %cst_41 = arith.constant dense<0.000000e+00> : vector<24x2xf32>
      %30 = tpu.matmul %29, %3, %cst_41 {dimension_numbers = #tpu.dot_dimension_numbers<[1], [0], [0], [1], [0, 0, 1, 1], [], []>} : vector<24x2xf32>, vector<2x2xf32>, vector<24x2xf32> -> vector<24x2xf32>
      %31 = arith.addf %28, %30 : vector<24x2xf32>
      %32 = vector.extract_strided_slice %25 {offsets = [2, 0], sizes = [24, 2], strides = [1, 1]} : vector<26x2xf32> to vector<24x2xf32>
      %cst_42 = arith.constant dense<0.000000e+00> : vector<24x2xf32>
      %33 = tpu.matmul %32, %5, %cst_42 {dimension_numbers = #tpu.dot_dimension_numbers<[1], [0], [0], [1], [0, 0, 1, 1], [], []>} : vector<24x2xf32>, vector<2x2xf32>, vector<24x2xf32> -> vector<24x2xf32>
      %34 = arith.addf %31, %33 : vector<24x2xf32>
      %c1_i32_43 = arith.constant 1 : i32
      %35 = arith.addi %arg5, %c1_i32_43 : i32
      %c0_44 = arith.constant 0 : index
      %36 = arith.index_cast %35 : i32 to index
      %c0_45 = arith.constant 0 : index
      %c0_46 = arith.constant 0 : index
      %37 = vector.load %arg1[%c0_44, %36, %c0_45, %c0_46] : memref<1x26x26x2xbf16, #tpu.memory_space<vmem>>, vector<1x1x26x2xbf16>
      %38 = vector.shape_cast %37 : vector<1x1x26x2xbf16> to vector<26x2xbf16>
      %39 = arith.extf %38 : vector<26x2xbf16> to vector<26x2xf32>
      %40 = vector.extract_strided_slice %39 {offsets = [0, 0], sizes = [24, 2], strides = [1, 1]} : vector<26x2xf32> to vector<24x2xf32>
      %cst_47 = arith.constant dense<0.000000e+00> : vector<24x2xf32>
      %41 = tpu.matmul %40, %7, %cst_47 {dimension_numbers = #tpu.dot_dimension_numbers<[1], [0], [0], [1], [0, 0, 1, 1], [], []>} : vector<24x2xf32>, vector<2x2xf32>, vector<24x2xf32> -> vector<24x2xf32>
      %42 = arith.addf %34, %41 : vector<24x2xf32>
      %43 = vector.extract_strided_slice %39 {offsets = [1, 0], sizes = [24, 2], strides = [1, 1]} : vector<26x2xf32> to vector<24x2xf32>
      %cst_48 = arith.constant dense<0.000000e+00> : vector<24x2xf32>
      %44 = tpu.matmul %43, %9, %cst_48 {dimension_numbers = #tpu.dot_dimension_numbers<[1], [0], [0], [1], [0, 0, 1, 1], [], []>} : vector<24x2xf32>, vector<2x2xf32>, vector<24x2xf32> -> vector<24x2xf32>
      %45 = arith.addf %42, %44 : vector<24x2xf32>
      %46 = vector.extract_strided_slice %39 {offsets = [2, 0], sizes = [24, 2], strides = [1, 1]} : vector<26x2xf32> to vector<24x2xf32>
      %cst_49 = arith.constant dense<0.000000e+00> : vector<24x2xf32>
      %47 = tpu.matmul %46, %11, %cst_49 {dimension_numbers = #tpu.dot_dimension_numbers<[1], [0], [0], [1], [0, 0, 1, 1], [], []>} : vector<24x2xf32>, vector<2x2xf32>, vector<24x2xf32> -> vector<24x2xf32>
      %48 = arith.addf %45, %47 : vector<24x2xf32>
      %c2_i32 = arith.constant 2 : i32
      %49 = arith.addi %arg5, %c2_i32 : i32
      %c0_50 = arith.constant 0 : index
      %50 = arith.index_cast %49 : i32 to index
      %c0_51 = arith.constant 0 : index
      %c0_52 = arith.constant 0 : index
      %51 = vector.load %arg1[%c0_50, %50, %c0_51, %c0_52] : memref<1x26x26x2xbf16, #tpu.memory_space<vmem>>, vector<1x1x26x2xbf16>
      %52 = vector.shape_cast %51 : vector<1x1x26x2xbf16> to vector<26x2xbf16>
      %53 = arith.extf %52 : vector<26x2xbf16> to vector<26x2xf32>
      %54 = vector.extract_strided_slice %53 {offsets = [0, 0], sizes = [24, 2], strides = [1, 1]} : vector<26x2xf32> to vector<24x2xf32>
      %cst_53 = arith.constant dense<0.000000e+00> : vector<24x2xf32>
      %55 = tpu.matmul %54, %13, %cst_53 {dimension_numbers = #tpu.dot_dimension_numbers<[1], [0], [0], [1], [0, 0, 1, 1], [], []>} : vector<24x2xf32>, vector<2x2xf32>, vector<24x2xf32> -> vector<24x2xf32>
      %56 = arith.addf %48, %55 : vector<24x2xf32>
      %57 = vector.extract_strided_slice %53 {offsets = [1, 0], sizes = [24, 2], strides = [1, 1]} : vector<26x2xf32> to vector<24x2xf32>
      %cst_54 = arith.constant dense<0.000000e+00> : vector<24x2xf32>
      %58 = tpu.matmul %57, %15, %cst_54 {dimension_numbers = #tpu.dot_dimension_numbers<[1], [0], [0], [1], [0, 0, 1, 1], [], []>} : vector<24x2xf32>, vector<2x2xf32>, vector<24x2xf32> -> vector<24x2xf32>
      %59 = arith.addf %56, %58 : vector<24x2xf32>
      %60 = vector.extract_strided_slice %53 {offsets = [2, 0], sizes = [24, 2], strides = [1, 1]} : vector<26x2xf32> to vector<24x2xf32>
      %cst_55 = arith.constant dense<0.000000e+00> : vector<24x2xf32>
      %61 = tpu.matmul %60, %17, %cst_55 {dimension_numbers = #tpu.dot_dimension_numbers<[1], [0], [0], [1], [0, 0, 1, 1], [], []>} : vector<24x2xf32>, vector<2x2xf32>, vector<24x2xf32> -> vector<24x2xf32>
      %62 = arith.addf %59, %61 : vector<24x2xf32>
      %63 = vector.broadcast %18 : vector<1x2xf32> to vector<24x2xf32>
      %64 = arith.addf %62, %63 : vector<24x2xf32>
      %65 = arith.truncf %64 : vector<24x2xf32> to vector<24x2xbf16>
      %c0_56 = arith.constant 0 : index
      %66 = arith.index_cast %arg5 : i32 to index
      %c0_57 = arith.constant 0 : index
      %c0_58 = arith.constant 0 : index
      %67 = vector.load %arg4[%c0_56, %66, %c0_57, %c0_58] : memref<1x24x24x2xbf16, #tpu.memory_space<vmem>>, vector<1x1x24x2xbf16>
      %68 = vector.shape_cast %67 : vector<1x1x24x2xbf16> to vector<24x2xbf16>
      %69 = vector.shape_cast %65 : vector<24x2xbf16> to vector<1x1x24x2xbf16>
      tpu.vector_store %arg4[%c0_56, %66, %c0_57, %c0_58], %69 {strides = array<i32>} : memref<1x24x24x2xbf16, #tpu.memory_space<vmem>>, vector<1x1x24x2xbf16>,
    }
    %c24_i32_35 = arith.constant 24 : i32
    return
  }
  func.func @transform_0(%arg0: i32) -> (i32, i32, i32, i32) {
    %c0_i32 = arith.constant 0 : i32
    %c0_i32_0 = arith.constant 0 : i32
    %c0_i32_1 = arith.constant 0 : i32
    %c0_i32_2 = arith.constant 0 : i32
    return %arg0, %c0_i32, %c0_i32_0, %c0_i32_1 : i32, i32, i32, i32
  }
  func.func @transform_1(%arg0: i32) -> (i32, i32, i32, i32) {
    %c0_i32 = arith.constant 0 : i32
    %c0_i32_0 = arith.constant 0 : i32
    %c0_i32_1 = arith.constant 0 : i32
    %c0_i32_2 = arith.constant 0 : i32
    %c0_i32_3 = arith.constant 0 : i32
    return %c0_i32, %c0_i32_0, %c0_i32_1, %c0_i32_2 : i32, i32, i32, i32
  }
  func.func @transform_2(%arg0: i32) -> (i32, i32) {
    %c0_i32 = arith.constant 0 : i32
    %c0_i32_0 = arith.constant 0 : i32
    %c0_i32_1 = arith.constant 0 : i32
    return %c0_i32, %c0_i32_0 : i32, i32
  }
  func.func @transform_3(%arg0: i32) -> (i32, i32, i32, i32) {
    %c0_i32 = arith.constant 0 : i32
    %c0_i32_0 = arith.constant 0 : i32
    %c0_i32_1 = arith.constant 0 : i32
    %c0_i32_2 = arith.constant 0 : i32
    return %arg0, %c0_i32, %c0_i32_0, %c0_i32_1 : i32, i32, i32, i32
  }
}

module attributes {stable_mosaic.version = 11 : i64} {
  func.func @attn_kernel(%arg0: i32, %arg1: memref<1x576x2xbf16, #tpu.memory_space<vmem>>, %arg2: memref<1x9x2xbf16, #tpu.memory_space<vmem>>, %arg3: memref<1x8x9xbf16, #tpu.memory_space<vmem>>, %arg4: memref<8x8xf32, #tpu.memory_space<vmem>>, %arg5: memref<8x1xf32, #tpu.memory_space<vmem>>, %arg6: memref<1x8x576xf32, #tpu.memory_space<vmem>>) attributes {dimension_semantics = [#tpu.dimension_semantics<parallel>], iteration_bounds = array<i64: 2>, scalar_prefetch = 0 : i64, scratch_operands = 0 : i64, tpu.core_type = #tpu.core_type<tc>, window_params = [{transform_indices = @transform_0, window_bounds = array<i64: 1, 576, 2>}, {transform_indices = @transform_1, window_bounds = array<i64: 1, 9, 2>}, {transform_indices = @transform_2, window_bounds = array<i64: 1, 8, 9>}, {pipeline_mode = #tpu.pipeline_mode<synchronous>, transform_indices = @transform_3, window_bounds = array<i64: 8, 8>}, {pipeline_mode = #tpu.pipeline_mode<synchronous>, transform_indices = @transform_4, window_bounds = array<i64: 8, 1>}, {transform_indices = @transform_5, window_bounds = array<i64: 1, 8, 576>}]} {
    %c0 = arith.constant 0 : index
    %c0_0 = arith.constant 0 : index
    %c0_1 = arith.constant 0 : index
    %0 = vector.load %arg1[%c0, %c0_0, %c0_1] : memref<1x576x2xbf16, #tpu.memory_space<vmem>>, vector<1x576x2xbf16>
    %1 = vector.shape_cast %0 : vector<1x576x2xbf16> to vector<576x2xbf16>
    %2 = arith.extf %1 : vector<576x2xbf16> to vector<576x2xf32>
    %c0_2 = arith.constant 0 : index
    %c0_3 = arith.constant 0 : index
    %c0_4 = arith.constant 0 : index
    %3 = vector.load %arg2[%c0_2, %c0_3, %c0_4] : memref<1x9x2xbf16, #tpu.memory_space<vmem>>, vector<1x9x2xbf16>
    %4 = vector.shape_cast %3 : vector<1x9x2xbf16> to vector<9x2xbf16>
    %5 = arith.extf %4 : vector<9x2xbf16> to vector<9x2xf32>
    %c0_5 = arith.constant 0 : index
    %c0_6 = arith.constant 0 : index
    %c0_7 = arith.constant 0 : index
    %6 = vector.load %arg3[%c0_5, %c0_6, %c0_7] : memref<1x8x9xbf16, #tpu.memory_space<vmem>>, vector<1x8x9xbf16>
    %7 = vector.shape_cast %6 : vector<1x8x9xbf16> to vector<8x9xbf16>
    %8 = arith.extf %7 : vector<8x9xbf16> to vector<8x9xf32>
    %cst = arith.constant dense<0.000000e+00> : vector<9x576xf32>
    %9 = tpu.matmul %5, %2, %cst {dimension_numbers = #tpu.dot_dimension_numbers<[1], [1], [0], [0], [0, 0, 1, 0], [], []>} : vector<9x2xf32>, vector<576x2xf32>, vector<9x576xf32> -> vector<9x576xf32>
    %cst_8 = arith.constant dense<0xFF800000> : vector<9xf32>
    %10 = vector.multi_reduction <maximumf>, %9, %cst_8 [1] : vector<9x576xf32> to vector<9xf32>
    %11 = vector.shape_cast %10 : vector<9xf32> to vector<9x1xf32>
    %12 = vector.broadcast %11 : vector<9x1xf32> to vector<9x576xf32>
    %13 = arith.subf %9, %12 : vector<9x576xf32>
    %14 = math.exp %13 : vector<9x576xf32>
    %cst_9 = arith.constant dense<0.000000e+00> : vector<9xf32>
    %15 = vector.multi_reduction <add>, %14, %cst_9 [1] : vector<9x576xf32> to vector<9xf32>
    %16 = vector.shape_cast %15 : vector<9xf32> to vector<9x1xf32>
    %17 = tpu.reciprocal %16 {approx = true} : vector<9x1xf32> -> vector<9x1xf32>
    %18 = vector.broadcast %17 : vector<9x1xf32> to vector<9x576xf32>
    %19 = arith.mulf %14, %18 : vector<9x576xf32>
    %c0_10 = arith.constant 0 : index
    %c0_11 = arith.constant 0 : index
    %20 = vector.load %arg4[%c0_10, %c0_11] : memref<8x8xf32, #tpu.memory_space<vmem>>, vector<8x8xf32>
    %cst_12 = arith.constant dense<0.000000e+00> : vector<8x9xf32>
    %21 = tpu.matmul %20, %8, %cst_12 {dimension_numbers = #tpu.dot_dimension_numbers<[1], [0], [0], [1], [0, 0, 1, 1], [], []>} : vector<8x8xf32>, vector<8x9xf32>, vector<8x9xf32> -> vector<8x9xf32>
    %cst_13 = arith.constant dense<0.000000e+00> : vector<8x576xf32>
    %22 = tpu.matmul %21, %19, %cst_13 {dimension_numbers = #tpu.dot_dimension_numbers<[1], [0], [0], [1], [0, 0, 1, 1], [], []>} : vector<8x9xf32>, vector<9x576xf32>, vector<8x576xf32> -> vector<8x576xf32>
    %c0_14 = arith.constant 0 : index
    %c0_15 = arith.constant 0 : index
    %23 = vector.load %arg5[%c0_14, %c0_15] : memref<8x1xf32, #tpu.memory_space<vmem>>, vector<8x1xf32>
    %24 = vector.broadcast %23 : vector<8x1xf32> to vector<8x576xf32>
    %25 = arith.addf %22, %24 : vector<8x576xf32>
    %c0_16 = arith.constant 0 : index
    %c0_17 = arith.constant 0 : index
    %c0_18 = arith.constant 0 : index
    %26 = vector.load %arg6[%c0_16, %c0_17, %c0_18] : memref<1x8x576xf32, #tpu.memory_space<vmem>>, vector<1x8x576xf32>
    %27 = vector.shape_cast %26 : vector<1x8x576xf32> to vector<8x576xf32>
    %28 = vector.shape_cast %25 : vector<8x576xf32> to vector<1x8x576xf32>
    tpu.vector_store %arg6[%c0_16, %c0_17, %c0_18], %28 {strides = array<i32>} : memref<1x8x576xf32, #tpu.memory_space<vmem>>, vector<1x8x576xf32>,
    return
  }
  func.func @transform_0(%arg0: i32) -> (i32, i32, i32) {
    %c0_i32 = arith.constant 0 : i32
    %c0_i32_0 = arith.constant 0 : i32
    %c0_i32_1 = arith.constant 0 : i32
    return %arg0, %c0_i32, %c0_i32_0 : i32, i32, i32
  }
  func.func @transform_1(%arg0: i32) -> (i32, i32, i32) {
    %c0_i32 = arith.constant 0 : i32
    %c0_i32_0 = arith.constant 0 : i32
    %c0_i32_1 = arith.constant 0 : i32
    return %arg0, %c0_i32, %c0_i32_0 : i32, i32, i32
  }
  func.func @transform_2(%arg0: i32) -> (i32, i32, i32) {
    %c0_i32 = arith.constant 0 : i32
    %c0_i32_0 = arith.constant 0 : i32
    %c0_i32_1 = arith.constant 0 : i32
    return %arg0, %c0_i32, %c0_i32_0 : i32, i32, i32
  }
  func.func @transform_3(%arg0: i32) -> (i32, i32) {
    %c0_i32 = arith.constant 0 : i32
    %c0_i32_0 = arith.constant 0 : i32
    %c0_i32_1 = arith.constant 0 : i32
    return %c0_i32, %c0_i32_0 : i32, i32
  }
  func.func @transform_4(%arg0: i32) -> (i32, i32) {
    %c0_i32 = arith.constant 0 : i32
    %c0_i32_0 = arith.constant 0 : i32
    %c0_i32_1 = arith.constant 0 : i32
    return %c0_i32, %c0_i32_0 : i32, i32
  }
  func.func @transform_5(%arg0: i32) -> (i32, i32, i32) {
    %c0_i32 = arith.constant 0 : i32
    %c0_i32_0 = arith.constant 0 : i32
    %c0_i32_1 = arith.constant 0 : i32
    return %arg0, %c0_i32, %c0_i32_0 : i32, i32, i32
  }
}

</mosaic_0001>

<bundles_post_ra>
// kernel: self_attn_conv.12
= control target key start
LH: loop header
LB: loop body
LE: loop exit
PB: predicated region body
PF: predicated region fallthrough
CT: control target
= control target key end

     0   :  { %s1403_s15 = smov 0   ;;  %s1610_s0 = inlined_call_operand.vmem [shape: bf16[2,24,12,16], index: 0, kind: input, shape index: {}]   ;;  %s1611_s1 = inlined_call_operand.vmem [shape: bf16[2,24,12,16], index: 1, kind: input, shape index: {}]   ;;  %s1612_s2 = inlined_call_operand.vmem [shape: f32[3,3,16,16], index: 2, kind: input, shape index: {}]   ;;  %s1613_s3 = inlined_call_operand.vmem [shape: f32[1,16], index: 3, kind: input, shape index: {}]   ;;  %s1614_s4 = inlined_call_operand.vmem [shape: bf16[2,11,11,16], index: 4, kind: output, shape index: {}]  }
   0x1 LB: > { %s1167_s16 = sadd.s32 4294967295, %s1372_s15   ;;  %p1171_p0 = scmp.ge.s32.totalorder %s1372_s15, 1  ;;  %s1372_s15 = sphi %s1403_s15, %s14_s15  }
   0x2   : > { %p172_p1 = scmp.lt.s32.totalorder %s1372_s15, 3 }
   0x4   : > { %p173_p2 = pnand %p1171_p0, %p172_p1 }
   0x5   : > { %p203_p3 = scmp.lt.s32.totalorder (!%p173_p2), %s1167_s16, 1  ;;  %s1521_s18 = smov (!%p173_p2), 0  }
   0x6   : > { %176 = sbr.rel (%p173_p2) target bundleno = 251 (0xfb), region = 36 }
   0xb   : > { %v1414_v0 = vld [vmem:[%s1612_s2] sm:$0xff]  ;;  %v1419_v1 = vld [vmem:[%s1612_s2 + $0x8] sm:$0xff]  ;;  %v1424_v2 = vld [vmem:[%s1612_s2 + $0x10] sm:$0xff]  ;;  %s1616_s16 = smov (!%p203_p3, %s1167_s16), 1 }
   0xc   : > { %v1429_v3 = vld [vmem:[%s1612_s2 + $0x18] sm:$0xff]  ;;  %v1434_v4 = vld [vmem:[%s1612_s2 + $0x20] sm:$0xff]  ;;  %v1439_v5 = vld [vmem:[%s1612_s2 + $0x28] sm:$0xff]  ;;  %s1344_s17 = smul.u32 192, %s1616_s16 }
   0xd   : > { %v1444_v6 = vld [vmem:[%s1612_s2 + $0x30] sm:$0xff]  ;;  %v1449_v7 = vld [vmem:[%s1612_s2 + $0x38] sm:$0xff]  ;;  %v1454_v8 = vld [vmem:[%s1612_s2 + $0x40] sm:$0xff]  ;;  %s1345_s24 = smul.u32 88, %s1616_s16 }
   0xe   : > { %v1459_v9 = vld [vmem:[%s1612_s2 + $0x48] sm:$0xff]  ;;  %v1464_v10 = vld [vmem:[%s1612_s2 + $0x50] sm:$0xff]  ;;  %v1469_v11 = vld [vmem:[%s1612_s2 + $0x58] sm:$0xff]  ;;  %s1504_s7 = scalar_lea.vmem %s1610_s0, %s1344_s17  ;;  %s1509_s9 = scalar_lea.vmem %s1611_s1, %s1344_s17 }
   0xf   : > { %v1474_v12 = vld [vmem:[%s1612_s2 + $0x60] sm:$0xff]  ;;  %v1479_v13 = vld [vmem:[%s1612_s2 + $0x68] sm:$0xff]  ;;  %v1484_v14 = vld [vmem:[%s1612_s2 + $0x70] sm:$0xff]  ;;  %s1519_s14 = scalar_lea.vmem %s1614_s4, %s1345_s24 }
  0x10   : > { %v1489_v15 = vld [vmem:[%s1612_s2 + $0x78] sm:$0xff]  ;;  %v1494_v16 = vld [vmem:[%s1612_s2 + $0x80] sm:$0xff]  ;;  %v1499_v17 = vld [vmem:[%s1612_s2 + $0x88] sm:$0xff] }
  0x11   : > { %v1514_v18 = vld [vmem:[%s1613_s3] ss:$0 sm:$0xff] }
  0x12 LB: >> { %1281 = vmatprep.subr.mxu0 %v1429_v3  ;;  %1288 = vmatprep.subr.mxu1 %v1419_v1  ;;  %s1236_s17 = sshll.u32 %s1376_s18, 4  ;;  %vm265_vm0 = vcmask 130048   ;;  %vm428_vm1 = vcmask 1046528   ;;  %s1244_s21 = sshll.u32 %s1376_s18, 3  ;;  %vm1067_vm2 = vcmask 123904   ;;  %vm1065_vm7 = vcmask 125952   ;;  %s1376_s18 = sphi %s1521_s18, %s250_s18  }
  0x13   : >> { %1282 = vmatpush3.msra.mxu0 %v1429_v3  ;;  %1289 = vmatpush3.msra.mxu1 %v1419_v1  ;;  %s1535_s19 = scalar_lea.vmem %s1509_s9, %s1236_s17  ;;  %s1540_s20 = scalar_lea.vmem %s1504_s7, %s1236_s17  ;;  %vm1068_vm3 = vsmask.f32 1280 }
  0x14   : >> { %1283 = vmatprep.subr.mxu0 %v1424_v2  ;;  %1290 = vmatprep.subr.mxu1 %v1414_v0  ;;  %v261_v19 = vld [vmem:[%s1535_s19] ss:$8 sps:$4 sm:$0xff]   ;;  %v262_v20 = vld [vmem:[%s1535_s19 + $0x4] sm:$0x3]  ;;  %v1204_v25 = vld [vmem:[%s1540_s20 + $0xc] sm:$0x3]  ;;  %s1064_s22 = scalar_lea.vmem %s1519_s14, %s1244_s21 }
  0x15   : >> { %1284 = vmatpush3.msra.mxu0 %v1424_v2  ;;  %1291 = vmatpush3.msra.mxu1 %v1414_v0  ;;  %v263_v21 = vunpack.c.l.bf16 %v261_v19  ;;  %v255_v22 = vld [vmem:[%s1540_s20] ss:$8 sps:$4 sm:$0xff]   ;;  %v264_v23 = vunpack.c.l.bf16 %v262_v20  ;;  %v256_v24 = vld [vmem:[%s1540_s20 + $0x4] sm:$0x3]  ;;  %v520_v31 = vunpack.c.l.bf16 %v1204_v25  ;;  %v1208_v35 = vld [vmem:[%s1535_s19 + $0xc] sm:$0x3]  ;;  %v525_v38 = vunpack.c.h.bf16 %v261_v19 }
  0x16   : >> { %1295 = vmatprep.subr.mxu0 %v1439_v5  ;;  %1302 = vmatprep.subr.mxu1 %v1449_v7  ;;  %v257_v26 = vunpack.c.l.bf16 %v255_v22  ;;  %v258_v27 = vunpack.c.l.bf16 %v256_v24  ;;  %v519_v30 = vunpack.c.h.bf16 %v255_v22  ;;  %v1217_v36 = vld [vmem:[%s1540_s20 + $0x10] sm:$0xf]  ;;  %v1218_v37 = vld [vmem:[%s1540_s20 + $0x14] sm:$0x3]  ;;  %v526_v40 = vunpack.c.l.bf16 %v1208_v35  ;;  %vm1069_vm5 = vmand %vm1067_vm2, %vm1068_vm3  ;;  %s250_s18 = sadd.s32 1, %s1376_s18  }
  0x17   : >> { %1285 = vmatprep.mubr.msk.f32.mxu0 %vm265_vm0, %v263_v21  ;;  %v694_v34 = vrot.slane %v520_v31, 1  ;;  %v783_v41 = vunpack.c.l.bf16 %v1217_v36  ;;  %v784_v42 = vunpack.c.l.bf16 %v1218_v37  ;;  %v1221_v43 = vld [vmem:[%s1535_s19 + $0x10] sm:$0xf]  ;;  %v1222_v44 = vld [vmem:[%s1535_s19 + $0x14] sm:$0x3]  ;;  %p247_p4 = scmp.ge.s32.totalorder %s250_s18, 11  }
  0x18   : >> { %1292 = vmatprep.mubr.msk.f32.mxu1 %vm265_vm0, %v257_v26  ;;  %v429_v28 = vrot.slane %v257_v26, 1  ;;  %1286 = vmatmul.mubr.msk.f32.vlgmr.msra.gmra.mxu0 %vm265_vm0, %v264_v23  ;;  %v430_v29 = vrot.slane %v258_v27, 1  ;;  %v693_v33 = vrot.slane %v519_v30, 1  ;;  %v789_v47 = vunpack.c.l.bf16 %v1221_v43  ;;  %v1070_v43 = vld [vmem:[%s1064_s22 + $0x4] sm:$0x3] }
  0x19   : >> { %1293 = vmatmul.mubr.msk.f32.vlgmr.msra.gmra.mxu1 %vm265_vm0, %v258_v27  ;;  %1296 = vmatpush3.msra.mxu0 %v1439_v5  ;;  %v957_v45 = vrot.slane %v783_v41, 1  ;;  %v958_v46 = vrot.slane %v784_v42, 1  ;;  %v790_v48 = vunpack.c.l.bf16 %v1222_v44 }
  0x1a   : >> { %1297 = vmatprep.subr.mxu0 %v1434_v4  ;;  %1303 = vmatpush3.msra.mxu1 %v1449_v7  ;;  %v431_v32 = vsel %vm428_vm1, %v429_v28, %v430_v29  ;;  %v695_v39 = vsel %vm428_vm1, %v693_v33, %v694_v34 }
  0x1b   : >> { %1298 = vmatpush3.msra.mxu0 %v1434_v4  ;;  %1304 = vmatprep.subr.mxu1 %v1444_v6  ;;  %v959_v49 = vsel %vm428_vm1, %v957_v45, %v958_v46 }
  0x1c   : >> { %1299 = vmatprep.mubr.msk.f32.mxu0 %vm265_vm0, %v431_v32  ;;  %1305 = vmatpush3.msra.mxu1 %v1444_v6 }
  0x1d   : >> { %1306 = vmatprep.mubr.msk.f32.mxu1 %vm265_vm0, %v519_v30  ;;  %1309 = vmatprep.subr.mxu0 %v1459_v9 }
  0x1e   : >> { %1300 = vmatmul.mubr.msk.f32.vlgmr.msra.gmra.mxu0 %vm265_vm0, %v430_v29  ;;  %1307 = vmatmul.mubr.msk.f32.vlgmr.msra.gmra.mxu1 %vm265_vm0, %v520_v31 }
  0x1f   : >> { %1310 = vmatpush3.msra.mxu0 %v1459_v9  ;;  %1316 = vmatprep.subr.mxu1 %v1469_v11 }
  0x20   : >> { %1311 = vmatprep.subr.mxu0 %v1454_v8  ;;  %1317 = vmatpush3.msra.mxu1 %v1469_v11 }
  0x21   : >> { %1312 = vmatpush3.msra.mxu0 %v1454_v8  ;;  %1318 = vmatprep.subr.mxu1 %v1464_v10 }
  0x22   : >> { %1313 = vmatprep.mubr.msk.f32.mxu0 %vm265_vm0, %v525_v38  ;;  %1319 = vmatpush3.msra.mxu1 %v1464_v10 }
  0x23   : >> { %1320 = vmatprep.mubr.msk.f32.mxu1 %vm265_vm0, %v695_v39  ;;  %1323 = vmatprep.subr.mxu0 %v1479_v13 }
  0x24   : >> { %1314 = vmatmul.mubr.msk.f32.vlgmr.msra.gmra.mxu0 %vm265_vm0, %v526_v40  ;;  %1321 = vmatmul.mubr.msk.f32.vlgmr.msra.gmra.mxu1 %vm265_vm0, %v694_v34 }
  0x25   : >> { %1324 = vmatpush3.msra.mxu0 %v1479_v13  ;;  %1330 = vmatprep.subr.mxu1 %v1489_v15 }
  0x26   : >> { %1325 = vmatprep.subr.mxu0 %v1474_v12  ;;  %1331 = vmatpush3.msra.mxu1 %v1489_v15 }
  0x27   : >> { %1326 = vmatpush3.msra.mxu0 %v1474_v12  ;;  %1332 = vmatprep.subr.mxu1 %v1484_v14 }
  0x28   : >> { %1327 = vmatprep.mubr.msk.f32.mxu0 %vm265_vm0, %v783_v41  ;;  %1333 = vmatpush3.msra.mxu1 %v1484_v14 }
  0x29   : >> { %1334 = vmatprep.mubr.msk.f32.mxu1 %vm265_vm0, %v789_v47  ;;  %1337 = vmatprep.subr.mxu0 %v1499_v17 }
  0x2a   : >> { %1328 = vmatmul.mubr.msk.f32.vlgmr.msra.gmra.mxu0 %vm265_vm0, %v784_v42  ;;  %1335 = vmatmul.mubr.msk.f32.vlgmr.msra.gmra.mxu1 %vm265_vm0, %v790_v48 }
  0x2b   : >> { %1338 = vmatpush3.msra.mxu0 %v1499_v17  ;;  %1341 = vmatprep.mubr.msk.f32.mxu0 %vm265_vm0, %v959_v49 }
  0x2c   : >> { %1339 = vmatprep.subr.mxu0 %v1494_v16 }
  0x2d   : >> { %1340 = vmatpush3.msra.mxu0 %v1494_v16 }
  0x2e   : >> { %1342 = vmatmul.mubr.msk.f32.vlgmr.msra.gmra.mxu0 %vm265_vm0, %v958_v46 }
  0xd8   : >> { %v1287_v50 = vpop.f32.mrf.mxu0 }
  0xd9   : >> { %v1294_v51 = vpop.f32.mrf.mxu1 }
  0xda   : >> { %v338_v52 = vpop.f32.mrf.mxu0  ;;  %v425_v54 = vadd.f32 %v1294_v51, %v1287_v50 }
  0xdb   : >> { %v419_v53 = vpop.f32.mrf.mxu1 }
  0xdc   : >> { %v420_v57 = vadd.f32 %v419_v53, %v338_v52 }
  0xde   : >> { %v1301_v55 = vpop.f32.mrf.mxu0  ;;  %v1308_v56 = vpop.f32.mrf.mxu1 }
  0xdf   : >> { %v512_v58 = vadd.f32 %v1301_v55, %v425_v54 }
  0xe0   : >> { %v502_v59 = vpop.f32.mrf.mxu0  ;;  %v599_v60 = vpop.f32.mrf.mxu1 }
  0xe1   : >> { %v609_v61 = vadd.f32 %v1308_v56, %v512_v58  ;;  %v511_v62 = vadd.f32 %v502_v59, %v420_v57 }
  0xe3   : >> { %v608_v63 = vadd.f32 %v599_v60, %v511_v62 }
  0xe4   : >> { %v1315_v19 = vpop.f32.mrf.mxu0  ;;  %v1322_v20 = vpop.f32.mrf.mxu1 }
  0xe5   : >> { %v692_v21 = vadd.f32 %v1315_v19, %v609_v61 }
  0xe6   : >> { %v682_v22 = vpop.f32.mrf.mxu0  ;;  %v766_v23 = vpop.f32.mrf.mxu1 }
  0xe7   : >> { %v776_v24 = vadd.f32 %v1322_v20, %v692_v21  ;;  %v691_v25 = vadd.f32 %v682_v22, %v608_v63 }
  0xe9   : >> { %v775_v26 = vadd.f32 %v766_v23, %v691_v25 }
  0xea   : >> { %v1329_v27 = vpop.f32.mrf.mxu0  ;;  %v1336_v28 = vpop.f32.mrf.mxu1 }
  0xeb   : >> { %v873_v29 = vadd.f32 %v1329_v27, %v776_v24 }
  0xec   : >> { %v863_v30 = vpop.f32.mrf.mxu0  ;;  %v946_v33 = vpop.f32.mrf.mxu1 }
  0xed   : >> { %v956_v31 = vadd.f32 %v1336_v28, %v873_v29  ;;  %v872_v32 = vadd.f32 %v863_v30, %v775_v26 }
  0xee   : >> { %v1343_v34 = vpop.f32.mrf.mxu0 }
  0xef   : >> { %v955_v35 = vadd.f32 %v946_v33, %v872_v32  ;;  %v1040_v36 = vadd.f32 %v1343_v34, %v956_v31 }
  0xf0   : >> { %v1030_v37 = vpop.f32.mrf.mxu0 }
  0xf1   : >> { %v1048_v38 = vadd.f32 %v1514_v18, %v1040_v36  ;;  %v1039_v39 = vadd.f32 %v1030_v37, %v955_v35 }
  0xf3   : >> { %vm1050_vm4 = vcmp.gt.f32.partialorder %v1048_v38, 0.0  ;;  %v1052_v40 = vmul.f32 0.3, %v1048_v38  ;;  %v1047_v41 = vadd.f32 %v1514_v18, %v1039_v39 }
  0xf5   : >> { %v1054_v42 = vsel %vm1050_vm4, %v1048_v38, %v1052_v40  ;;  %vm1049_vm6 = vcmp.gt.f32.partialorder %v1047_v41, 0.0  ;;  %v1051_v44 = vmul.f32 0.3, %v1047_v41 }
  0xf6   : >> { %v1243_v45 = vpack.c.bf16 %v1054_v42, %v1054_v42  ;;  %249 = sbr.rel (!%p247_p4) target bundleno = 18 (0x12), region = 91 }
  0xf7   : >> { %v1053_v46 = vsel %vm1049_vm6, %v1047_v41, %v1051_v44 }
  0xf8   : >> { %v1071_v47 = vsel %vm1069_vm5, %v1243_v45, %v1070_v43  ;;  %v1242_v48 = vpack.c.bf16 %v1053_v46, %v1053_v46 }
  0xf9   : >> { %1072 = vst [vmem:[%s1064_s22 + $0x4] sm:$0x3] %v1071_v47 }
  0xfa   : >> { %1066 = vst.msk [vmem:[%s1064_s22] sm:$0xf] %vm1065_vm7, %v1242_v48 }
  0xfb PF: > { %s14_s15 = sadd.s32 1, %s1372_s15  }
  0xfc   : > { %p11_p5 = scmp.ge.s32.totalorder %s14_s15, 4  }
  0xfe   :  { %13 = sbr.rel (!%p11_p5) target bundleno = 1 (0x1), region = 102 }

// kernel: self_attn_conv.16
= control target key start
LH: loop header
LB: loop body
LE: loop exit
PB: predicated region body
PF: predicated region fallthrough
CT: control target
= control target key end

     0   :  { %s1114_s12 = smov 0   ;;  %s1225_s0 = inlined_call_operand.vmem [shape: bf16[2,5,5,8], index: 0, kind: input, shape index: {}]   ;;  %s1226_s1 = inlined_call_operand.vmem [shape: f32[3,3,8,8], index: 1, kind: input, shape index: {}]   ;;  %s1227_s2 = inlined_call_operand.vmem [shape: f32[1,8], index: 2, kind: input, shape index: {}]   ;;  %s1228_s3 = inlined_call_operand.vmem [shape: bf16[2,3,3,8], index: 3, kind: output, shape index: {}]  }
   0x1 LB: > { %s960_s13 = sadd.s32 4294967295, %s1086_s12   ;;  %p964_p0 = scmp.ge.s32.totalorder %s1086_s12, 1  ;;  %s1086_s12 = sphi %s1114_s12, %s13_s12  }
   0x2   : > { %p137_p1 = scmp.lt.s32.totalorder %s1086_s12, 3 }
   0x4   : > { %p138_p2 = pnand %p964_p0, %p137_p1 }
   0x5   : > { %p161_p3 = scmp.lt.s32.totalorder (!%p138_p2), %s960_s13, 1  ;;  %s1182_s17 = smov (!%p138_p2), 0  }
   0x6   : > { %141 = sbr.rel (%p138_p2) target bundleno = 240 (0xf0), region = 32 }
   0xb   : > { %v1125_v0 = vld [vmem:[%s1226_s1] sm:$0xff]  ;;  %v1130_v1 = vld [vmem:[%s1226_s1 + $0x8] sm:$0xff]  ;;  %v1135_v2 = vld [vmem:[%s1226_s1 + $0x10] sm:$0xff]  ;;  %s1230_s13 = smov (!%p161_p3, %s960_s13), 1 }
   0xc   : > { %v1140_v3 = vld [vmem:[%s1226_s1 + $0x18] sm:$0xff]  ;;  %v1145_v4 = vld [vmem:[%s1226_s1 + $0x20] sm:$0xff]  ;;  %v1150_v5 = vld [vmem:[%s1226_s1 + $0x28] sm:$0xff]  ;;  %s1056_s7 = smul.u32 20, %s1230_s13 }
   0xd   : > { %v1155_v6 = vld [vmem:[%s1226_s1 + $0x30] sm:$0xff]  ;;  %v1160_v7 = vld [vmem:[%s1226_s1 + $0x38] sm:$0xff]  ;;  %v1165_v8 = vld [vmem:[%s1226_s1 + $0x40] sm:$0xff]  ;;  %s1057_s8 = smul.u32 6, %s1230_s13 }
   0xe   : > { %v1170_v9 = vld [vmem:[%s1227_s2] ss:$0 sm:$0xff]  ;;  %s1175_s11 = scalar_lea.vmem %s1225_s0, %s1056_s7 }
   0xf   : > { %s1180_s16 = scalar_lea.vmem %s1228_s3, %s1057_s8 }
  0x10 LB: >> { %v1092_v10 = vmov 0.0   ;;  %vm1093_vm0 = vmmov 0   ;;  %s975_s13 = sshll.u32 %s1090_s17, 2  ;;  %vm201_vm1 = vcmask 64512   ;;  %s990_s19 = sshll.u32 %s1090_s17, 1  ;;  %vm884_vm2 = vcmask 58368   ;;  %s1090_s17 = sphi %s1182_s17, %s194_s17  }
  0x11   : >> { %1011 = vmatprep.subr.mxu0 %v1092_v10  ;;  %1016 = vmatprep.subr.mxu1 %v1092_v10  ;;  %s196_s18 = scalar_lea.vmem %s1175_s11, %s975_s13  ;;  %s883_s20 = scalar_lea.vmem %s1180_s16, %s990_s19  ;;  %vm885_vm3 = vsmask.f32 1280 }
  0x12   : >> { %1012 = vmatpush3.msra.mxu0 %v1130_v1  ;;  %1013 = vmatprep.mubr.msk.f32.mxu0 %vm1093_vm0, %v1092_v10  ;;  %v197_v11 = vld [vmem:[%s196_s18] sm:$0x7]  ;;  %v980_v12 = vld [vmem:[%s196_s18 + $0x4] sm:$0x7]  ;;  %v985_v16 = vld [vmem:[%s196_s18 + $0x8] sm:$0x7] }
  0x13   : >> { %1017 = vmatpush3.msra.mxu1 %v1125_v0  ;;  %1018 = vmatprep.mubr.msk.f32.mxu1 %vm1093_vm0, %v1092_v10  ;;  %v198_v13 = vunpack.c.l.bf16 %v197_v11  ;;  %v424_v15 = vunpack.c.l.bf16 %v980_v12  ;;  %v651_v19 = vunpack.c.l.bf16 %v985_v16  ;;  %vm886_vm4 = vmand %vm884_vm2, %vm885_vm3  ;;  %v887_v50 = vld [vmem:[%s883_s20] sm:$0x3]  ;;  %s194_s17 = sadd.s32 1, %s1090_s17  }
  0x14   : >> { %1021 = vmatprep.subr.mxu0 %v1092_v10  ;;  %1026 = vmatprep.subr.mxu1 %v1092_v10  ;;  %p191_p4 = scmp.ge.s32.totalorder %s194_s17, 3  }
  0x15   : >> { %v200_v14 = vrot.slane %v198_v13, 1  ;;  %1019 = vmatmul.mubr.msk.f32.vlgmr.msra.gmra.mxu1 %vm201_vm1, %v198_v13  ;;  %v346_v17 = vrot.slane %v198_v13, 2  ;;  %v573_v18 = vrot.slane %v424_v15, 2  ;;  %v499_v20 = vrot.slane %v424_v15, 1 }
  0x16   : >> { %1027 = vmatpush3.msra.mxu1 %v1140_v3  ;;  %1028 = vmatprep.mubr.msk.f32.mxu1 %vm1093_vm0, %v1092_v10  ;;  %v726_v21 = vrot.slane %v651_v19, 1  ;;  %v800_v22 = vrot.slane %v651_v19, 2 }
  0x17   : >> { %1014 = vmatmul.mubr.msk.f32.vlgmr.msra.gmra.mxu0 %vm201_vm1, %v200_v14  ;;  %1036 = vmatprep.subr.mxu1 %v1092_v10 }
  0x18   : >> { %1022 = vmatpush3.msra.mxu0 %v1135_v2  ;;  %1023 = vmatprep.mubr.msk.f32.mxu0 %vm1093_vm0, %v1092_v10 }
  0x19   : >> { %1031 = vmatprep.subr.mxu0 %v1092_v10  ;;  %1029 = vmatmul.mubr.msk.f32.vlgmr.msra.gmra.mxu1 %vm201_vm1, %v424_v15 }
  0x1a   : >> { %1037 = vmatpush3.msra.mxu1 %v1150_v5  ;;  %1038 = vmatprep.mubr.msk.f32.mxu1 %vm1093_vm0, %v1092_v10 }
  0x1b   : >> { %1024 = vmatmul.mubr.msk.f32.vlgmr.msra.gmra.mxu0 %vm201_vm1, %v346_v17  ;;  %1046 = vmatprep.subr.mxu1 %v1092_v10 }
  0x1c   : >> { %1032 = vmatpush3.msra.mxu0 %v1145_v4  ;;  %1033 = vmatprep.mubr.msk.f32.mxu0 %vm1093_vm0, %v1092_v10 }
  0x1d   : >> { %1041 = vmatprep.subr.mxu0 %v1092_v10  ;;  %1039 = vmatmul.mubr.msk.f32.vlgmr.msra.gmra.mxu1 %vm201_vm1, %v573_v18 }
  0x1e   : >> { %1047 = vmatpush3.msra.mxu1 %v1160_v7  ;;  %1048 = vmatprep.mubr.msk.f32.mxu1 %vm1093_vm0, %v1092_v10 }
  0x1f   : >> { %1034 = vmatmul.mubr.msk.f32.vlgmr.msra.gmra.mxu0 %vm201_vm1, %v499_v20 }
  0x20   : >> { %1042 = vmatpush3.msra.mxu0 %v1155_v6  ;;  %1043 = vmatprep.mubr.msk.f32.mxu0 %vm1093_vm0, %v1092_v10 }
  0x21   : >> { %1051 = vmatprep.subr.mxu0 %v1092_v10  ;;  %1049 = vmatmul.mubr.msk.f32.vlgmr.msra.gmra.mxu1 %vm201_vm1, %v726_v21 }
  0x23   : >> { %1044 = vmatmul.mubr.msk.f32.vlgmr.msra.gmra.mxu0 %vm201_vm1, %v651_v19 }
  0x24   : >> { %1052 = vmatpush3.msra.mxu0 %v1165_v8  ;;  %1053 = vmatprep.mubr.msk.f32.mxu0 %vm1093_vm0, %v1092_v10 }
  0x27   : >> { %1054 = vmatmul.mubr.msk.f32.vlgmr.msra.gmra.mxu0 %vm201_vm1, %v800_v22 }
  0xd5   : >> { %v342_v23 = vpop.f32.mrf.mxu1 }
  0xd7   : >> { %v270_v24 = vpop.f32.mrf.mxu0  ;;  %v1020_v25 = vpop.f32.mrf.mxu1 }
  0xd8   : >> { %v343_v28 = vadd.f32 %v342_v23, %v270_v24 }
  0xd9   : >> { %v1015_v26 = vpop.f32.mrf.mxu0  ;;  %v494_v27 = vpop.f32.mrf.mxu1 }
  0xdb   : >> { %v415_v29 = vpop.f32.mrf.mxu0  ;;  %v1030_v30 = vpop.f32.mrf.mxu1 }
  0xdc   : >> { %v419_v31 = vadd.f32 %v415_v29, %v343_v28 }
  0xdd   : >> { %v1025_v32 = vpop.f32.mrf.mxu0  ;;  %v642_v33 = vpop.f32.mrf.mxu1 }
  0xde   : >> { %v498_v34 = vadd.f32 %v494_v27, %v419_v31 }
  0xdf   : >> { %v568_v35 = vpop.f32.mrf.mxu0  ;;  %v1040_v36 = vpop.f32.mrf.mxu1 }
  0xe0   : >> { %v572_v37 = vadd.f32 %v568_v35, %v498_v34 }
  0xe1   : >> { %v1035_v38 = vpop.f32.mrf.mxu0  ;;  %v795_v39 = vpop.f32.mrf.mxu1 }
  0xe2   : >> { %v646_v40 = vadd.f32 %v642_v33, %v572_v37 }
  0xe3   : >> { %v721_v41 = vpop.f32.mrf.mxu0  ;;  %v1050_v42 = vpop.f32.mrf.mxu1 }
  0xe4   : >> { %v725_v43 = vadd.f32 %v721_v41, %v646_v40 }
  0xe5   : >> { %v1045_v44 = vpop.f32.mrf.mxu0 }
  0xe6   : >> { %v799_v45 = vadd.f32 %v795_v39, %v725_v43 }
  0xe7   : >> { %v869_v46 = vpop.f32.mrf.mxu0 }
  0xe8   : >> { %v873_v47 = vadd.f32 %v869_v46, %v799_v45 }
  0xe9   : >> { %v1055_v48 = vpop.f32.mrf.mxu0 }
  0xea   : >> { %v880_v49 = vadd.f32 %v1170_v9, %v873_v47 }
  0xeb   : > { %193 = sbr.rel (!%p191_p4) target bundleno = 16 (0x10), region = 81 }
  0xec   : >> { %v881_v51 = vpack.c.bf16 %v880_v49, %v880_v49 }
  0xee   : >> { %v888_v52 = vsel %vm886_vm4, %v881_v51, %v887_v50 }
  0xef   : >> { %889 = vst [vmem:[%s883_s20] sm:$0x3] %v888_v52 }
  0xf0 PF: > { %s13_s12 = sadd.s32 1, %s1086_s12  }
  0xf1   : > { %p10_p5 = scmp.ge.s32.totalorder %s13_s12, 4  }
  0xf3   :  { %12 = sbr.rel (!%p10_p5) target bundleno = 1 (0x1), region = 92 }

// kernel: self_attn_conv.15
= control target key start
LH: loop header
LB: loop body
LE: loop exit
PB: predicated region body
PF: predicated region fallthrough
CT: control target
= control target key end

     0   :  { %s1223_s15 = smov 0   ;;  %s1340_s0 = inlined_call_operand.vmem [shape: bf16[2,11,6,8], index: 0, kind: input, shape index: {}]   ;;  %s1341_s1 = inlined_call_operand.vmem [shape: bf16[2,11,5,8], index: 1, kind: input, shape index: {}]   ;;  %s1342_s2 = inlined_call_operand.vmem [shape: f32[3,3,8,8], index: 2, kind: input, shape index: {}]   ;;  %s1343_s3 = inlined_call_operand.vmem [shape: f32[1,8], index: 3, kind: input, shape index: {}]   ;;  %s1344_s4 = inlined_call_operand.vmem [shape: bf16[2,5,5,8], index: 4, kind: output, shape index: {}]  }
   0x1 LB: > { %s1047_s16 = sadd.s32 4294967295, %s1190_s15   ;;  %p1051_p0 = scmp.ge.s32.totalorder %s1190_s15, 1  ;;  %s1190_s15 = sphi %s1223_s15, %s14_s15  }
   0x2   : > { %p172_p1 = scmp.lt.s32.totalorder %s1190_s15, 3 }
   0x4   : > { %p173_p2 = pnand %p1051_p0, %p172_p1 }
   0x5   : > { %p203_p3 = scmp.lt.s32.totalorder (!%p173_p2), %s1047_s16, 1  ;;  %s1296_s24 = smov (!%p173_p2), 0  }
   0x6   : > { %176 = sbr.rel (%p173_p2) target bundleno = 241 (0xf1), region = 36 }
   0xb   : > { %v1234_v0 = vld [vmem:[%s1342_s2] sm:$0xff]  ;;  %v1239_v1 = vld [vmem:[%s1342_s2 + $0x8] sm:$0xff]  ;;  %v1244_v2 = vld [vmem:[%s1342_s2 + $0x10] sm:$0xff]  ;;  %s1346_s16 = smov (!%p203_p3, %s1047_s16), 1 }
   0xc   : > { %v1249_v3 = vld [vmem:[%s1342_s2 + $0x18] sm:$0xff]  ;;  %v1254_v4 = vld [vmem:[%s1342_s2 + $0x20] sm:$0xff]  ;;  %v1259_v5 = vld [vmem:[%s1342_s2 + $0x28] sm:$0xff]  ;;  %s1160_s11 = smul.u32 44, %s1346_s16 }
   0xd   : > { %v1264_v6 = vld [vmem:[%s1342_s2 + $0x30] sm:$0xff]  ;;  %v1269_v7 = vld [vmem:[%s1342_s2 + $0x38] sm:$0xff]  ;;  %v1274_v8 = vld [vmem:[%s1342_s2 + $0x40] sm:$0xff]  ;;  %s1161_s12 = smul.u32 20, %s1346_s16 }
   0xe   : > { %v1279_v9 = vld [vmem:[%s1343_s3] ss:$0 sm:$0xff]  ;;  %s1284_s17 = scalar_lea.vmem %s1340_s0, %s1160_s11  ;;  %s1289_s20 = scalar_lea.vmem %s1341_s1, %s1160_s11 }
   0xf   : > { %s1294_s23 = scalar_lea.vmem %s1344_s4, %s1161_s12 }
  0x10 LB: >> { %v1196_v10 = vmov 0.0   ;;  %vm1197_vm0 = vmmov 0   ;;  %s1091_s16 = sshll.u32 %s1194_s24, 3  ;;  %vm251_vm1 = vcmask 64512   ;;  %s1088_s27 = sshll.u32 %s1194_s24, 2  ;;  %vm947_vm2 = vcmask 59392   ;;  %s1194_s24 = sphi %s1296_s24, %s241_s24  }
  0x11   : >> { %1115 = vmatprep.subr.mxu0 %v1196_v10  ;;  %1120 = vmatprep.subr.mxu1 %v1196_v10  ;;  %s248_s25 = scalar_lea.vmem %s1289_s20, %s1091_s16  ;;  %s244_s26 = scalar_lea.vmem %s1284_s17, %s1091_s16  ;;  %vm948_vm3 = vsmask.f32 2304 }
  0x12   : >> { %1116 = vmatpush3.msra.mxu0 %v1239_v1  ;;  %1117 = vmatprep.mubr.msk.f32.mxu0 %vm1197_vm0, %v1196_v10  ;;  %v249_v11 = vld [vmem:[%s248_s25] sm:$0x7]  ;;  %v1071_v14 = vld [vmem:[%s244_s26 + $0x4] sm:$0x7]  ;;  %v1080_v21 = vld [vmem:[%s244_s26 + $0x8] sm:$0x7]  ;;  %s946_s28 = scalar_lea.vmem %s1294_s23, %s1088_s27 }
  0x13   : >> { %1121 = vmatpush3.msra.mxu1 %v1234_v0  ;;  %1122 = vmatprep.mubr.msk.f32.mxu1 %vm1197_vm0, %v1196_v10  ;;  %v250_v12 = vunpack.c.l.bf16 %v249_v11  ;;  %v245_v13 = vld [vmem:[%s244_s26] sm:$0x7]  ;;  %v476_v17 = vunpack.c.l.bf16 %v1071_v14  ;;  %v1074_v18 = vld [vmem:[%s248_s25 + $0x4] sm:$0x7]  ;;  %v1083_v22 = vld [vmem:[%s248_s25 + $0x8] sm:$0x7]  ;;  %v707_v23 = vunpack.c.l.bf16 %v1080_v21 }
  0x14   : >> { %1125 = vmatprep.subr.mxu0 %v1196_v10  ;;  %1130 = vmatprep.subr.mxu1 %v1196_v10  ;;  %v246_v15 = vunpack.c.l.bf16 %v245_v13  ;;  %v480_v19 = vunpack.c.l.bf16 %v1074_v18  ;;  %v711_v24 = vunpack.c.l.bf16 %v1083_v22  ;;  %vm949_vm5 = vmand %vm947_vm2, %vm948_vm3  ;;  %v950_v55 = vld [vmem:[%s946_s28] sm:$0x7]  ;;  %s241_s24 = sadd.s32 1, %s1194_s24  }
  0x15   : >> { %1118 = vmatmul.mubr.msk.f32.vlgmr.msra.gmra.mxu0 %vm251_vm1, %v250_v12  ;;  %v629_v20 = vrot.slane %v476_v17, 1  ;;  %v860_v25 = vrot.slane %v707_v23, 1  ;;  %p238_p4 = scmp.ge.s32.totalorder %s241_s24, 5  }
  0x16   : >> { %1123 = vmatmul.mubr.msk.f32.vlgmr.msra.gmra.mxu1 %vm251_vm1, %v246_v15  ;;  %v398_v16 = vrot.slane %v246_v15, 1  ;;  %1126 = vmatpush3.msra.mxu0 %v1244_v2 }
  0x17   : >> { %1131 = vmatpush3.msra.mxu1 %v1249_v3  ;;  %1127 = vmatprep.mubr.msk.f32.mxu0 %vm1197_vm0, %v1196_v10 }
  0x18   : >> { %1132 = vmatprep.mubr.msk.f32.mxu1 %vm1197_vm0, %v1196_v10  ;;  %1135 = vmatprep.subr.mxu0 %v1196_v10 }
  0x19   : >> { %1128 = vmatmul.mubr.msk.f32.vlgmr.msra.gmra.mxu0 %vm251_vm1, %v398_v16  ;;  %1140 = vmatprep.subr.mxu1 %v1196_v10 }
  0x1a   : >> { %1133 = vmatmul.mubr.msk.f32.vlgmr.msra.gmra.mxu1 %vm251_vm1, %v476_v17  ;;  %1136 = vmatpush3.msra.mxu0 %v1254_v4 }
  0x1b   : >> { %1141 = vmatpush3.msra.mxu1 %v1259_v5  ;;  %1137 = vmatprep.mubr.msk.f32.mxu0 %vm1197_vm0, %v1196_v10 }
  0x1c   : >> { %1142 = vmatprep.mubr.msk.f32.mxu1 %vm1197_vm0, %v1196_v10  ;;  %1145 = vmatprep.subr.mxu0 %v1196_v10 }
  0x1d   : >> { %1138 = vmatmul.mubr.msk.f32.vlgmr.msra.gmra.mxu0 %vm251_vm1, %v480_v19  ;;  %1150 = vmatprep.subr.mxu1 %v1196_v10 }
  0x1e   : >> { %1143 = vmatmul.mubr.msk.f32.vlgmr.msra.gmra.mxu1 %vm251_vm1, %v629_v20  ;;  %1146 = vmatpush3.msra.mxu0 %v1264_v6 }
  0x1f   : >> { %1151 = vmatpush3.msra.mxu1 %v1269_v7  ;;  %1147 = vmatprep.mubr.msk.f32.mxu0 %vm1197_vm0, %v1196_v10 }
  0x20   : >> { %1152 = vmatprep.mubr.msk.f32.mxu1 %vm1197_vm0, %v1196_v10  ;;  %1155 = vmatprep.subr.mxu0 %v1196_v10 }
  0x21   : >> { %1148 = vmatmul.mubr.msk.f32.vlgmr.msra.gmra.mxu0 %vm251_vm1, %v707_v23 }
  0x22   : >> { %1153 = vmatmul.mubr.msk.f32.vlgmr.msra.gmra.mxu1 %vm251_vm1, %v711_v24  ;;  %1156 = vmatpush3.msra.mxu0 %v1274_v8 }
  0x23   : >> { %1157 = vmatprep.mubr.msk.f32.mxu0 %vm1197_vm0, %v1196_v10 }
  0x25   : >> { %1158 = vmatmul.mubr.msk.f32.vlgmr.msra.gmra.mxu0 %vm251_vm1, %v860_v25 }
  0xd5   : >> { %v321_v26 = vpop.f32.mrf.mxu0 }
  0xd6   : >> { %v394_v27 = vpop.f32.mrf.mxu1 }
  0xd7   : >> { %v1119_v28 = vpop.f32.mrf.mxu0  ;;  %v395_v29 = vadd.f32 %v394_v27, %v321_v26 }
  0xd8   : >> { %v1124_v30 = vpop.f32.mrf.mxu1 }
  0xd9   : >> { %v467_v31 = vpop.f32.mrf.mxu0 }
  0xda   : >> { %v471_v32 = vadd.f32 %v467_v31, %v395_v29  ;;  %v550_v33 = vpop.f32.mrf.mxu1 }
  0xdb   : >> { %v1129_v34 = vpop.f32.mrf.mxu0 }
  0xdc   : >> { %v554_v35 = vadd.f32 %v550_v33, %v471_v32  ;;  %v1134_v36 = vpop.f32.mrf.mxu1 }
  0xdd   : >> { %v624_v37 = vpop.f32.mrf.mxu0 }
  0xde   : >> { %v628_v38 = vadd.f32 %v624_v37, %v554_v35  ;;  %v698_v39 = vpop.f32.mrf.mxu1 }
  0xdf   : >> { %v1139_v40 = vpop.f32.mrf.mxu0 }
  0xe0   : >> { %v702_v41 = vadd.f32 %v698_v39, %v628_v38  ;;  %v1144_v42 = vpop.f32.mrf.mxu1 }
  0xe1   : >> { %v781_v43 = vpop.f32.mrf.mxu0 }
  0xe2   : >> { %v785_v44 = vadd.f32 %v781_v43, %v702_v41  ;;  %v855_v45 = vpop.f32.mrf.mxu1 }
  0xe3   : >> { %v1149_v46 = vpop.f32.mrf.mxu0 }
  0xe4   : >> { %v859_v47 = vadd.f32 %v855_v45, %v785_v44  ;;  %v1154_v48 = vpop.f32.mrf.mxu1 }
  0xe5   : >> { %v929_v49 = vpop.f32.mrf.mxu0 }
  0xe6   : >> { %v933_v50 = vadd.f32 %v929_v49, %v859_v47 }
  0xe7   : >> { %v1159_v51 = vpop.f32.mrf.mxu0 }
  0xe8   : >> { %v940_v52 = vadd.f32 %v1279_v9, %v933_v50 }
  0xea   : >> { %vm941_vm4 = vcmp.gt.f32.partialorder %v940_v52, 0.0  ;;  %v942_v53 = vmul.f32 0.3, %v940_v52 }
  0xec   : >> { %v943_v54 = vsel %vm941_vm4, %v940_v52, %v942_v53  ;;  %240 = sbr.rel (!%p238_p4) target bundleno = 16 (0x10), region = 91 }
  0xed   : >> { %v944_v56 = vpack.c.bf16 %v943_v54, %v943_v54 }
  0xef   : >> { %v951_v57 = vsel %vm949_vm5, %v944_v56, %v950_v55 }
  0xf0   : >> { %952 = vst [vmem:[%s946_s28] sm:$0x7] %v951_v57 }
  0xf1 PF: > { %s14_s15 = sadd.s32 1, %s1190_s15  }
  0xf2   : > { %p11_p5 = scmp.ge.s32.totalorder %s14_s15, 4  }
  0xf4   :  { %13 = sbr.rel (!%p11_p5) target bundleno = 1 (0x1), region = 102 }

// kernel: self_attn_conv.13
= control target key start
LH: loop header
LB: loop body
LE: loop exit
PB: predicated region body
PF: predicated region fallthrough
CT: control target
= control target key end

     0   :  { %s1223_s15 = smov 0   ;;  %s1340_s0 = inlined_call_operand.vmem [shape: bf16[2,11,6,8], index: 0, kind: input, shape index: {}]   ;;  %s1341_s1 = inlined_call_operand.vmem [shape: bf16[2,11,5,8], index: 1, kind: input, shape index: {}]   ;;  %s1342_s2 = inlined_call_operand.vmem [shape: f32[3,3,8,2], index: 2, kind: input, shape index: {}]   ;;  %s1343_s3 = inlined_call_operand.vmem [shape: f32[1,2], index: 3, kind: input, shape index: {}]   ;;  %s1344_s4 = inlined_call_operand.vmem [shape: bf16[2,5,5,2], index: 4, kind: output, shape index: {}]  }
   0x1 LB: > { %s1047_s16 = sadd.s32 4294967295, %s1190_s15   ;;  %p1051_p0 = scmp.ge.s32.totalorder %s1190_s15, 1  ;;  %s1190_s15 = sphi %s1223_s15, %s14_s15  }
   0x2   : > { %p172_p1 = scmp.lt.s32.totalorder %s1190_s15, 3 }
   0x4   : > { %p173_p2 = pnand %p1051_p0, %p172_p1 }
   0x5   : > { %p203_p3 = scmp.lt.s32.totalorder (!%p173_p2), %s1047_s16, 1  ;;  %s1296_s24 = smov (!%p173_p2), 0  }
   0x6   : > { %176 = sbr.rel (%p173_p2) target bundleno = 241 (0xf1), region = 36 }
   0xb   : > { %v1234_v0 = vld [vmem:[%s1342_s2] sm:$0xff]  ;;  %v1239_v1 = vld [vmem:[%s1342_s2 + $0x8] sm:$0xff]  ;;  %v1244_v2 = vld [vmem:[%s1342_s2 + $0x10] sm:$0xff]  ;;  %s1346_s16 = smov (!%p203_p3, %s1047_s16), 1 }
   0xc   : > { %v1249_v3 = vld [vmem:[%s1342_s2 + $0x18] sm:$0xff]  ;;  %v1254_v4 = vld [vmem:[%s1342_s2 + $0x20] sm:$0xff]  ;;  %v1259_v5 = vld [vmem:[%s1342_s2 + $0x28] sm:$0xff]  ;;  %s1160_s11 = smul.u32 44, %s1346_s16 }
   0xd   : > { %v1264_v6 = vld [vmem:[%s1342_s2 + $0x30] sm:$0xff]  ;;  %v1269_v7 = vld [vmem:[%s1342_s2 + $0x38] sm:$0xff]  ;;  %v1274_v8 = vld [vmem:[%s1342_s2 + $0x40] sm:$0xff]  ;;  %s1161_s12 = smul.u32 20, %s1346_s16 }
   0xe   : > { %v1279_v9 = vld [vmem:[%s1343_s3] ss:$0 sm:$0xff]  ;;  %s1284_s17 = scalar_lea.vmem %s1340_s0, %s1160_s11  ;;  %s1289_s20 = scalar_lea.vmem %s1341_s1, %s1160_s11 }
   0xf   : > { %s1294_s23 = scalar_lea.vmem %s1344_s4, %s1161_s12 }
  0x10 LB: >> { %v1196_v10 = vmov 0.0   ;;  %vm1197_vm0 = vmmov 0   ;;  %s1091_s16 = sshll.u32 %s1194_s24, 3  ;;  %vm251_vm1 = vcmask 64512   ;;  %s1088_s27 = sshll.u32 %s1194_s24, 2  ;;  %vm947_vm2 = vcmask 10240   ;;  %s1194_s24 = sphi %s1296_s24, %s241_s24  }
  0x11   : >> { %1115 = vmatprep.subr.mxu0 %v1196_v10  ;;  %1120 = vmatprep.subr.mxu1 %v1196_v10  ;;  %s248_s25 = scalar_lea.vmem %s1289_s20, %s1091_s16  ;;  %s244_s26 = scalar_lea.vmem %s1284_s17, %s1091_s16  ;;  %vm948_vm3 = vsmask.f32 2304 }
  0x12   : >> { %1116 = vmatpush3.msra.mxu0 %v1239_v1  ;;  %1117 = vmatprep.mubr.msk.f32.mxu0 %vm1197_vm0, %v1196_v10  ;;  %v249_v11 = vld [vmem:[%s248_s25] sm:$0x7]  ;;  %v1071_v14 = vld [vmem:[%s244_s26 + $0x4] sm:$0x7]  ;;  %v1080_v21 = vld [vmem:[%s244_s26 + $0x8] sm:$0x7]  ;;  %s946_s28 = scalar_lea.vmem %s1294_s23, %s1088_s27 }
  0x13   : >> { %1121 = vmatpush3.msra.mxu1 %v1234_v0  ;;  %1122 = vmatprep.mubr.msk.f32.mxu1 %vm1197_vm0, %v1196_v10  ;;  %v250_v12 = vunpack.c.l.bf16 %v249_v11  ;;  %v245_v13 = vld [vmem:[%s244_s26] sm:$0x7]  ;;  %v476_v17 = vunpack.c.l.bf16 %v1071_v14  ;;  %v1074_v18 = vld [vmem:[%s248_s25 + $0x4] sm:$0x7]  ;;  %v1083_v22 = vld [vmem:[%s248_s25 + $0x8] sm:$0x7]  ;;  %v707_v23 = vunpack.c.l.bf16 %v1080_v21 }
  0x14   : >> { %1125 = vmatprep.subr.mxu0 %v1196_v10  ;;  %1130 = vmatprep.subr.mxu1 %v1196_v10  ;;  %v246_v15 = vunpack.c.l.bf16 %v245_v13  ;;  %v480_v19 = vunpack.c.l.bf16 %v1074_v18  ;;  %v711_v24 = vunpack.c.l.bf16 %v1083_v22  ;;  %vm949_vm5 = vmand %vm947_vm2, %vm948_vm3  ;;  %v950_v55 = vld [vmem:[%s946_s28] sm:$0x7]  ;;  %s241_s24 = sadd.s32 1, %s1194_s24  }
  0x15   : >> { %1118 = vmatmul.mubr.msk.f32.vlgmr.msra.gmra.mxu0 %vm251_vm1, %v250_v12  ;;  %v629_v20 = vrot.slane %v476_v17, 1  ;;  %v860_v25 = vrot.slane %v707_v23, 1  ;;  %p238_p4 = scmp.ge.s32.totalorder %s241_s24, 5  }
  0x16   : >> { %1123 = vmatmul.mubr.msk.f32.vlgmr.msra.gmra.mxu1 %vm251_vm1, %v246_v15  ;;  %v398_v16 = vrot.slane %v246_v15, 1  ;;  %1126 = vmatpush3.msra.mxu0 %v1244_v2 }
  0x17   : >> { %1131 = vmatpush3.msra.mxu1 %v1249_v3  ;;  %1127 = vmatprep.mubr.msk.f32.mxu0 %vm1197_vm0, %v1196_v10 }
  0x18   : >> { %1132 = vmatprep.mubr.msk.f32.mxu1 %vm1197_vm0, %v1196_v10  ;;  %1135 = vmatprep.subr.mxu0 %v1196_v10 }
  0x19   : >> { %1128 = vmatmul.mubr.msk.f32.vlgmr.msra.gmra.mxu0 %vm251_vm1, %v398_v16  ;;  %1140 = vmatprep.subr.mxu1 %v1196_v10 }
  0x1a   : >> { %1133 = vmatmul.mubr.msk.f32.vlgmr.msra.gmra.mxu1 %vm251_vm1, %v476_v17  ;;  %1136 = vmatpush3.msra.mxu0 %v1254_v4 }
  0x1b   : >> { %1141 = vmatpush3.msra.mxu1 %v1259_v5  ;;  %1137 = vmatprep.mubr.msk.f32.mxu0 %vm1197_vm0, %v1196_v10 }
  0x1c   : >> { %1142 = vmatprep.mubr.msk.f32.mxu1 %vm1197_vm0, %v1196_v10  ;;  %1145 = vmatprep.subr.mxu0 %v1196_v10 }
  0x1d   : >> { %1138 = vmatmul.mubr.msk.f32.vlgmr.msra.gmra.mxu0 %vm251_vm1, %v480_v19  ;;  %1150 = vmatprep.subr.mxu1 %v1196_v10 }
  0x1e   : >> { %1143 = vmatmul.mubr.msk.f32.vlgmr.msra.gmra.mxu1 %vm251_vm1, %v629_v20  ;;  %1146 = vmatpush3.msra.mxu0 %v1264_v6 }
  0x1f   : >> { %1151 = vmatpush3.msra.mxu1 %v1269_v7  ;;  %1147 = vmatprep.mubr.msk.f32.mxu0 %vm1197_vm0, %v1196_v10 }
  0x20   : >> { %1152 = vmatprep.mubr.msk.f32.mxu1 %vm1197_vm0, %v1196_v10  ;;  %1155 = vmatprep.subr.mxu0 %v1196_v10 }
  0x21   : >> { %1148 = vmatmul.mubr.msk.f32.vlgmr.msra.gmra.mxu0 %vm251_vm1, %v707_v23 }
  0x22   : >> { %1153 = vmatmul.mubr.msk.f32.vlgmr.msra.gmra.mxu1 %vm251_vm1, %v711_v24  ;;  %1156 = vmatpush3.msra.mxu0 %v1274_v8 }
  0x23   : >> { %1157 = vmatprep.mubr.msk.f32.mxu0 %vm1197_vm0, %v1196_v10 }
  0x25   : >> { %1158 = vmatmul.mubr.msk.f32.vlgmr.msra.gmra.mxu0 %vm251_vm1, %v860_v25 }
  0xd5   : >> { %v321_v26 = vpop.f32.mrf.mxu0 }
  0xd6   : >> { %v394_v27 = vpop.f32.mrf.mxu1 }
  0xd7   : >> { %v1119_v28 = vpop.f32.mrf.mxu0  ;;  %v395_v29 = vadd.f32 %v394_v27, %v321_v26 }
  0xd8   : >> { %v1124_v30 = vpop.f32.mrf.mxu1 }
  0xd9   : >> { %v467_v31 = vpop.f32.mrf.mxu0 }
  0xda   : >> { %v471_v32 = vadd.f32 %v467_v31, %v395_v29  ;;  %v550_v33 = vpop.f32.mrf.mxu1 }
  0xdb   : >> { %v1129_v34 = vpop.f32.mrf.mxu0 }
  0xdc   : >> { %v554_v35 = vadd.f32 %v550_v33, %v471_v32  ;;  %v1134_v36 = vpop.f32.mrf.mxu1 }
  0xdd   : >> { %v624_v37 = vpop.f32.mrf.mxu0 }
  0xde   : >> { %v628_v38 = vadd.f32 %v624_v37, %v554_v35  ;;  %v698_v39 = vpop.f32.mrf.mxu1 }
  0xdf   : >> { %v1139_v40 = vpop.f32.mrf.mxu0 }
  0xe0   : >> { %v702_v41 = vadd.f32 %v698_v39, %v628_v38  ;;  %v1144_v42 = vpop.f32.mrf.mxu1 }
  0xe1   : >> { %v781_v43 = vpop.f32.mrf.mxu0 }
  0xe2   : >> { %v785_v44 = vadd.f32 %v781_v43, %v702_v41  ;;  %v855_v45 = vpop.f32.mrf.mxu1 }
  0xe3   : >> { %v1149_v46 = vpop.f32.mrf.mxu0 }
  0xe4   : >> { %v859_v47 = vadd.f32 %v855_v45, %v785_v44  ;;  %v1154_v48 = vpop.f32.mrf.mxu1 }
  0xe5   : >> { %v929_v49 = vpop.f32.mrf.mxu0 }
  0xe6   : >> { %v933_v50 = vadd.f32 %v929_v49, %v859_v47 }
  0xe7   : >> { %v1159_v51 = vpop.f32.mrf.mxu0 }
  0xe8   : >> { %v940_v52 = vadd.f32 %v1279_v9, %v933_v50 }
  0xea   : >> { %vm941_vm4 = vcmp.gt.f32.partialorder %v940_v52, 0.0  ;;  %v942_v53 = vmul.f32 0.3, %v940_v52 }
  0xec   : >> { %v943_v54 = vsel %vm941_vm4, %v940_v52, %v942_v53  ;;  %240 = sbr.rel (!%p238_p4) target bundleno = 16 (0x10), region = 91 }
  0xed   : >> { %v944_v56 = vpack.c.bf16 %v943_v54, %v943_v54 }
  0xef   : >> { %v951_v57 = vsel %vm949_vm5, %v944_v56, %v950_v55 }
  0xf0   : >> { %952 = vst [vmem:[%s946_s28] sm:$0x7] %v951_v57 }
  0xf1 PF: > { %s14_s15 = sadd.s32 1, %s1190_s15  }
  0xf2   : > { %p11_p5 = scmp.ge.s32.totalorder %s14_s15, 4  }
  0xf4   :  { %13 = sbr.rel (!%p11_p5) target bundleno = 1 (0x1), region = 102 }

// kernel: self_attn_conv.14
= control target key start
LH: loop header
LB: loop body
LE: loop exit
PB: predicated region body
PF: predicated region fallthrough
CT: control target
= control target key end

     0   :  { %s1151_s12 = smov 0   ;;  %s1271_s0 = inlined_call_operand.vmem [shape: bf16[2,5,5,2], index: 0, kind: input, shape index: {}]   ;;  %s1272_s1 = inlined_call_operand.vmem [shape: f32[3,3,2,2], index: 1, kind: input, shape index: {}]   ;;  %s1273_s2 = inlined_call_operand.vmem [shape: f32[1,2], index: 2, kind: input, shape index: {}]   ;;  %s1274_s3 = inlined_call_operand.vmem [shape: bf16[2,3,3,2], index: 3, kind: output, shape index: {}]  }
   0x1 LB: > { %s988_s13 = sadd.s32 4294967295, %s1123_s12   ;;  %p992_p0 = scmp.ge.s32.totalorder %s1123_s12, 1  ;;  %s1123_s12 = sphi %s1151_s12, %s13_s12  }
   0x2   : > { %p137_p1 = scmp.lt.s32.totalorder %s1123_s12, 3 }
   0x4   : > { %p138_p2 = pnand %p992_p0, %p137_p1 }
   0x5   : > { %p161_p3 = scmp.lt.s32.totalorder (!%p138_p2), %s988_s13, 1  ;;  %s1219_s17 = smov (!%p138_p2), 0  }
   0x6   : > { %141 = sbr.rel (%p138_p2) target bundleno = 242 (0xf2), region = 32 }
   0xb   : > { %v1162_v0 = vld [vmem:[%s1272_s1] sm:$0x3]  ;;  %v1167_v1 = vld [vmem:[%s1272_s1 + $0x2] sm:$0x3]  ;;  %v1172_v2 = vld [vmem:[%s1272_s1 + $0x4] sm:$0x3] }
   0xc   : > { %v1177_v3 = vld [vmem:[%s1272_s1 + $0x6] sm:$0x3]  ;;  %v1182_v4 = vld [vmem:[%s1272_s1 + $0x8] sm:$0x3]  ;;  %s1276_s13 = smov (!%p161_p3, %s988_s13), 1 }
   0xd   : > { %v1187_v5 = vld [vmem:[%s1272_s1 + $0xa] sm:$0x3]  ;;  %v1192_v6 = vld [vmem:[%s1272_s1 + $0xc] sm:$0x3]  ;;  %v1197_v7 = vld [vmem:[%s1272_s1 + $0xe] sm:$0x3] }
   0xe   : > { %v1202_v8 = vld [vmem:[%s1272_s1 + $0x10] sm:$0x3]  ;;  %v1207_v9 = vld [vmem:[%s1273_s2] ss:$0 sm:$0xff]  ;;  %s1093_s7 = smul.u32 20, %s1276_s13 }
   0xf   : > { %s1094_s8 = smul.u32 6, %s1276_s13 }
  0x10   : > { %s1212_s11 = scalar_lea.vmem %s1271_s0, %s1093_s7 }
  0x11   : > { %s1217_s16 = scalar_lea.vmem %s1274_s3, %s1094_s8 }
  0x12 LB: >> { %vm204_vm0 = vcmask 1041408   ;;  %v1129_v10 = vmov 0.0   ;;  %vm1130_vm1 = vmmov 0   ;;  %s1003_s13 = sshll.u32 %s1127_s17, 2  ;;  %vm201_vm2 = vcmask 15360   ;;  %s1027_s19 = sshll.u32 %s1127_s17, 1  ;;  %s1127_s17 = sphi %s1219_s17, %s194_s17  }
  0x13   : >> { %1048 = vmatprep.subr.mxu0 %v1129_v10  ;;  %1053 = vmatprep.subr.mxu1 %v1129_v10  ;;  %s196_s18 = scalar_lea.vmem %s1212_s11, %s1003_s13  ;;  %s911_s20 = scalar_lea.vmem %s1217_s16, %s1027_s19  ;;  %vm912_vm3 = vcmask 9216   ;;  %vm913_vm4 = vsmask.f32 1280 }
  0x14   : >> { %1049 = vmatpush3.msk.msra.mxu0 %vm204_vm0, %v1167_v1  ;;  %1050 = vmatprep.mubr.msk.f32.mxu0 %vm1130_vm1, %v1129_v10  ;;  %v197_v11 = vld [vmem:[%s196_s18] sm:$0x7]  ;;  %v1011_v12 = vld [vmem:[%s196_s18 + $0x4] sm:$0x7]  ;;  %v1019_v16 = vld [vmem:[%s196_s18 + $0x8] sm:$0x7] }
  0x15   : >> { %1054 = vmatpush3.msk.msra.mxu1 %vm204_vm0, %v1162_v0  ;;  %1055 = vmatprep.mubr.msk.f32.mxu1 %vm1130_vm1, %v1129_v10  ;;  %v198_v13 = vunpack.c.l.bf16 %v197_v11  ;;  %v434_v15 = vunpack.c.l.bf16 %v1011_v12  ;;  %v670_v19 = vunpack.c.l.bf16 %v1019_v16  ;;  %vm914_vm5 = vmand %vm912_vm3, %vm913_vm4  ;;  %v915_v50 = vld [vmem:[%s911_s20] sm:$0x3]  ;;  %s194_s17 = sadd.s32 1, %s1127_s17  }
  0x16   : >> { %1058 = vmatprep.subr.mxu0 %v1129_v10  ;;  %1063 = vmatprep.subr.mxu1 %v1129_v10  ;;  %p191_p4 = scmp.ge.s32.totalorder %s194_s17, 3  }
  0x17   : >> { %v200_v14 = vrot.slane %v198_v13, 1  ;;  %1056 = vmatmul.mubr.msk.f32.vlgmr.msra.gmra.mxu1 %vm201_vm2, %v198_v13  ;;  %v353_v17 = vrot.slane %v198_v13, 2  ;;  %v589_v18 = vrot.slane %v434_v15, 2  ;;  %v512_v20 = vrot.slane %v434_v15, 1 }
  0x18   : >> { %1064 = vmatpush3.msk.msra.mxu1 %vm204_vm0, %v1177_v3  ;;  %1065 = vmatprep.mubr.msk.f32.mxu1 %vm1130_vm1, %v1129_v10  ;;  %v748_v21 = vrot.slane %v670_v19, 1  ;;  %v825_v22 = vrot.slane %v670_v19, 2 }
  0x19   : >> { %1051 = vmatmul.mubr.msk.f32.vlgmr.msra.gmra.mxu0 %vm201_vm2, %v200_v14  ;;  %1073 = vmatprep.subr.mxu1 %v1129_v10 }
  0x1a   : >> { %1059 = vmatpush3.msk.msra.mxu0 %vm204_vm0, %v1172_v2  ;;  %1060 = vmatprep.mubr.msk.f32.mxu0 %vm1130_vm1, %v1129_v10 }
  0x1b   : >> { %1068 = vmatprep.subr.mxu0 %v1129_v10  ;;  %1066 = vmatmul.mubr.msk.f32.vlgmr.msra.gmra.mxu1 %vm201_vm2, %v434_v15 }
  0x1c   : >> { %1074 = vmatpush3.msk.msra.mxu1 %vm204_vm0, %v1187_v5  ;;  %1075 = vmatprep.mubr.msk.f32.mxu1 %vm1130_vm1, %v1129_v10 }
  0x1d   : >> { %1061 = vmatmul.mubr.msk.f32.vlgmr.msra.gmra.mxu0 %vm201_vm2, %v353_v17  ;;  %1083 = vmatprep.subr.mxu1 %v1129_v10 }
  0x1e   : >> { %1069 = vmatpush3.msk.msra.mxu0 %vm204_vm0, %v1182_v4  ;;  %1070 = vmatprep.mubr.msk.f32.mxu0 %vm1130_vm1, %v1129_v10 }
  0x1f   : >> { %1078 = vmatprep.subr.mxu0 %v1129_v10  ;;  %1076 = vmatmul.mubr.msk.f32.vlgmr.msra.gmra.mxu1 %vm201_vm2, %v589_v18 }
  0x20   : >> { %1084 = vmatpush3.msk.msra.mxu1 %vm204_vm0, %v1197_v7  ;;  %1085 = vmatprep.mubr.msk.f32.mxu1 %vm1130_vm1, %v1129_v10 }
  0x21   : >> { %1071 = vmatmul.mubr.msk.f32.vlgmr.msra.gmra.mxu0 %vm201_vm2, %v512_v20 }
  0x22   : >> { %1079 = vmatpush3.msk.msra.mxu0 %vm204_vm0, %v1192_v6  ;;  %1080 = vmatprep.mubr.msk.f32.mxu0 %vm1130_vm1, %v1129_v10 }
  0x23   : >> { %1088 = vmatprep.subr.mxu0 %v1129_v10  ;;  %1086 = vmatmul.mubr.msk.f32.vlgmr.msra.gmra.mxu1 %vm201_vm2, %v748_v21 }
  0x25   : >> { %1081 = vmatmul.mubr.msk.f32.vlgmr.msra.gmra.mxu0 %vm201_vm2, %v670_v19 }
  0x26   : >> { %1089 = vmatpush3.msk.msra.mxu0 %vm204_vm0, %v1202_v8  ;;  %1090 = vmatprep.mubr.msk.f32.mxu0 %vm1130_vm1, %v1129_v10 }
  0x29   : >> { %1091 = vmatmul.mubr.msk.f32.vlgmr.msra.gmra.mxu0 %vm201_vm2, %v825_v22 }
  0xd7   : >> { %v349_v23 = vpop.f32.mrf.mxu1 }
  0xd9   : >> { %v274_v24 = vpop.f32.mrf.mxu0  ;;  %v1057_v25 = vpop.f32.mrf.mxu1 }
  0xda   : >> { %v350_v28 = vadd.f32 %v349_v23, %v274_v24 }
  0xdb   : >> { %v1052_v26 = vpop.f32.mrf.mxu0  ;;  %v507_v27 = vpop.f32.mrf.mxu1 }
  0xdd   : >> { %v425_v29 = vpop.f32.mrf.mxu0  ;;  %v1067_v30 = vpop.f32.mrf.mxu1 }
  0xde   : >> { %v429_v31 = vadd.f32 %v425_v29, %v350_v28 }
  0xdf   : >> { %v1062_v32 = vpop.f32.mrf.mxu0  ;;  %v661_v33 = vpop.f32.mrf.mxu1 }
  0xe0   : >> { %v511_v34 = vadd.f32 %v507_v27, %v429_v31 }
  0xe1   : >> { %v584_v35 = vpop.f32.mrf.mxu0  ;;  %v1077_v36 = vpop.f32.mrf.mxu1 }
  0xe2   : >> { %v588_v37 = vadd.f32 %v584_v35, %v511_v34 }
  0xe3   : >> { %v1072_v38 = vpop.f32.mrf.mxu0  ;;  %v820_v39 = vpop.f32.mrf.mxu1 }
  0xe4   : >> { %v665_v40 = vadd.f32 %v661_v33, %v588_v37 }
  0xe5   : >> { %v743_v41 = vpop.f32.mrf.mxu0  ;;  %v1087_v42 = vpop.f32.mrf.mxu1 }
  0xe6   : >> { %v747_v43 = vadd.f32 %v743_v41, %v665_v40 }
  0xe7   : >> { %v1082_v44 = vpop.f32.mrf.mxu0 }
  0xe8   : >> { %v824_v45 = vadd.f32 %v820_v39, %v747_v43 }
  0xe9   : >> { %v897_v46 = vpop.f32.mrf.mxu0 }
  0xea   : >> { %v901_v47 = vadd.f32 %v897_v46, %v824_v45 }
  0xeb   : >> { %v1092_v48 = vpop.f32.mrf.mxu0 }
  0xec   : >> { %v908_v49 = vadd.f32 %v1207_v9, %v901_v47 }
  0xed   : > { %193 = sbr.rel (!%p191_p4) target bundleno = 18 (0x12), region = 81 }
  0xee   : >> { %v909_v51 = vpack.c.bf16 %v908_v49, %v908_v49 }
  0xf0   : >> { %v916_v52 = vsel %vm914_vm5, %v909_v51, %v915_v50 }
  0xf1   : >> { %917 = vst [vmem:[%s911_s20] sm:$0x3] %v916_v52 }
  0xf2 PF: > { %s13_s12 = sadd.s32 1, %s1123_s12  }
  0xf3   : > { %p10_p5 = scmp.ge.s32.totalorder %s13_s12, 4  }
  0xf5   :  { %12 = sbr.rel (!%p10_p5) target bundleno = 1 (0x1), region = 92 }

// kernel: self_attn_conv.9
= control target key start
LH: loop header
LB: loop body
LE: loop exit
PB: predicated region body
PF: predicated region fallthrough
CT: control target
= control target key end

     0   :  { %s1511_s12 = smov 0   ;;  %s1809_s0 = inlined_call_operand.vmem [shape: bf16[2,26,26,16], index: 0, kind: input, shape index: {}]   ;;  %s1810_s1 = inlined_call_operand.vmem [shape: f32[3,3,16,8], index: 1, kind: input, shape index: {}]   ;;  %s1811_s2 = inlined_call_operand.vmem [shape: f32[1,8], index: 2, kind: input, shape index: {}]   ;;  %s1812_s3 = inlined_call_operand.vmem [shape: bf16[2,24,24,8], index: 3, kind: output, shape index: {}]  }
   0x1 LB: > { %s1199_s13 = sadd.s32 4294967295, %s1483_s12   ;;  %p1203_p0 = scmp.ge.s32.totalorder %s1483_s12, 1  ;;  %s1483_s12 = sphi %s1511_s12, %s13_s12  }
   0x2   : > { %p137_p1 = scmp.lt.s32.totalorder %s1483_s12, 3 }
   0x4   : > { %p138_p2 = pnand %p1203_p0, %p137_p1 }
   0x5   : > { %p161_p3 = scmp.lt.s32.totalorder (!%p138_p2), %s1199_s13, 1  ;;  %s1624_s7 = smov (!%p138_p2), 0  }
   0x6   : > { %141 = sbr.rel (%p138_p2) target bundleno = 283 (0x11b), region = 32 }
   0xb   : > { %v1522_v0 = vld [vmem:[%s1810_s1] sm:$0xff]  ;;  %v1527_v1 = vld [vmem:[%s1810_s1 + $0x8] sm:$0xff]  ;;  %v1532_v2 = vld [vmem:[%s1810_s1 + $0x10] sm:$0xff]  ;;  %s1814_s13 = smov (!%p161_p3, %s1199_s13), 1 }
   0xc   : > { %v1537_v3 = vld [vmem:[%s1810_s1 + $0x18] sm:$0xff]  ;;  %v1542_v4 = vld [vmem:[%s1810_s1 + $0x20] sm:$0xff]  ;;  %v1547_v5 = vld [vmem:[%s1810_s1 + $0x28] sm:$0xff]  ;;  %s1453_s11 = smul.u32 416, %s1814_s13 }
   0xd   : > { %v1552_v6 = vld [vmem:[%s1810_s1 + $0x30] sm:$0xff]  ;;  %v1557_v7 = vld [vmem:[%s1810_s1 + $0x38] sm:$0xff]  ;;  %v1562_v8 = vld [vmem:[%s1810_s1 + $0x40] sm:$0xff]  ;;  %s1454_s20 = smul.u32 288, %s1814_s13 }
   0xe   : > { %v1567_v9 = vld [vmem:[%s1810_s1 + $0x48] sm:$0xff]  ;;  %v1572_v10 = vld [vmem:[%s1810_s1 + $0x50] sm:$0xff]  ;;  %v1577_v11 = vld [vmem:[%s1810_s1 + $0x58] sm:$0xff]  ;;  %s1612_s29 = scalar_lea.vmem %s1809_s0, %s1453_s11 }
   0xf   : > { %v1582_v12 = vld [vmem:[%s1810_s1 + $0x60] sm:$0xff]  ;;  %v1587_v13 = vld [vmem:[%s1810_s1 + $0x68] sm:$0xff]  ;;  %v1592_v14 = vld [vmem:[%s1810_s1 + $0x70] sm:$0xff]  ;;  %s1622_s6 = scalar_lea.vmem %s1812_s3, %s1454_s20 }
  0x10   : > { %v1597_v15 = vld [vmem:[%s1810_s1 + $0x78] sm:$0xff]  ;;  %v1602_v16 = vld [vmem:[%s1810_s1 + $0x80] sm:$0xff]  ;;  %v1607_v17 = vld [vmem:[%s1810_s1 + $0x88] sm:$0xff] }
  0x11   : > { %v1617_v18 = vld [vmem:[%s1811_s2] ss:$0 sm:$0xff] }
  0x12 LB: >> { %v1489_v19 = vmov 0.0   ;;  %vm1490_vm0 = vmmov 0   ;;  %s1268_s8 = sshll.u32 %s1487_s7, 4  ;;  %vm219_vm1 = vcmask 1046528   ;;  %vm227_vm2 = vcmask 130048   ;;  %s1272_s10 = smul.u32 12, %s1487_s7  ;;  %s1487_s7 = sphi %s1624_s7, %s203_s7  }
  0x13   : >> { %1449 = vmatprep.subr.mxu1 %v1489_v19  ;;  %1339 = vmatprep.mubr.msk.f32.mxu1 %vm1490_vm0, %v1489_v19  ;;  %s1637_s9 = scalar_lea.vmem %s1612_s29, %s1268_s8  ;;  %vm400_vm3 = vcmask 1045504   ;;  %vm1125_vm5 = vcmask 60416   ;;  %s203_s7 = sadd.s32 1, %s1487_s7  }
  0x14   : >> { %1451 = vmatpush3.msra.mxu1 %v1537_v3  ;;  %1332 = vmatprep.subr.mxu0 %v1489_v19  ;;  %v1274_v20 = vld [vmem:[%s1637_s9] sm:$0xff]   ;;  %v209_v21 = vld [vmem:[%s1637_s9 + $0x8] ss:$16 sps:$4 sm:$0xff]   ;;  %v210_v22 = vld [vmem:[%s1637_s9 + $0xc] sm:$0x1]  ;;  %s1124_s11 = scalar_lea.vmem %s1622_s6, %s1272_s10  ;;  %p200_p4 = scmp.ge.s32.totalorder %s203_s7, 24  }
  0x15   : >> { %1450 = vmatprep.subr.mxu1 %v1489_v19  ;;  %1333 = vmatpush3.msra.mxu0 %v1537_v3  ;;  %v1276_v23 = vunpack.c.h.bf16 %v1274_v20  ;;  %v1646_v24 = vunpack.c.l.bf16 %v209_v21  ;;  %v1275_v25 = vunpack.c.l.bf16 %v1274_v20  ;;  %v214_v26 = vunpack.c.l.bf16 %v210_v22  ;;  %v1285_v38 = vld [vmem:[%s1637_s9 + $0x10] sm:$0xff]   ;;  %v1237_v47 = vld [vmem:[%s1637_s9 + $0x1c] sm:$0x1]  ;;  %v1286_v54 = vld [vmem:[%s1637_s9 + $0x20] sm:$0xff]  }
  0x16   : >> { %1452 = vmatpush3.msra.mxu1 %v1532_v2  ;;  %1334 = vmatprep.subr.mxu0 %v1489_v19  ;;  %v1279_v41 = vunpack.c.l.bf16 %v1285_v38  ;;  %v1680_v42 = vunpack.c.h.bf16 %v1285_v38  ;;  %v1694_v46 = vunpack.c.h.bf16 %v209_v21  ;;  %v508_v50 = vunpack.c.l.bf16 %v1237_v47  ;;  %v1250_v61 = vld [vmem:[%s1637_s9 + $0x28] sm:$0xf] }
  0x17   : >> { %1345 = vmatprep.subr.mxu1 %v1489_v19  ;;  %1335 = vmatpush3.msra.mxu0 %v1532_v2  ;;  %v221_v27 = vrot.slane %v1276_v23, 1  ;;  %v223_v28 = vrot.slane %v1646_v24, 1  ;;  %v220_v29 = vrot.slane %v1275_v25, 1  ;;  %v225_v30 = vrot.slane %v214_v26, 1 }
  0x18   : >> { %1336 = vmatprep.mubr.msk.f32.mxu0 %vm1490_vm0, %v1489_v19  ;;  %1358 = vmatprep.subr.mxu0 %v1489_v19  ;;  %v401_v33 = vrot.slane %v1275_v25, 2  ;;  %v402_v34 = vrot.slane %v1276_v23, 2  ;;  %v404_v37 = vrot.slane %v1646_v24, 2  ;;  %v406_v40 = vrot.slane %v214_v26, 2 }
  0x19   : >> { %v224_v31 = vsel %vm219_vm1, %v221_v27, %v223_v28  ;;  %v222_v32 = vsel %vm219_vm1, %v220_v29, %v221_v27  ;;  %v226_v35 = vsel %vm219_vm1, %v223_v28, %v225_v30  ;;  %v602_v44 = vrot.slane %v1279_v41, 1 }
  0x1a   : >> { %1340 = vmatmul.mubr.msk.f32.vlgmr.msra.gmra.mxu1 %vm227_vm2, %v224_v31  ;;  %1337 = vmatmul.mubr.msk.f32.vlgmr.msra.gmra.mxu0 %vm227_vm2, %v222_v32  ;;  %v403_v36 = vsel %vm400_vm3, %v401_v33, %v402_v34  ;;  %v405_v39 = vsel %vm400_vm3, %v402_v34, %v404_v37  ;;  %v407_v43 = vsel %vm400_vm3, %v404_v37, %v406_v40  ;;  %v603_v45 = vrot.slane %v1680_v42, 1 }
  0x1b   : >> { %1346 = vmatpush3.msra.mxu1 %v1527_v1  ;;  %1342 = vmatprep.mubr.msk.f32.mxu1 %vm1490_vm0, %v1489_v19  ;;  %v605_v49 = vrot.slane %v1694_v46, 1  ;;  %v607_v52 = vrot.slane %v508_v50, 1  ;;  %v698_v55 = vrot.slane %v1279_v41, 2  ;;  %v699_v56 = vrot.slane %v1680_v42, 2 }
  0x1c   : >> { %1347 = vmatprep.subr.mxu1 %v1489_v19  ;;  %1359 = vmatpush3.msra.mxu0 %v1547_v5  ;;  %v604_v48 = vsel %vm219_vm1, %v602_v44, %v603_v45  ;;  %v1283_v57 = vunpack.c.l.bf16 %v1286_v54  ;;  %v701_v59 = vrot.slane %v1694_v46, 2  ;;  %v1284_v60 = vunpack.c.h.bf16 %v1286_v54 }
  0x1d   : >> { %1348 = vmatpush3.msra.mxu1 %v1522_v0  ;;  %1360 = vmatprep.subr.mxu0 %v1489_v19  ;;  %v606_v51 = vsel %vm219_vm1, %v603_v45, %v605_v49  ;;  %v608_v53 = vsel %vm219_vm1, %v605_v49, %v607_v52  ;;  %v700_v58 = vsel %vm400_vm3, %v698_v55, %v699_v56  ;;  %v703_v63 = vrot.slane %v508_v50, 2 }
  0x1e   : >> { %1343 = vmatmul.mubr.msk.f32.gmra.mxu1 %vm227_vm2, %v226_v35  ;;  %1361 = vmatpush3.msra.mxu0 %v1542_v4  ;;  %v702_v62 = vsel %vm400_vm3, %v699_v56, %v701_v59  ;;  %v804_v20 = vunpack.c.l.bf16 %v1250_v61  ;;  %v996_v21 = vrot.slane %v1284_v60, 2  ;;  %v995_v22 = vrot.slane %v1283_v57, 2 }
  0x1f   : >> { %1349 = vmatprep.mubr.msk.f32.mxu1 %vm1490_vm0, %v1489_v19  ;;  %1362 = vmatprep.mubr.msk.f32.mxu0 %vm1490_vm0, %v1489_v19  ;;  %v899_v26 = vrot.slane %v1283_v57, 1 }
  0x20   : >> { %1371 = vmatprep.subr.mxu1 %v1489_v19  ;;  %1363 = vmatmul.mubr.msk.f32.vlgmr.msra.gmra.mxu0 %vm227_vm2, %v403_v36  ;;  %v997_v27 = vsel %vm400_vm3, %v995_v22, %v996_v21  ;;  %v998_v28 = vrot.slane %v804_v20, 2  ;;  %v902_v31 = vrot.slane %v804_v20, 1 }
  0x21   : >> { %1384 = vmatprep.subr.mxu0 %v1489_v19  ;;  %1365 = vmatprep.mubr.msk.f32.mxu0 %vm1490_vm0, %v1489_v19 }
  0x22   : >> { %1350 = vmatmul.mubr.msk.f32.vlgmr.msra.gmra.mxu1 %vm227_vm2, %v1275_v25  ;;  %1385 = vmatpush3.msra.mxu0 %v1567_v9  ;;  %v704_v25 = vsel %vm400_vm3, %v701_v59, %v703_v63  ;;  %v999_v32 = vsel %vm400_vm3, %v996_v21, %v998_v28 }
  0x23   : >> { %1372 = vmatpush3.msra.mxu1 %v1557_v7  ;;  %1352 = vmatprep.mubr.msk.f32.mxu1 %vm1490_vm0, %v1489_v19 }
  0x24   : >> { %1366 = vmatmul.mubr.msk.f32.gmra.mxu0 %vm227_vm2, %v405_v39  ;;  %1373 = vmatprep.subr.mxu1 %v1489_v19 }
  0x25   : >> { %1374 = vmatpush3.msra.mxu1 %v1552_v6  ;;  %1368 = vmatprep.mubr.msk.f32.mxu0 %vm1490_vm0, %v1489_v19 }
  0x26   : >> { %1353 = vmatmul.mubr.msk.f32.gmra.mxu1 %vm227_vm2, %v1276_v23  ;;  %1386 = vmatprep.subr.mxu0 %v1489_v19  ;;  %v1251_v23 = vld [vmem:[%s1637_s9 + $0x2c] sm:$0x1] }
  0x27   : >> { %1355 = vmatprep.mubr.msk.f32.mxu1 %vm1490_vm0, %v1489_v19  ;;  %1387 = vmatpush3.msra.mxu0 %v1562_v8  ;;  %v805_v29 = vunpack.c.l.bf16 %v1251_v23 }
  0x28   : >> { %1369 = vmatmul.mubr.msk.f32.gmra.mxu0 %vm227_vm2, %v407_v43  ;;  %1397 = vmatprep.subr.mxu1 %v1489_v19 }
  0x29   : >> { %1388 = vmatprep.mubr.msk.f32.mxu0 %vm1490_vm0, %v1489_v19  ;;  %1410 = vmatprep.subr.mxu0 %v1489_v19  ;;  %v1000_v33 = vrot.slane %v805_v29, 2  ;;  %v904_v35 = vrot.slane %v805_v29, 1 }
  0x2a   : >> { %1356 = vmatmul.mubr.msk.f32.gmra.mxu1 %vm227_vm2, %v1646_v24  ;;  %v900_v24 = vrot.slane %v1284_v60, 1 }
  0x2b   : >> { %1375 = vmatprep.mubr.msk.f32.mxu1 %vm1490_vm0, %v1489_v19  ;;  %v1001_v36 = vsel %vm400_vm3, %v998_v28, %v1000_v33  ;;  %v905_v37 = vsel %vm219_vm1, %v902_v31, %v904_v35 }
  0x2c   : >> { %1389 = vmatmul.mubr.msk.f32.vlgmr.msra.gmra.mxu0 %vm227_vm2, %v604_v48  ;;  %v901_v30 = vsel %vm219_vm1, %v899_v26, %v900_v24  ;;  %v903_v34 = vsel %vm219_vm1, %v900_v24, %v902_v31 }
  0x2d   : >> { %1411 = vmatpush3.msra.mxu0 %v1587_v13  ;;  %1391 = vmatprep.mubr.msk.f32.mxu0 %vm1490_vm0, %v1489_v19 }
  0x2e   : >> { %1376 = vmatmul.mubr.msk.f32.vlgmr.msra.gmra.mxu1 %vm227_vm2, %v1279_v41  ;;  %1412 = vmatprep.subr.mxu0 %v1489_v19 }
  0x2f   : >> { %1398 = vmatpush3.msra.mxu1 %v1577_v11  ;;  %1378 = vmatprep.mubr.msk.f32.mxu1 %vm1490_vm0, %v1489_v19 }
  0x30   : >> { %1392 = vmatmul.mubr.msk.f32.gmra.mxu0 %vm227_vm2, %v606_v51  ;;  %1399 = vmatprep.subr.mxu1 %v1489_v19 }
  0x31   : >> { %1400 = vmatpush3.msra.mxu1 %v1572_v10  ;;  %1394 = vmatprep.mubr.msk.f32.mxu0 %vm1490_vm0, %v1489_v19 }
  0x32   : >> { %1379 = vmatmul.mubr.msk.f32.gmra.mxu1 %vm227_vm2, %v1680_v42  ;;  %1413 = vmatpush3.msra.mxu0 %v1582_v12 }
  0x33   : >> { %1381 = vmatprep.mubr.msk.f32.mxu1 %vm1490_vm0, %v1489_v19  ;;  %1423 = vmatprep.subr.mxu1 %v1489_v19 }
  0x34   : >> { %1395 = vmatmul.mubr.msk.f32.gmra.mxu0 %vm227_vm2, %v608_v53  ;;  %1436 = vmatprep.subr.mxu0 %v1489_v19 }
  0x35   : >> { %1414 = vmatprep.mubr.msk.f32.mxu0 %vm1490_vm0, %v1489_v19 }
  0x36   : >> { %1382 = vmatmul.mubr.msk.f32.gmra.mxu1 %vm227_vm2, %v1694_v46 }
  0x37   : >> { %1401 = vmatprep.mubr.msk.f32.mxu1 %vm1490_vm0, %v1489_v19 }
  0x38   : >> { %1415 = vmatmul.mubr.msk.f32.vlgmr.msra.gmra.mxu0 %vm227_vm2, %v1283_v57 }
  0x39   : >> { %1437 = vmatpush3.msra.mxu0 %v1607_v17  ;;  %1417 = vmatprep.mubr.msk.f32.mxu0 %vm1490_vm0, %v1489_v19 }
  0x3a   : >> { %1402 = vmatmul.mubr.msk.f32.vlgmr.msra.gmra.mxu1 %vm227_vm2, %v700_v58  ;;  %1438 = vmatprep.subr.mxu0 %v1489_v19 }
  0x3b   : >> { %1424 = vmatpush3.msra.mxu1 %v1597_v15  ;;  %1404 = vmatprep.mubr.msk.f32.mxu1 %vm1490_vm0, %v1489_v19 }
  0x3c   : >> { %1418 = vmatmul.mubr.msk.f32.gmra.mxu0 %vm227_vm2, %v1284_v60  ;;  %1425 = vmatprep.subr.mxu1 %v1489_v19 }
  0x3d   : >> { %1426 = vmatpush3.msra.mxu1 %v1592_v14  ;;  %1420 = vmatprep.mubr.msk.f32.mxu0 %vm1490_vm0, %v1489_v19 }
  0x3e   : >> { %1405 = vmatmul.mubr.msk.f32.gmra.mxu1 %vm227_vm2, %v702_v62  ;;  %1439 = vmatpush3.msra.mxu0 %v1602_v16 }
  0x3f   : >> { %1407 = vmatprep.mubr.msk.f32.mxu1 %vm1490_vm0, %v1489_v19 }
  0x40   : >> { %1421 = vmatmul.mubr.msk.f32.gmra.mxu0 %vm227_vm2, %v804_v20 }
  0x41   : >> { %1440 = vmatprep.mubr.msk.f32.mxu0 %vm1490_vm0, %v1489_v19 }
  0x42   : >> { %1408 = vmatmul.mubr.msk.f32.gmra.mxu1 %vm227_vm2, %v704_v25 }
  0x43   : >> { %1427 = vmatprep.mubr.msk.f32.mxu1 %vm1490_vm0, %v1489_v19 }
  0x44   : >> { %1441 = vmatmul.mubr.msk.f32.vlgmr.msra.gmra.mxu0 %vm227_vm2, %v997_v27 }
  0x45   : >> { %1443 = vmatprep.mubr.msk.f32.mxu0 %vm1490_vm0, %v1489_v19 }
  0x46   : >> { %1428 = vmatmul.mubr.msk.f32.vlgmr.msra.gmra.mxu1 %vm227_vm2, %v901_v30 }
  0x47   : >> { %1430 = vmatprep.mubr.msk.f32.mxu1 %vm1490_vm0, %v1489_v19 }
  0x48   : >> { %1444 = vmatmul.mubr.msk.f32.gmra.mxu0 %vm227_vm2, %v999_v32 }
  0x49   : >> { %1446 = vmatprep.mubr.msk.f32.mxu0 %vm1490_vm0, %v1489_v19 }
  0x4a   : >> { %1431 = vmatmul.mubr.msk.f32.gmra.mxu1 %vm227_vm2, %v903_v34 }
  0x4b   : >> { %1433 = vmatprep.mubr.msk.f32.mxu1 %vm1490_vm0, %v1489_v19 }
  0x4c   : >> { %1447 = vmatmul.mubr.msk.f32.gmra.mxu0 %vm227_vm2, %v1001_v36 }
  0x4e   : >> { %1434 = vmatmul.mubr.msk.f32.gmra.mxu1 %vm227_vm2, %v905_v37 }
  0xda   : >> { %v305_v38 = vpop.f32.mrf.mxu1  ;;  %v300_v39 = vpop.f32.mrf.mxu0 }
  0xdc   : >> { %v1341_v40 = vpop.f32.mrf.mxu1  ;;  %v1338_v41 = vpop.f32.mrf.mxu0 }
  0xde   : >> { %v310_v42 = vpop.f32.mrf.mxu1 }
  0xe0   : >> { %v1344_v43 = vpop.f32.mrf.mxu1  ;;  %v480_v44 = vpop.f32.mrf.mxu0 }
  0xe2   : >> { %v386_v45 = vpop.f32.mrf.mxu1  ;;  %v1364_v46 = vpop.f32.mrf.mxu0 }
  0xe3   : >> { %v387_v20 = vadd.f32 %v386_v45, %v300_v39 }
  0xe4   : >> { %v1351_v47 = vpop.f32.mrf.mxu1  ;;  %v485_v48 = vpop.f32.mrf.mxu0 }
  0xe5   : >> { %v494_v25 = vadd.f32 %v480_v44, %v387_v20 }
  0xe6   : >> { %v391_v49 = vpop.f32.mrf.mxu1  ;;  %v1367_v50 = vpop.f32.mrf.mxu0 }
  0xe7   : >> { %v392_v26 = vadd.f32 %v391_v49, %v305_v38 }
  0xe8   : >> { %v1354_v19 = vpop.f32.mrf.mxu1  ;;  %v490_v51 = vpop.f32.mrf.mxu0 }
  0xe9   : >> { %v495_v32 = vadd.f32 %v485_v48, %v392_v26 }
  0xea   : >> { %v396_v52 = vpop.f32.mrf.mxu1  ;;  %v1370_v53 = vpop.f32.mrf.mxu0 }
  0xeb   : >> { %v397_v33 = vadd.f32 %v396_v52, %v310_v42 }
  0xec   : >> { %v1357_v54 = vpop.f32.mrf.mxu1  ;;  %v681_v55 = vpop.f32.mrf.mxu0 }
  0xed   : >> { %v496_v39 = vadd.f32 %v490_v51, %v397_v33 }
  0xee   : >> { %v584_v56 = vpop.f32.mrf.mxu1  ;;  %v1390_v57 = vpop.f32.mrf.mxu0 }
  0xef   : >> { %v598_v29 = vadd.f32 %v584_v56, %v494_v25 }
  0xf0   : >> { %v1377_v58 = vpop.f32.mrf.mxu1  ;;  %v686_v59 = vpop.f32.mrf.mxu0 }
  0xf1   : >> { %v695_v36 = vadd.f32 %v681_v55, %v598_v29 }
  0xf2   : >> { %v589_v60 = vpop.f32.mrf.mxu1  ;;  %v1393_v61 = vpop.f32.mrf.mxu0 }
  0xf3   : >> { %v599_v37 = vadd.f32 %v589_v60, %v495_v32 }
  0xf4   : >> { %v1380_v62 = vpop.f32.mrf.mxu1  ;;  %v691_v63 = vpop.f32.mrf.mxu0 }
  0xf5   : >> { %v696_v47 = vadd.f32 %v686_v59, %v599_v37 }
  0xf6   : >> { %v594_v21 = vpop.f32.mrf.mxu1  ;;  %v1396_v22 = vpop.f32.mrf.mxu0 }
  0xf7   : >> { %v600_v44 = vadd.f32 %v594_v21, %v496_v39 }
  0xf8   : >> { %v1383_v23 = vpop.f32.mrf.mxu1  ;;  %v881_v24 = vpop.f32.mrf.mxu0 }
  0xf9   : >> { %v697_v42 = vadd.f32 %v691_v63, %v600_v44 }
  0xfa   : >> { %v777_v27 = vpop.f32.mrf.mxu1  ;;  %v1416_v28 = vpop.f32.mrf.mxu0 }
  0xfb   : >> { %v791_v43 = vadd.f32 %v777_v27, %v695_v36 }
  0xfc   : >> { %v1403_v30 = vpop.f32.mrf.mxu1  ;;  %v886_v31 = vpop.f32.mrf.mxu0 }
  0xfd   : >> { %v895_v50 = vadd.f32 %v881_v24, %v791_v43 }
  0xfe   : >> { %v782_v34 = vpop.f32.mrf.mxu1  ;;  %v1419_v35 = vpop.f32.mrf.mxu0 }
  0xff   : >> { %v792_v19 = vadd.f32 %v782_v34, %v696_v47 }
 0x100   : >> { %v1406_v40 = vpop.f32.mrf.mxu1  ;;  %v891_v41 = vpop.f32.mrf.mxu0 }
 0x101   : >> { %v896_v56 = vadd.f32 %v886_v31, %v792_v19 }
 0x102   : >> { %v787_v45 = vpop.f32.mrf.mxu1  ;;  %v1422_v46 = vpop.f32.mrf.mxu0 }
 0x103   : >> { %v793_v57 = vadd.f32 %v787_v45, %v697_v42 }
 0x104   : >> { %v1409_v38 = vpop.f32.mrf.mxu1  ;;  %v1074_v49 = vpop.f32.mrf.mxu0 }
 0x105   : >> { %v897_v21 = vadd.f32 %v891_v41, %v793_v57 }
 0x106   : >> { %v978_v53 = vpop.f32.mrf.mxu1  ;;  %v1442_v48 = vpop.f32.mrf.mxu0 }
 0x107   : >> { %v992_v52 = vadd.f32 %v978_v53, %v895_v50 }
 0x108   : >> { %v1429_v54 = vpop.f32.mrf.mxu1  ;;  %v1079_v55 = vpop.f32.mrf.mxu0 }
 0x109   : >> { %v1088_v51 = vadd.f32 %v1074_v49, %v992_v52 }
 0x10a   : >> { %v983_v58 = vpop.f32.mrf.mxu1  ;;  %v1445_v60 = vpop.f32.mrf.mxu0 }
 0x10b   : >> { %v1097_v59 = vadd.f32 %v1617_v18, %v1088_v51  ;;  %v993_v61 = vadd.f32 %v983_v58, %v896_v56 }
 0x10c   : >> { %v1432_v62 = vpop.f32.mrf.mxu1  ;;  %v1084_v20 = vpop.f32.mrf.mxu0 }
 0x10d   : >> { %vm1100_vm4 = vcmp.gt.f32.partialorder %v1097_v59, 0.0  ;;  %v1103_v22 = vmul.f32 0.3, %v1097_v59  ;;  %v1089_v23 = vadd.f32 %v1079_v55, %v993_v61 }
 0x10e   : >> { %v988_v63 = vpop.f32.mrf.mxu1  ;;  %v1448_v24 = vpop.f32.mrf.mxu0 }
 0x10f   : >> { %v1106_v25 = vsel %vm1100_vm4, %v1097_v59, %v1103_v22  ;;  %v1098_v26 = vadd.f32 %v1617_v18, %v1089_v23  ;;  %v994_v27 = vadd.f32 %v988_v63, %v897_v21 }
 0x110   : >> { %v1269_v28 = vpack.c.bf16 %v1106_v25, %v1106_v25  ;;  %v1435_v29 = vpop.f32.mrf.mxu1 }
 0x111   : >> { %vm1101_vm6 = vcmp.gt.f32.partialorder %v1098_v26, 0.0  ;;  %v1104_v30 = vmul.f32 0.3, %v1098_v26  ;;  %v1090_v31 = vadd.f32 %v1084_v20, %v994_v27 }
 0x112   : >> { %1126 = vst.msk [vmem:[%s1124_s11] sm:$0xf] %vm1125_vm5, %v1269_v28 }
 0x113   : >> { %v1107_v32 = vsel %vm1101_vm6, %v1098_v26, %v1104_v30  ;;  %v1099_v33 = vadd.f32 %v1617_v18, %v1090_v31 }
 0x114   : >> { %v1270_v34 = vpack.c.bf16 %v1107_v32, %v1107_v32 }
 0x115   : >> { %vm1102_vm7 = vcmp.gt.f32.partialorder %v1099_v33, 0.0  ;;  %v1105_v35 = vmul.f32 0.3, %v1099_v33 }
 0x116   : >> { %1127 = vst.msk [vmem:[%s1124_s11 + $0x4] sm:$0xf] %vm1125_vm5, %v1270_v34  ;;  %202 = sbr.rel (!%p200_p4) target bundleno = 18 (0x12), region = 81 }
 0x117   : >> { %v1108_v36 = vsel %vm1102_vm7, %v1099_v33, %v1105_v35 }
 0x118   : >> { %v1271_v37 = vpack.c.bf16 %v1108_v36, %v1108_v36 }
 0x11a   : >> { %1128 = vst.msk [vmem:[%s1124_s11 + $0x8] sm:$0xf] %vm1125_vm5, %v1271_v37 }
 0x11b PF: > { %s13_s12 = sadd.s32 1, %s1483_s12  }
 0x11c   : > { %p10_p5 = scmp.ge.s32.totalorder %s13_s12, 4  }
 0x11e   :  { %12 = sbr.rel (!%p10_p5) target bundleno = 1 (0x1), region = 92 }

// kernel: self_attn_conv.10
= control target key start
LH: loop header
LB: loop body
LE: loop exit
PB: predicated region body
PF: predicated region fallthrough
CT: control target
= control target key end

     0   :  { %s1465_s12 = smov 0   ;;  %s1683_s0 = inlined_call_operand.vmem [shape: bf16[2,26,26,8], index: 0, kind: input, shape index: {}]   ;;  %s1684_s1 = inlined_call_operand.vmem [shape: f32[3,3,8,2], index: 1, kind: input, shape index: {}]   ;;  %s1685_s2 = inlined_call_operand.vmem [shape: f32[1,2], index: 2, kind: input, shape index: {}]   ;;  %s1686_s3 = inlined_call_operand.vmem [shape: bf16[2,24,24,2], index: 3, kind: output, shape index: {}]  }
   0x1 LB: > { %s1190_s13 = sadd.s32 4294967295, %s1437_s12   ;;  %p1194_p0 = scmp.ge.s32.totalorder %s1437_s12, 1  ;;  %s1437_s12 = sphi %s1465_s12, %s13_s12  }
   0x2   : > { %p137_p1 = scmp.lt.s32.totalorder %s1437_s12, 3 }
   0x4   : > { %p138_p2 = pnand %p1194_p0, %p137_p1 }
   0x5   : > { %p161_p3 = scmp.lt.s32.totalorder (!%p138_p2), %s1190_s13, 1  ;;  %s1533_s17 = smov (!%p138_p2), 0  }
   0x6   : > { %141 = sbr.rel (%p138_p2) target bundleno = 281 (0x119), region = 32 }
   0xb   : > { %v1476_v0 = vld [vmem:[%s1684_s1] sm:$0xff]  ;;  %v1481_v1 = vld [vmem:[%s1684_s1 + $0x8] sm:$0xff]  ;;  %v1486_v2 = vld [vmem:[%s1684_s1 + $0x10] sm:$0xff]  ;;  %s1688_s13 = smov (!%p161_p3, %s1190_s13), 1 }
   0xc   : > { %v1491_v3 = vld [vmem:[%s1684_s1 + $0x18] sm:$0xff]  ;;  %v1496_v4 = vld [vmem:[%s1684_s1 + $0x20] sm:$0xff]  ;;  %v1501_v5 = vld [vmem:[%s1684_s1 + $0x28] sm:$0xff]  ;;  %s1407_s7 = smul.u32 416, %s1688_s13 }
   0xd   : > { %v1506_v6 = vld [vmem:[%s1684_s1 + $0x30] sm:$0xff]  ;;  %v1511_v7 = vld [vmem:[%s1684_s1 + $0x38] sm:$0xff]  ;;  %v1516_v8 = vld [vmem:[%s1684_s1 + $0x40] sm:$0xff]  ;;  %s1408_s8 = smul.u32 288, %s1688_s13 }
   0xe   : > { %v1521_v9 = vld [vmem:[%s1685_s2] ss:$0 sm:$0xff]  ;;  %s1526_s11 = scalar_lea.vmem %s1683_s0, %s1407_s7 }
   0xf   : > { %s1531_s16 = scalar_lea.vmem %s1686_s3, %s1408_s8 }
  0x10 LB: >> { %v1443_v10 = vmov 0.0   ;;  %vm1444_vm0 = vmmov 0   ;;  %s1251_s13 = sshll.u32 %s1441_s17, 4  ;;  %vm210_vm1 = vcmask 1046528   ;;  %vm218_vm2 = vcmask 64512   ;;  %s1255_s19 = smul.u32 12, %s1441_s17  ;;  %s1441_s17 = sphi %s1533_s17, %s194_s17  }
  0x11   : >> { %1405 = vmatprep.subr.mxu1 %v1443_v10  ;;  %1311 = vmatprep.mubr.msk.f32.mxu1 %vm1444_vm0, %v1443_v10  ;;  %s1546_s18 = scalar_lea.vmem %s1526_s11, %s1251_s13  ;;  %vm391_vm3 = vcmask 1045504   ;;  %vm1116_vm5 = vcmask 11264   ;;  %s194_s17 = sadd.s32 1, %s1441_s17  }
  0x12   : >> { %1406 = vmatpush3.msra.mxu1 %v1481_v1  ;;  %1306 = vmatprep.subr.mxu0 %v1443_v10  ;;  %v1257_v11 = vld [vmem:[%s1546_s18] sm:$0xff]   ;;  %v200_v12 = vld [vmem:[%s1546_s18 + $0x8] ss:$16 sps:$4 sm:$0xff]   ;;  %v201_v13 = vld [vmem:[%s1546_s18 + $0xc] sm:$0x1]  ;;  %s1115_s20 = scalar_lea.vmem %s1531_s16, %s1255_s19  ;;  %p191_p4 = scmp.ge.s32.totalorder %s194_s17, 24  }
  0x13   : >> { %1317 = vmatprep.subr.mxu1 %v1443_v10  ;;  %1307 = vmatpush3.msra.mxu0 %v1481_v1  ;;  %v1259_v14 = vunpack.c.h.bf16 %v1257_v11  ;;  %v204_v15 = vunpack.c.l.bf16 %v200_v12  ;;  %v1258_v16 = vunpack.c.l.bf16 %v1257_v11  ;;  %v205_v17 = vunpack.c.l.bf16 %v201_v13  ;;  %v1268_v29 = vld [vmem:[%s1546_s18 + $0x10] sm:$0xff]   ;;  %v1220_v38 = vld [vmem:[%s1546_s18 + $0x1c] sm:$0x1]  ;;  %v1269_v45 = vld [vmem:[%s1546_s18 + $0x20] sm:$0xff]  }
  0x14   : >> { %1308 = vmatprep.mubr.msk.f32.mxu0 %vm1444_vm0, %v1443_v10  ;;  %1328 = vmatprep.subr.mxu0 %v1443_v10  ;;  %v1262_v32 = vunpack.c.l.bf16 %v1268_v29  ;;  %v1263_v33 = vunpack.c.h.bf16 %v1268_v29  ;;  %v498_v37 = vunpack.c.h.bf16 %v200_v12  ;;  %v499_v41 = vunpack.c.l.bf16 %v1220_v38  ;;  %v1233_v52 = vld [vmem:[%s1546_s18 + $0x28] sm:$0xf]  ;;  %v1234_v58 = vld [vmem:[%s1546_s18 + $0x2c] sm:$0x1] }
  0x15   : >> { %v212_v18 = vrot.slane %v1259_v14, 1  ;;  %v214_v19 = vrot.slane %v204_v15, 1  ;;  %v211_v20 = vrot.slane %v1258_v16, 1  ;;  %v216_v21 = vrot.slane %v205_v17, 1 }
  0x16   : >> { %v392_v22 = vrot.slane %v1258_v16, 2  ;;  %v393_v23 = vrot.slane %v1259_v14, 2  ;;  %v395_v28 = vrot.slane %v204_v15, 2  ;;  %v397_v31 = vrot.slane %v205_v17, 2 }
  0x17   : >> { %v215_v24 = vsel %vm210_vm1, %v212_v18, %v214_v19  ;;  %v213_v25 = vsel %vm210_vm1, %v211_v20, %v212_v18  ;;  %v217_v26 = vsel %vm210_vm1, %v214_v19, %v216_v21  ;;  %v593_v35 = vrot.slane %v1262_v32, 1 }
  0x18   : >> { %1312 = vmatmul.mubr.msk.f32.vlgmr.msra.gmra.mxu1 %vm218_vm2, %v215_v24  ;;  %1309 = vmatmul.mubr.msk.f32.vlgmr.msra.gmra.mxu0 %vm218_vm2, %v213_v25  ;;  %v394_v27 = vsel %vm391_vm3, %v392_v22, %v393_v23  ;;  %v396_v30 = vsel %vm391_vm3, %v393_v23, %v395_v28  ;;  %v398_v34 = vsel %vm391_vm3, %v395_v28, %v397_v31  ;;  %v594_v36 = vrot.slane %v1263_v33, 1 }
  0x19   : >> { %1318 = vmatpush3.msra.mxu1 %v1476_v0  ;;  %1314 = vmatprep.mubr.msk.f32.mxu1 %vm1444_vm0, %v1443_v10  ;;  %v596_v40 = vrot.slane %v498_v37, 1  ;;  %v598_v43 = vrot.slane %v499_v41, 1  ;;  %v1266_v46 = vunpack.c.l.bf16 %v1269_v45  ;;  %v689_v47 = vrot.slane %v1262_v32, 2 }
  0x1a   : >> { %1329 = vmatpush3.msra.mxu0 %v1486_v2  ;;  %1330 = vmatprep.mubr.msk.f32.mxu0 %vm1444_vm0, %v1443_v10  ;;  %v595_v39 = vsel %vm210_vm1, %v593_v35, %v594_v36  ;;  %v690_v48 = vrot.slane %v1263_v33, 2  ;;  %v1267_v49 = vunpack.c.h.bf16 %v1269_v45  ;;  %v692_v51 = vrot.slane %v498_v37, 2 }
  0x1b   : >> { %1339 = vmatprep.subr.mxu1 %v1443_v10  ;;  %1350 = vmatprep.subr.mxu0 %v1443_v10  ;;  %v597_v42 = vsel %vm210_vm1, %v594_v36, %v596_v40  ;;  %v599_v44 = vsel %vm210_vm1, %v596_v40, %v598_v43  ;;  %v694_v53 = vrot.slane %v499_v41, 2  ;;  %v795_v54 = vunpack.c.l.bf16 %v1233_v52 }
  0x1c   : >> { %1315 = vmatmul.mubr.msk.f32.gmra.mxu1 %vm218_vm2, %v217_v26  ;;  %1331 = vmatmul.mubr.msk.f32.vlgmr.msra.gmra.mxu0 %vm218_vm2, %v394_v27  ;;  %v691_v50 = vsel %vm391_vm3, %v689_v47, %v690_v48  ;;  %v693_v55 = vsel %vm391_vm3, %v690_v48, %v692_v51  ;;  %v987_v56 = vrot.slane %v1267_v49, 2  ;;  %v986_v57 = vrot.slane %v1266_v46, 2 }
  0x1d   : >> { %1319 = vmatprep.mubr.msk.f32.mxu1 %vm1444_vm0, %v1443_v10  ;;  %1351 = vmatpush3.msra.mxu0 %v1496_v4  ;;  %v891_v59 = vrot.slane %v1267_v49, 1  ;;  %v695_v60 = vsel %vm391_vm3, %v692_v51, %v694_v53  ;;  %v890_v61 = vrot.slane %v1266_v46, 1  ;;  %v989_v63 = vrot.slane %v795_v54, 2 }
  0x1e   : >> { %1333 = vmatprep.mubr.msk.f32.mxu0 %vm1444_vm0, %v1443_v10  ;;  %1372 = vmatprep.subr.mxu0 %v1443_v10  ;;  %v988_v62 = vsel %vm391_vm3, %v986_v57, %v987_v56  ;;  %v796_v11 = vunpack.c.l.bf16 %v1234_v58  ;;  %v893_v13 = vrot.slane %v795_v54, 1 }
  0x1f   : >> { %v892_v12 = vsel %vm210_vm1, %v890_v61, %v891_v59 }
  0x20   : >> { %1320 = vmatmul.mubr.msk.f32.vlgmr.msra.gmra.mxu1 %vm218_vm2, %v1258_v16  ;;  %1334 = vmatmul.mubr.msk.f32.gmra.mxu0 %vm218_vm2, %v396_v30  ;;  %v894_v16 = vsel %vm210_vm1, %v891_v59, %v893_v13  ;;  %v895_v17 = vrot.slane %v796_v11, 1 }
  0x21   : >> { %1340 = vmatpush3.msra.mxu1 %v1491_v3  ;;  %1322 = vmatprep.mubr.msk.f32.mxu1 %vm1444_vm0, %v1443_v10 }
  0x22   : >> { %1336 = vmatprep.mubr.msk.f32.mxu0 %vm1444_vm0, %v1443_v10  ;;  %1361 = vmatprep.subr.mxu1 %v1443_v10  ;;  %v896_v19 = vsel %vm210_vm1, %v893_v13, %v895_v17 }
  0x24   : >> { %1323 = vmatmul.mubr.msk.f32.gmra.mxu1 %vm218_vm2, %v1259_v14  ;;  %1337 = vmatmul.mubr.msk.f32.gmra.mxu0 %vm218_vm2, %v398_v34  ;;  %v990_v14 = vsel %vm391_vm3, %v987_v56, %v989_v63 }
  0x25   : >> { %1325 = vmatprep.mubr.msk.f32.mxu1 %vm1444_vm0, %v1443_v10  ;;  %1352 = vmatprep.mubr.msk.f32.mxu0 %vm1444_vm0, %v1443_v10 }
  0x28   : >> { %1326 = vmatmul.mubr.msk.f32.gmra.mxu1 %vm218_vm2, %v204_v15  ;;  %1353 = vmatmul.mubr.msk.f32.vlgmr.msra.gmra.mxu0 %vm218_vm2, %v595_v39  ;;  %v991_v15 = vrot.slane %v796_v11, 2 }
  0x29   : >> { %1341 = vmatprep.mubr.msk.f32.mxu1 %vm1444_vm0, %v1443_v10  ;;  %1373 = vmatpush3.msra.mxu0 %v1506_v6 }
  0x2a   : >> { %1355 = vmatprep.mubr.msk.f32.mxu0 %vm1444_vm0, %v1443_v10  ;;  %1394 = vmatprep.subr.mxu0 %v1443_v10  ;;  %v992_v18 = vsel %vm391_vm3, %v989_v63, %v991_v15 }
  0x2c   : >> { %1342 = vmatmul.mubr.msk.f32.vlgmr.msra.gmra.mxu1 %vm218_vm2, %v1262_v32  ;;  %1356 = vmatmul.mubr.msk.f32.gmra.mxu0 %vm218_vm2, %v597_v42 }
  0x2d   : >> { %1362 = vmatpush3.msra.mxu1 %v1501_v5  ;;  %1344 = vmatprep.mubr.msk.f32.mxu1 %vm1444_vm0, %v1443_v10 }
  0x2e   : >> { %1358 = vmatprep.mubr.msk.f32.mxu0 %vm1444_vm0, %v1443_v10  ;;  %1383 = vmatprep.subr.mxu1 %v1443_v10 }
  0x30   : >> { %1345 = vmatmul.mubr.msk.f32.gmra.mxu1 %vm218_vm2, %v1263_v33  ;;  %1359 = vmatmul.mubr.msk.f32.gmra.mxu0 %vm218_vm2, %v599_v44 }
  0x31   : >> { %1347 = vmatprep.mubr.msk.f32.mxu1 %vm1444_vm0, %v1443_v10  ;;  %1374 = vmatprep.mubr.msk.f32.mxu0 %vm1444_vm0, %v1443_v10 }
  0x34   : >> { %1348 = vmatmul.mubr.msk.f32.gmra.mxu1 %vm218_vm2, %v498_v37  ;;  %1375 = vmatmul.mubr.msk.f32.vlgmr.msra.gmra.mxu0 %vm218_vm2, %v1266_v46 }
  0x35   : >> { %1363 = vmatprep.mubr.msk.f32.mxu1 %vm1444_vm0, %v1443_v10  ;;  %1395 = vmatpush3.msra.mxu0 %v1516_v8 }
  0x36   : >> { %1377 = vmatprep.mubr.msk.f32.mxu0 %vm1444_vm0, %v1443_v10 }
  0x38   : >> { %1364 = vmatmul.mubr.msk.f32.vlgmr.msra.gmra.mxu1 %vm218_vm2, %v691_v50  ;;  %1378 = vmatmul.mubr.msk.f32.gmra.mxu0 %vm218_vm2, %v1267_v49 }
  0x39   : >> { %1384 = vmatpush3.msra.mxu1 %v1511_v7  ;;  %1366 = vmatprep.mubr.msk.f32.mxu1 %vm1444_vm0, %v1443_v10 }
  0x3a   : >> { %1380 = vmatprep.mubr.msk.f32.mxu0 %vm1444_vm0, %v1443_v10 }
  0x3c   : >> { %1367 = vmatmul.mubr.msk.f32.gmra.mxu1 %vm218_vm2, %v693_v55  ;;  %1381 = vmatmul.mubr.msk.f32.gmra.mxu0 %vm218_vm2, %v795_v54 }
  0x3d   : >> { %1369 = vmatprep.mubr.msk.f32.mxu1 %vm1444_vm0, %v1443_v10  ;;  %1396 = vmatprep.mubr.msk.f32.mxu0 %vm1444_vm0, %v1443_v10 }
  0x40   : >> { %1370 = vmatmul.mubr.msk.f32.gmra.mxu1 %vm218_vm2, %v695_v60  ;;  %1397 = vmatmul.mubr.msk.f32.vlgmr.msra.gmra.mxu0 %vm218_vm2, %v988_v62 }
  0x41   : >> { %1385 = vmatprep.mubr.msk.f32.mxu1 %vm1444_vm0, %v1443_v10  ;;  %1399 = vmatprep.mubr.msk.f32.mxu0 %vm1444_vm0, %v1443_v10 }
  0x44   : >> { %1386 = vmatmul.mubr.msk.f32.vlgmr.msra.gmra.mxu1 %vm218_vm2, %v892_v12  ;;  %1400 = vmatmul.mubr.msk.f32.gmra.mxu0 %vm218_vm2, %v990_v14 }
  0x45   : >> { %1388 = vmatprep.mubr.msk.f32.mxu1 %vm1444_vm0, %v1443_v10  ;;  %1402 = vmatprep.mubr.msk.f32.mxu0 %vm1444_vm0, %v1443_v10 }
  0x48   : >> { %1389 = vmatmul.mubr.msk.f32.gmra.mxu1 %vm218_vm2, %v894_v16  ;;  %1403 = vmatmul.mubr.msk.f32.gmra.mxu0 %vm218_vm2, %v992_v18 }
  0x49   : >> { %1391 = vmatprep.mubr.msk.f32.mxu1 %vm1444_vm0, %v1443_v10 }
  0x4c   : >> { %1392 = vmatmul.mubr.msk.f32.gmra.mxu1 %vm218_vm2, %v896_v19 }
  0xd8   : >> { %v296_v20 = vpop.f32.mrf.mxu1  ;;  %v291_v21 = vpop.f32.mrf.mxu0 }
  0xda   : >> { %v1313_v22 = vpop.f32.mrf.mxu1  ;;  %v1310_v23 = vpop.f32.mrf.mxu0 }
  0xdc   : >> { %v301_v24 = vpop.f32.mrf.mxu1  ;;  %v471_v25 = vpop.f32.mrf.mxu0 }
  0xde   : >> { %v1316_v26 = vpop.f32.mrf.mxu1  ;;  %v1332_v27 = vpop.f32.mrf.mxu0 }
  0xe0   : >> { %v377_v28 = vpop.f32.mrf.mxu1  ;;  %v476_v29 = vpop.f32.mrf.mxu0 }
  0xe1   : >> { %v378_v47 = vadd.f32 %v377_v28, %v291_v21 }
  0xe2   : >> { %v1321_v30 = vpop.f32.mrf.mxu1  ;;  %v1335_v31 = vpop.f32.mrf.mxu0 }
  0xe3   : >> { %v485_v52 = vadd.f32 %v471_v25, %v378_v47 }
  0xe4   : >> { %v382_v32 = vpop.f32.mrf.mxu1  ;;  %v481_v33 = vpop.f32.mrf.mxu0 }
  0xe5   : >> { %v383_v53 = vadd.f32 %v382_v32, %v296_v20 }
  0xe6   : >> { %v1324_v34 = vpop.f32.mrf.mxu1  ;;  %v1338_v10 = vpop.f32.mrf.mxu0 }
  0xe7   : >> { %v486_v59 = vadd.f32 %v476_v29, %v383_v53 }
  0xe8   : >> { %v387_v35 = vpop.f32.mrf.mxu1  ;;  %v672_v36 = vpop.f32.mrf.mxu0 }
  0xe9   : >> { %v388_v60 = vadd.f32 %v387_v35, %v301_v24 }
  0xea   : >> { %v1327_v37 = vpop.f32.mrf.mxu1  ;;  %v1354_v38 = vpop.f32.mrf.mxu0 }
  0xeb   : >> { %v487_v14 = vadd.f32 %v481_v33, %v388_v60 }
  0xec   : >> { %v575_v39 = vpop.f32.mrf.mxu1  ;;  %v677_v40 = vpop.f32.mrf.mxu0 }
  0xed   : >> { %v589_v56 = vadd.f32 %v575_v39, %v485_v52 }
  0xee   : >> { %v1343_v41 = vpop.f32.mrf.mxu1  ;;  %v1357_v42 = vpop.f32.mrf.mxu0 }
  0xef   : >> { %v686_v63 = vadd.f32 %v672_v36, %v589_v56 }
  0xf0   : >> { %v580_v43 = vpop.f32.mrf.mxu1  ;;  %v682_v44 = vpop.f32.mrf.mxu0 }
  0xf1   : >> { %v590_v11 = vadd.f32 %v580_v43, %v486_v59 }
  0xf2   : >> { %v1346_v45 = vpop.f32.mrf.mxu1  ;;  %v1360_v46 = vpop.f32.mrf.mxu0 }
  0xf3   : >> { %v687_v18 = vadd.f32 %v677_v40, %v590_v11 }
  0xf4   : >> { %v585_v48 = vpop.f32.mrf.mxu1  ;;  %v872_v49 = vpop.f32.mrf.mxu0 }
  0xf5   : >> { %v591_v19 = vadd.f32 %v585_v48, %v487_v14 }
  0xf6   : >> { %v1349_v50 = vpop.f32.mrf.mxu1  ;;  %v1376_v51 = vpop.f32.mrf.mxu0 }
  0xf7   : >> { %v688_v24 = vadd.f32 %v682_v44, %v591_v19 }
  0xf8   : >> { %v768_v54 = vpop.f32.mrf.mxu1  ;;  %v877_v55 = vpop.f32.mrf.mxu0 }
  0xf9   : >> { %v782_v15 = vadd.f32 %v768_v54, %v686_v63 }
  0xfa   : >> { %v1365_v57 = vpop.f32.mrf.mxu1  ;;  %v1379_v58 = vpop.f32.mrf.mxu0 }
  0xfb   : >> { %v886_v22 = vadd.f32 %v872_v49, %v782_v15 }
  0xfc   : >> { %v773_v61 = vpop.f32.mrf.mxu1  ;;  %v882_v62 = vpop.f32.mrf.mxu0 }
  0xfd   : >> { %v783_v23 = vadd.f32 %v773_v61, %v687_v18 }
  0xfe   : >> { %v1368_v12 = vpop.f32.mrf.mxu1  ;;  %v1382_v13 = vpop.f32.mrf.mxu0 }
  0xff   : >> { %v887_v30 = vadd.f32 %v877_v55, %v783_v23 }
 0x100   : >> { %v778_v16 = vpop.f32.mrf.mxu1  ;;  %v1065_v17 = vpop.f32.mrf.mxu0 }
 0x101   : >> { %v784_v31 = vadd.f32 %v778_v16, %v688_v24 }
 0x102   : >> { %v1371_v20 = vpop.f32.mrf.mxu1  ;;  %v1398_v21 = vpop.f32.mrf.mxu0 }
 0x103   : >> { %v888_v38 = vadd.f32 %v882_v62, %v784_v31 }
 0x104   : >> { %v969_v25 = vpop.f32.mrf.mxu1  ;;  %v1070_v26 = vpop.f32.mrf.mxu0 }
 0x105   : >> { %v983_v27 = vadd.f32 %v969_v25, %v886_v22 }
 0x106   : >> { %v1387_v28 = vpop.f32.mrf.mxu1  ;;  %v1401_v29 = vpop.f32.mrf.mxu0 }
 0x107   : >> { %v1079_v32 = vadd.f32 %v1065_v17, %v983_v27 }
 0x108   : >> { %v974_v33 = vpop.f32.mrf.mxu1  ;;  %v1075_v34 = vpop.f32.mrf.mxu0 }
 0x109   : >> { %v1088_v10 = vadd.f32 %v1521_v9, %v1079_v32  ;;  %v984_v35 = vadd.f32 %v974_v33, %v887_v30 }
 0x10a   : >> { %v1390_v36 = vpop.f32.mrf.mxu1  ;;  %v1404_v37 = vpop.f32.mrf.mxu0 }
 0x10b   : >> { %vm1091_vm4 = vcmp.gt.f32.partialorder %v1088_v10, 0.0  ;;  %v1094_v39 = vmul.f32 0.3, %v1088_v10  ;;  %v1080_v40 = vadd.f32 %v1070_v26, %v984_v35 }
 0x10c   : >> { %v979_v41 = vpop.f32.mrf.mxu1 }
 0x10d   : >> { %v1097_v42 = vsel %vm1091_vm4, %v1088_v10, %v1094_v39  ;;  %v1089_v43 = vadd.f32 %v1521_v9, %v1080_v40  ;;  %v985_v44 = vadd.f32 %v979_v41, %v888_v38 }
 0x10e   : >> { %v1252_v45 = vpack.c.bf16 %v1097_v42, %v1097_v42  ;;  %v1393_v46 = vpop.f32.mrf.mxu1 }
 0x10f   : >> { %vm1092_vm6 = vcmp.gt.f32.partialorder %v1089_v43, 0.0  ;;  %v1095_v47 = vmul.f32 0.3, %v1089_v43  ;;  %v1081_v48 = vadd.f32 %v1075_v34, %v985_v44 }
 0x110   : >> { %1117 = vst.msk [vmem:[%s1115_s20] sm:$0xf] %vm1116_vm5, %v1252_v45 }
 0x111   : >> { %v1098_v49 = vsel %vm1092_vm6, %v1089_v43, %v1095_v47  ;;  %v1090_v50 = vadd.f32 %v1521_v9, %v1081_v48 }
 0x112   : >> { %v1253_v51 = vpack.c.bf16 %v1098_v49, %v1098_v49 }
 0x113   : >> { %vm1093_vm7 = vcmp.gt.f32.partialorder %v1090_v50, 0.0  ;;  %v1096_v52 = vmul.f32 0.3, %v1090_v50 }
 0x114   : >> { %1118 = vst.msk [vmem:[%s1115_s20 + $0x4] sm:$0xf] %vm1116_vm5, %v1253_v51  ;;  %193 = sbr.rel (!%p191_p4) target bundleno = 16 (0x10), region = 81 }
 0x115   : >> { %v1099_v53 = vsel %vm1093_vm7, %v1090_v50, %v1096_v52 }
 0x116   : >> { %v1254_v54 = vpack.c.bf16 %v1099_v53, %v1099_v53 }
 0x118   : >> { %1119 = vst.msk [vmem:[%s1115_s20 + $0x8] sm:$0xf] %vm1116_vm5, %v1254_v54 }
 0x119 PF: > { %s13_s12 = sadd.s32 1, %s1437_s12  }
 0x11a   : > { %p10_p5 = scmp.ge.s32.totalorder %s13_s12, 4  }
 0x11c   :  { %12 = sbr.rel (!%p10_p5) target bundleno = 1 (0x1), region = 92 }

// kernel: self_attn_conv.11
= control target key start
LH: loop header
LB: loop body
LE: loop exit
PB: predicated region body
PF: predicated region fallthrough
CT: control target
= control target key end

     0   :  { %s1493_s12 = smov 0   ;;  %s1721_s0 = inlined_call_operand.vmem [shape: bf16[2,26,26,2], index: 0, kind: input, shape index: {}]   ;;  %s1722_s1 = inlined_call_operand.vmem [shape: f32[3,3,2,2], index: 1, kind: input, shape index: {}]   ;;  %s1723_s2 = inlined_call_operand.vmem [shape: f32[1,2], index: 2, kind: input, shape index: {}]   ;;  %s1724_s3 = inlined_call_operand.vmem [shape: bf16[2,24,24,2], index: 3, kind: output, shape index: {}]  }
   0x1 LB: > { %s1209_s13 = sadd.s32 4294967295, %s1465_s12   ;;  %p1213_p0 = scmp.ge.s32.totalorder %s1465_s12, 1  ;;  %s1465_s12 = sphi %s1493_s12, %s13_s12  }
   0x2   : > { %p137_p1 = scmp.lt.s32.totalorder %s1465_s12, 3 }
   0x4   : > { %p138_p2 = pnand %p1213_p0, %p137_p1 }
   0x5   : > { %p161_p3 = scmp.lt.s32.totalorder (!%p138_p2), %s1209_s13, 1  ;;  %s1561_s17 = smov (!%p138_p2), 0  }
   0x6   : > { %141 = sbr.rel (%p138_p2) target bundleno = 280 (0x118), region = 32 }
   0xb   : > { %v1504_v0 = vld [vmem:[%s1722_s1] sm:$0x3]  ;;  %v1509_v1 = vld [vmem:[%s1722_s1 + $0x2] sm:$0x3]  ;;  %v1514_v2 = vld [vmem:[%s1722_s1 + $0x4] sm:$0x3] }
   0xc   : > { %v1519_v3 = vld [vmem:[%s1722_s1 + $0x6] sm:$0x3]  ;;  %v1524_v4 = vld [vmem:[%s1722_s1 + $0x8] sm:$0x3]  ;;  %s1726_s13 = smov (!%p161_p3, %s1209_s13), 1 }
   0xd   : > { %v1529_v5 = vld [vmem:[%s1722_s1 + $0xa] sm:$0x3]  ;;  %v1534_v6 = vld [vmem:[%s1722_s1 + $0xc] sm:$0x3]  ;;  %v1539_v7 = vld [vmem:[%s1722_s1 + $0xe] sm:$0x3] }
   0xe   : > { %v1544_v8 = vld [vmem:[%s1722_s1 + $0x10] sm:$0x3]  ;;  %v1549_v9 = vld [vmem:[%s1723_s2] ss:$0 sm:$0xff]  ;;  %s1435_s7 = smul.u32 416, %s1726_s13 }
   0xf   : > { %s1436_s8 = smul.u32 288, %s1726_s13 }
  0x10   : > { %s1554_s11 = scalar_lea.vmem %s1721_s0, %s1435_s7 }
  0x11   : > { %s1559_s16 = scalar_lea.vmem %s1724_s3, %s1436_s8 }
  0x12 LB: >> { %vm225_vm0 = vcmask 1041408   ;;  %v1471_v10 = vmov 0.0   ;;  %vm1472_vm1 = vmmov 0   ;;  %s1279_s13 = sshll.u32 %s1469_s17, 4  ;;  %vm210_vm2 = vcmask 1046528   ;;  %s1283_s19 = smul.u32 12, %s1469_s17  ;;  %s1469_s17 = sphi %s1561_s17, %s194_s17  }
  0x13   : >> { %1433 = vmatprep.subr.mxu1 %v1471_v10  ;;  %1339 = vmatprep.mubr.msk.f32.mxu1 %vm1472_vm1, %v1471_v10  ;;  %s1575_s18 = scalar_lea.vmem %s1554_s11, %s1279_s13  ;;  %vm218_vm3 = vcmask 15360   ;;  %vm398_vm4 = vcmask 1045504   ;;  %vm1135_vm5 = vcmask 11264   ;;  %s194_s17 = sadd.s32 1, %s1469_s17  }
  0x14   : >> { %1434 = vmatpush3.msk.msra.mxu1 %vm225_vm0, %v1509_v1  ;;  %1334 = vmatprep.subr.mxu0 %v1471_v10  ;;  %v1285_v11 = vld [vmem:[%s1575_s18] sm:$0xff]   ;;  %v200_v12 = vld [vmem:[%s1575_s18 + $0x8] ss:$16 sps:$4 sm:$0xff]   ;;  %v201_v13 = vld [vmem:[%s1575_s18 + $0xc] sm:$0x1]  ;;  %s1134_s20 = scalar_lea.vmem %s1559_s16, %s1283_s19  ;;  %p191_p4 = scmp.ge.s32.totalorder %s194_s17, 24  }
  0x15   : >> { %1345 = vmatprep.subr.mxu1 %v1471_v10  ;;  %1335 = vmatpush3.msk.msra.mxu0 %vm225_vm0, %v1509_v1  ;;  %v1287_v14 = vunpack.c.h.bf16 %v1285_v11  ;;  %v204_v15 = vunpack.c.l.bf16 %v200_v12  ;;  %v1286_v16 = vunpack.c.l.bf16 %v1285_v11  ;;  %v205_v17 = vunpack.c.l.bf16 %v201_v13  ;;  %v1296_v29 = vld [vmem:[%s1575_s18 + $0x10] sm:$0xff]   ;;  %v1242_v38 = vld [vmem:[%s1575_s18 + $0x1c] sm:$0x1]  ;;  %v1297_v45 = vld [vmem:[%s1575_s18 + $0x20] sm:$0xff]  }
  0x16   : >> { %1336 = vmatprep.mubr.msk.f32.mxu0 %vm1472_vm1, %v1471_v10  ;;  %1356 = vmatprep.subr.mxu0 %v1471_v10  ;;  %v1290_v32 = vunpack.c.l.bf16 %v1296_v29  ;;  %v1291_v33 = vunpack.c.h.bf16 %v1296_v29  ;;  %v508_v37 = vunpack.c.h.bf16 %v200_v12  ;;  %v509_v41 = vunpack.c.l.bf16 %v1242_v38  ;;  %v1258_v52 = vld [vmem:[%s1575_s18 + $0x28] sm:$0xf]  ;;  %v1259_v58 = vld [vmem:[%s1575_s18 + $0x2c] sm:$0x1] }
  0x17   : >> { %v212_v18 = vrot.slane %v1287_v14, 1  ;;  %v214_v19 = vrot.slane %v204_v15, 1  ;;  %v211_v20 = vrot.slane %v1286_v16, 1  ;;  %v216_v21 = vrot.slane %v205_v17, 1 }
  0x18   : >> { %v399_v22 = vrot.slane %v1286_v16, 2  ;;  %v400_v23 = vrot.slane %v1287_v14, 2  ;;  %v402_v28 = vrot.slane %v204_v15, 2  ;;  %v404_v31 = vrot.slane %v205_v17, 2 }
  0x19   : >> { %v215_v24 = vsel %vm210_vm2, %v212_v18, %v214_v19  ;;  %v213_v25 = vsel %vm210_vm2, %v211_v20, %v212_v18  ;;  %v217_v26 = vsel %vm210_vm2, %v214_v19, %v216_v21  ;;  %v606_v35 = vrot.slane %v1290_v32, 1 }
  0x1a   : >> { %1340 = vmatmul.mubr.msk.f32.vlgmr.msra.gmra.mxu1 %vm218_vm3, %v215_v24  ;;  %1337 = vmatmul.mubr.msk.f32.vlgmr.msra.gmra.mxu0 %vm218_vm3, %v213_v25  ;;  %v401_v27 = vsel %vm398_vm4, %v399_v22, %v400_v23  ;;  %v403_v30 = vsel %vm398_vm4, %v400_v23, %v402_v28  ;;  %v405_v34 = vsel %vm398_vm4, %v402_v28, %v404_v31  ;;  %v607_v36 = vrot.slane %v1291_v33, 1 }
  0x1b   : >> { %1346 = vmatpush3.msk.msra.mxu1 %vm225_vm0, %v1504_v0  ;;  %1342 = vmatprep.mubr.msk.f32.mxu1 %vm1472_vm1, %v1471_v10  ;;  %v609_v40 = vrot.slane %v508_v37, 1  ;;  %v611_v43 = vrot.slane %v509_v41, 1  ;;  %v1294_v46 = vunpack.c.l.bf16 %v1297_v45  ;;  %v705_v47 = vrot.slane %v1290_v32, 2 }
  0x1c   : >> { %1357 = vmatpush3.msk.msra.mxu0 %vm225_vm0, %v1514_v2  ;;  %1358 = vmatprep.mubr.msk.f32.mxu0 %vm1472_vm1, %v1471_v10  ;;  %v608_v39 = vsel %vm210_vm2, %v606_v35, %v607_v36  ;;  %v706_v48 = vrot.slane %v1291_v33, 2  ;;  %v1295_v49 = vunpack.c.h.bf16 %v1297_v45  ;;  %v708_v51 = vrot.slane %v508_v37, 2 }
  0x1d   : >> { %1367 = vmatprep.subr.mxu1 %v1471_v10  ;;  %1378 = vmatprep.subr.mxu0 %v1471_v10  ;;  %v610_v42 = vsel %vm210_vm2, %v607_v36, %v609_v40  ;;  %v612_v44 = vsel %vm210_vm2, %v609_v40, %v611_v43  ;;  %v710_v53 = vrot.slane %v509_v41, 2  ;;  %v814_v54 = vunpack.c.l.bf16 %v1258_v52 }
  0x1e   : >> { %1343 = vmatmul.mubr.msk.f32.gmra.mxu1 %vm218_vm3, %v217_v26  ;;  %1359 = vmatmul.mubr.msk.f32.vlgmr.msra.gmra.mxu0 %vm218_vm3, %v401_v27  ;;  %v707_v50 = vsel %vm398_vm4, %v705_v47, %v706_v48  ;;  %v709_v55 = vsel %vm398_vm4, %v706_v48, %v708_v51  ;;  %v1012_v56 = vrot.slane %v1295_v49, 2  ;;  %v1011_v57 = vrot.slane %v1294_v46, 2 }
  0x1f   : >> { %1347 = vmatprep.mubr.msk.f32.mxu1 %vm1472_vm1, %v1471_v10  ;;  %1379 = vmatpush3.msk.msra.mxu0 %vm225_vm0, %v1524_v4  ;;  %v913_v59 = vrot.slane %v1295_v49, 1  ;;  %v711_v60 = vsel %vm398_vm4, %v708_v51, %v710_v53  ;;  %v912_v61 = vrot.slane %v1294_v46, 1  ;;  %v1014_v63 = vrot.slane %v814_v54, 2 }
  0x20   : >> { %1361 = vmatprep.mubr.msk.f32.mxu0 %vm1472_vm1, %v1471_v10  ;;  %1400 = vmatprep.subr.mxu0 %v1471_v10  ;;  %v1013_v62 = vsel %vm398_vm4, %v1011_v57, %v1012_v56  ;;  %v815_v11 = vunpack.c.l.bf16 %v1259_v58  ;;  %v915_v13 = vrot.slane %v814_v54, 1 }
  0x21   : >> { %v914_v12 = vsel %vm210_vm2, %v912_v61, %v913_v59 }
  0x22   : >> { %1348 = vmatmul.mubr.msk.f32.vlgmr.msra.gmra.mxu1 %vm218_vm3, %v1286_v16  ;;  %1362 = vmatmul.mubr.msk.f32.gmra.mxu0 %vm218_vm3, %v403_v30  ;;  %v916_v16 = vsel %vm210_vm2, %v913_v59, %v915_v13  ;;  %v917_v17 = vrot.slane %v815_v11, 1 }
  0x23   : >> { %1368 = vmatpush3.msk.msra.mxu1 %vm225_vm0, %v1519_v3  ;;  %1350 = vmatprep.mubr.msk.f32.mxu1 %vm1472_vm1, %v1471_v10 }
  0x24   : >> { %1364 = vmatprep.mubr.msk.f32.mxu0 %vm1472_vm1, %v1471_v10  ;;  %1389 = vmatprep.subr.mxu1 %v1471_v10  ;;  %v918_v19 = vsel %vm210_vm2, %v915_v13, %v917_v17 }
  0x26   : >> { %1351 = vmatmul.mubr.msk.f32.gmra.mxu1 %vm218_vm3, %v1287_v14  ;;  %1365 = vmatmul.mubr.msk.f32.gmra.mxu0 %vm218_vm3, %v405_v34  ;;  %v1015_v14 = vsel %vm398_vm4, %v1012_v56, %v1014_v63 }
  0x27   : >> { %1353 = vmatprep.mubr.msk.f32.mxu1 %vm1472_vm1, %v1471_v10  ;;  %1380 = vmatprep.mubr.msk.f32.mxu0 %vm1472_vm1, %v1471_v10 }
  0x2a   : >> { %1354 = vmatmul.mubr.msk.f32.gmra.mxu1 %vm218_vm3, %v204_v15  ;;  %1381 = vmatmul.mubr.msk.f32.vlgmr.msra.gmra.mxu0 %vm218_vm3, %v608_v39  ;;  %v1016_v15 = vrot.slane %v815_v11, 2 }
  0x2b   : >> { %1369 = vmatprep.mubr.msk.f32.mxu1 %vm1472_vm1, %v1471_v10  ;;  %1401 = vmatpush3.msk.msra.mxu0 %vm225_vm0, %v1534_v6 }
  0x2c   : >> { %1383 = vmatprep.mubr.msk.f32.mxu0 %vm1472_vm1, %v1471_v10  ;;  %1422 = vmatprep.subr.mxu0 %v1471_v10  ;;  %v1017_v18 = vsel %vm398_vm4, %v1014_v63, %v1016_v15 }
  0x2e   : >> { %1370 = vmatmul.mubr.msk.f32.vlgmr.msra.gmra.mxu1 %vm218_vm3, %v1290_v32  ;;  %1384 = vmatmul.mubr.msk.f32.gmra.mxu0 %vm218_vm3, %v610_v42 }
  0x2f   : >> { %1390 = vmatpush3.msk.msra.mxu1 %vm225_vm0, %v1529_v5  ;;  %1372 = vmatprep.mubr.msk.f32.mxu1 %vm1472_vm1, %v1471_v10 }
  0x30   : >> { %1386 = vmatprep.mubr.msk.f32.mxu0 %vm1472_vm1, %v1471_v10  ;;  %1411 = vmatprep.subr.mxu1 %v1471_v10 }
  0x32   : >> { %1373 = vmatmul.mubr.msk.f32.gmra.mxu1 %vm218_vm3, %v1291_v33  ;;  %1387 = vmatmul.mubr.msk.f32.gmra.mxu0 %vm218_vm3, %v612_v44 }
  0x33   : >> { %1375 = vmatprep.mubr.msk.f32.mxu1 %vm1472_vm1, %v1471_v10  ;;  %1402 = vmatprep.mubr.msk.f32.mxu0 %vm1472_vm1, %v1471_v10 }
  0x36   : >> { %1376 = vmatmul.mubr.msk.f32.gmra.mxu1 %vm218_vm3, %v508_v37  ;;  %1403 = vmatmul.mubr.msk.f32.vlgmr.msra.gmra.mxu0 %vm218_vm3, %v1294_v46 }
  0x37   : >> { %1391 = vmatprep.mubr.msk.f32.mxu1 %vm1472_vm1, %v1471_v10  ;;  %1423 = vmatpush3.msk.msra.mxu0 %vm225_vm0, %v1544_v8 }
  0x38   : >> { %1405 = vmatprep.mubr.msk.f32.mxu0 %vm1472_vm1, %v1471_v10 }
  0x3a   : >> { %1392 = vmatmul.mubr.msk.f32.vlgmr.msra.gmra.mxu1 %vm218_vm3, %v707_v50  ;;  %1406 = vmatmul.mubr.msk.f32.gmra.mxu0 %vm218_vm3, %v1295_v49 }
  0x3b   : >> { %1412 = vmatpush3.msk.msra.mxu1 %vm225_vm0, %v1539_v7  ;;  %1394 = vmatprep.mubr.msk.f32.mxu1 %vm1472_vm1, %v1471_v10 }
  0x3c   : >> { %1408 = vmatprep.mubr.msk.f32.mxu0 %vm1472_vm1, %v1471_v10 }
  0x3e   : >> { %1395 = vmatmul.mubr.msk.f32.gmra.mxu1 %vm218_vm3, %v709_v55  ;;  %1409 = vmatmul.mubr.msk.f32.gmra.mxu0 %vm218_vm3, %v814_v54 }
  0x3f   : >> { %1397 = vmatprep.mubr.msk.f32.mxu1 %vm1472_vm1, %v1471_v10  ;;  %1424 = vmatprep.mubr.msk.f32.mxu0 %vm1472_vm1, %v1471_v10 }
  0x42   : >> { %1398 = vmatmul.mubr.msk.f32.gmra.mxu1 %vm218_vm3, %v711_v60  ;;  %1425 = vmatmul.mubr.msk.f32.vlgmr.msra.gmra.mxu0 %vm218_vm3, %v1013_v62 }
  0x43   : >> { %1413 = vmatprep.mubr.msk.f32.mxu1 %vm1472_vm1, %v1471_v10  ;;  %1427 = vmatprep.mubr.msk.f32.mxu0 %vm1472_vm1, %v1471_v10 }
  0x46   : >> { %1414 = vmatmul.mubr.msk.f32.vlgmr.msra.gmra.mxu1 %vm218_vm3, %v914_v12  ;;  %1428 = vmatmul.mubr.msk.f32.gmra.mxu0 %vm218_vm3, %v1015_v14 }
  0x47   : >> { %1416 = vmatprep.mubr.msk.f32.mxu1 %vm1472_vm1, %v1471_v10  ;;  %1430 = vmatprep.mubr.msk.f32.mxu0 %vm1472_vm1, %v1471_v10 }
  0x4a   : >> { %1417 = vmatmul.mubr.msk.f32.gmra.mxu1 %vm218_vm3, %v916_v16  ;;  %1431 = vmatmul.mubr.msk.f32.gmra.mxu0 %vm218_vm3, %v1017_v18 }
  0x4b   : >> { %1419 = vmatprep.mubr.msk.f32.mxu1 %vm1472_vm1, %v1471_v10 }
  0x4e   : >> { %1420 = vmatmul.mubr.msk.f32.gmra.mxu1 %vm218_vm3, %v918_v19 }
  0xda   : >> { %v300_v20 = vpop.f32.mrf.mxu1  ;;  %v295_v21 = vpop.f32.mrf.mxu0 }
  0xdc   : >> { %v1341_v22 = vpop.f32.mrf.mxu1  ;;  %v1338_v23 = vpop.f32.mrf.mxu0 }
  0xde   : >> { %v305_v24 = vpop.f32.mrf.mxu1  ;;  %v481_v25 = vpop.f32.mrf.mxu0 }
  0xe0   : >> { %v1344_v26 = vpop.f32.mrf.mxu1  ;;  %v1360_v27 = vpop.f32.mrf.mxu0 }
  0xe2   : >> { %v384_v28 = vpop.f32.mrf.mxu1  ;;  %v486_v29 = vpop.f32.mrf.mxu0 }
  0xe3   : >> { %v385_v47 = vadd.f32 %v384_v28, %v295_v21 }
  0xe4   : >> { %v1349_v30 = vpop.f32.mrf.mxu1  ;;  %v1363_v31 = vpop.f32.mrf.mxu0 }
  0xe5   : >> { %v495_v52 = vadd.f32 %v481_v25, %v385_v47 }
  0xe6   : >> { %v389_v32 = vpop.f32.mrf.mxu1  ;;  %v491_v33 = vpop.f32.mrf.mxu0 }
  0xe7   : >> { %v390_v53 = vadd.f32 %v389_v32, %v300_v20 }
  0xe8   : >> { %v1352_v34 = vpop.f32.mrf.mxu1  ;;  %v1366_v10 = vpop.f32.mrf.mxu0 }
  0xe9   : >> { %v496_v59 = vadd.f32 %v486_v29, %v390_v53 }
  0xea   : >> { %v394_v35 = vpop.f32.mrf.mxu1  ;;  %v688_v36 = vpop.f32.mrf.mxu0 }
  0xeb   : >> { %v395_v60 = vadd.f32 %v394_v35, %v305_v24 }
  0xec   : >> { %v1355_v37 = vpop.f32.mrf.mxu1  ;;  %v1382_v38 = vpop.f32.mrf.mxu0 }
  0xed   : >> { %v497_v14 = vadd.f32 %v491_v33, %v395_v60 }
  0xee   : >> { %v588_v39 = vpop.f32.mrf.mxu1  ;;  %v693_v40 = vpop.f32.mrf.mxu0 }
  0xef   : >> { %v602_v56 = vadd.f32 %v588_v39, %v495_v52 }
  0xf0   : >> { %v1371_v41 = vpop.f32.mrf.mxu1  ;;  %v1385_v42 = vpop.f32.mrf.mxu0 }
  0xf1   : >> { %v702_v63 = vadd.f32 %v688_v36, %v602_v56 }
  0xf2   : >> { %v593_v43 = vpop.f32.mrf.mxu1  ;;  %v698_v44 = vpop.f32.mrf.mxu0 }
  0xf3   : >> { %v603_v11 = vadd.f32 %v593_v43, %v496_v59 }
  0xf4   : >> { %v1374_v45 = vpop.f32.mrf.mxu1  ;;  %v1388_v46 = vpop.f32.mrf.mxu0 }
  0xf5   : >> { %v703_v18 = vadd.f32 %v693_v40, %v603_v11 }
  0xf6   : >> { %v598_v48 = vpop.f32.mrf.mxu1  ;;  %v894_v49 = vpop.f32.mrf.mxu0 }
  0xf7   : >> { %v604_v19 = vadd.f32 %v598_v48, %v497_v14 }
  0xf8   : >> { %v1377_v50 = vpop.f32.mrf.mxu1  ;;  %v1404_v51 = vpop.f32.mrf.mxu0 }
  0xf9   : >> { %v704_v26 = vadd.f32 %v698_v44, %v604_v19 }
  0xfa   : >> { %v787_v54 = vpop.f32.mrf.mxu1  ;;  %v899_v55 = vpop.f32.mrf.mxu0 }
  0xfb   : >> { %v801_v15 = vadd.f32 %v787_v54, %v702_v63 }
  0xfc   : >> { %v1393_v57 = vpop.f32.mrf.mxu1  ;;  %v1407_v58 = vpop.f32.mrf.mxu0 }
  0xfd   : >> { %v908_v22 = vadd.f32 %v894_v49, %v801_v15 }
  0xfe   : >> { %v792_v61 = vpop.f32.mrf.mxu1  ;;  %v904_v62 = vpop.f32.mrf.mxu0 }
  0xff   : >> { %v802_v23 = vadd.f32 %v792_v61, %v703_v18 }
 0x100   : >> { %v1396_v12 = vpop.f32.mrf.mxu1  ;;  %v1410_v13 = vpop.f32.mrf.mxu0 }
 0x101   : >> { %v909_v30 = vadd.f32 %v899_v55, %v802_v23 }
 0x102   : >> { %v797_v16 = vpop.f32.mrf.mxu1  ;;  %v1093_v17 = vpop.f32.mrf.mxu0 }
 0x103   : >> { %v803_v31 = vadd.f32 %v797_v16, %v704_v26 }
 0x104   : >> { %v1399_v20 = vpop.f32.mrf.mxu1  ;;  %v1426_v21 = vpop.f32.mrf.mxu0 }
 0x105   : >> { %v910_v38 = vadd.f32 %v904_v62, %v803_v31 }
 0x106   : >> { %v994_v25 = vpop.f32.mrf.mxu1  ;;  %v1098_v24 = vpop.f32.mrf.mxu0 }
 0x107   : >> { %v1008_v27 = vadd.f32 %v994_v25, %v908_v22 }
 0x108   : >> { %v1415_v28 = vpop.f32.mrf.mxu1  ;;  %v1429_v29 = vpop.f32.mrf.mxu0 }
 0x109   : >> { %v1107_v32 = vadd.f32 %v1093_v17, %v1008_v27 }
 0x10a   : >> { %v999_v33 = vpop.f32.mrf.mxu1  ;;  %v1103_v34 = vpop.f32.mrf.mxu0 }
 0x10b   : >> { %v1116_v10 = vadd.f32 %v1549_v9, %v1107_v32  ;;  %v1009_v35 = vadd.f32 %v999_v33, %v909_v30 }
 0x10c   : >> { %v1418_v36 = vpop.f32.mrf.mxu1  ;;  %v1432_v37 = vpop.f32.mrf.mxu0 }
 0x10d   : >> { %v1280_v39 = vpack.c.bf16 %v1116_v10, %v1116_v10  ;;  %v1108_v40 = vadd.f32 %v1098_v24, %v1009_v35 }
 0x10e   : >> { %v1004_v41 = vpop.f32.mrf.mxu1 }
 0x10f   : >> { %1136 = vst.msk [vmem:[%s1134_s20] sm:$0xf] %vm1135_vm5, %v1280_v39  ;;  %v1117_v42 = vadd.f32 %v1549_v9, %v1108_v40  ;;  %v1010_v43 = vadd.f32 %v1004_v41, %v910_v38 }
 0x110   : >> { %v1421_v44 = vpop.f32.mrf.mxu1 }
 0x111   : >> { %v1281_v45 = vpack.c.bf16 %v1117_v42, %v1117_v42  ;;  %v1109_v46 = vadd.f32 %v1103_v34, %v1010_v43 }
 0x113   : >> { %1137 = vst.msk [vmem:[%s1134_s20 + $0x4] sm:$0xf] %vm1135_vm5, %v1281_v45  ;;  %v1118_v47 = vadd.f32 %v1549_v9, %v1109_v46  ;;  %193 = sbr.rel (!%p191_p4) target bundleno = 18 (0x12), region = 81 }
 0x115   : >> { %v1282_v48 = vpack.c.bf16 %v1118_v47, %v1118_v47 }
 0x117   : >> { %1138 = vst.msk [vmem:[%s1134_s20 + $0x8] sm:$0xf] %vm1135_vm5, %v1282_v48 }
 0x118 PF: > { %s13_s12 = sadd.s32 1, %s1465_s12  }
 0x119   : > { %p10_p5 = scmp.ge.s32.totalorder %s13_s12, 4  }
 0x11b   :  { %12 = sbr.rel (!%p10_p5) target bundleno = 1 (0x1), region = 92 }

// kernel: self_attn_conv.17
= control target key start
LH: loop header
LB: loop body
LE: loop exit
PB: predicated region body
PF: predicated region fallthrough
CT: control target
= control target key end

     0   :  { %s1817_s18 = smov 0   ;;  %s2021_s0 = inlined_call_operand.vmem [shape: bf16[2,576,2], index: 0, kind: input, shape index: {}]   ;;  %s2022_s1 = inlined_call_operand.vmem [shape: bf16[2,9,2], index: 1, kind: input, shape index: {}]   ;;  %s2023_s2 = inlined_call_operand.vmem [shape: bf16[2,8,9], index: 2, kind: input, shape index: {}]   ;;  %s2024_s3 = inlined_call_operand.vmem [shape: f32[8,8], index: 3, kind: input, shape index: {}]   ;;  %s2025_s4 = inlined_call_operand.vmem [shape: f32[8,1], index: 4, kind: input, shape index: {}]   ;;  %s2026_s5 = inlined_call_operand.vmem [shape: f32[2,8,576], index: 5, kind: output, shape index: {}]  }
   0x1 LB: > { %s1341_s19 = sadd.s32 4294967295, %s1782_s18   ;;  %p1345_p0 = scmp.ge.s32.totalorder %s1782_s18, 1  ;;  %s1782_s18 = sphi %s1817_s18, %s15_s18  }
   0x2   : > { %p206_p1 = scmp.lt.s32.totalorder %s1782_s18, 3 }
   0x4   : > { %p207_p2 = pnand %p1345_p0, %p206_p1 }
   0x5   : > { %p243_p3 = scmp.lt.s32.totalorder (!%p207_p2), %s1341_s19, 1 }
   0x6   : > { %210 = sbr.rel (%p207_p2) target bundleno = 843 (0x34b), region = 40 }
   0xb   : > { %s2028_s19 = smov (!%p243_p3, %s1341_s19), 1  ;;  %vm412_vm0 = vcmask 15360   ;;  %vm1785_vm1 = vmmov 0   ;;  %vm946_vm2 = vcmask 64512   ;;  %vm872_vm3 = vcmask 1040384  }
   0xc   : > { %s1738_s20 = smul.u32 288, %s2028_s19  ;;  %s1440_s21 = sshll.u32 %s2028_s19, 3  ;;  %vm879_vm4 = vcmask 516096   ;;  %vm866_vm5 = vcmask 523264   ;;  %vm1026_vm6 = vcmask 72704  }
   0xd   : > { %s1832_s24 = scalar_lea.vmem %s2022_s1, %s1440_s21  ;;  %s1349_s28 = sshll.u32 %s2028_s19, 2 }
   0xe   : > { %s1837_s27 = scalar_lea.vmem %s2021_s0, %s1738_s20  ;;  %v406_v0 = vld [vmem:[%s1832_s24] sm:$0xf]  ;;  %s256_s6 = scalar_lea.vmem %s2023_s2, %s1349_s28 }
   0xf   : > { %v1599_v1 = vld [vmem:[%s1837_s27 + $0x78] sm:$0xff]   ;;  %v1843_v4 = vunpack.c.l.bf16 %v406_v0  ;;  %v1598_v12 = vld [vmem:[%s1837_s27 + $0x70] sm:$0xff]   ;;  %v1597_v24 = vld [vmem:[%s1837_s27 + $0x68] sm:$0xff]   ;;  %s1739_s11 = smul.u32 40, %s2028_s19 }
  0x10   : > { %v1615_v2 = vld [vmem:[%s1837_s27 + $0xf8] sm:$0xff]   ;;  %v1503_v5 = vunpack.c.l.bf16 %v1599_v1  ;;  %v1504_v6 = vunpack.c.h.bf16 %v1599_v1  ;;  %v1614_v13 = vld [vmem:[%s1837_s27 + $0xf0] sm:$0xff]   ;;  %v1500_v16 = vunpack.c.h.bf16 %v1598_v12  ;;  %v1499_v22 = vunpack.c.l.bf16 %v1598_v12  ;;  %v1613_v25 = vld [vmem:[%s1837_s27 + $0xe8] sm:$0xff]  }
  0x11   : > { %v1591_v3 = vld [vmem:[%s1837_s27 + $0x38] sm:$0xff]   ;;  %v1567_v7 = vunpack.c.l.bf16 %v1615_v2  ;;  %v1568_v8 = vunpack.c.h.bf16 %v1615_v2  ;;  %1652 = vmatprep.mubr.msk.f32.mxu0 %vm412_vm0, %v1843_v4  ;;  %1688 = vmatprep.mubr.msk.f32.mxu1 %vm412_vm0, %v1843_v4  ;;  %v1564_v17 = vunpack.c.h.bf16 %v1614_v13  ;;  %v1590_v18 = vld [vmem:[%s1837_s27 + $0x30] sm:$0xff]   ;;  %v1563_v23 = vunpack.c.l.bf16 %v1614_v13  ;;  %v1589_v30 = vld [vmem:[%s1837_s27 + $0x28] sm:$0xff]   ;;  %s261_s14 = scalar_lea.vmem %s2026_s5, %s1739_s11 }
  0x12   : > { %v1607_v9 = vld [vmem:[%s1837_s27 + $0xb8] sm:$0xff]   ;;  %v1472_v10 = vunpack.c.h.bf16 %v1591_v3  ;;  %1620 = vmatprep.subr.msk.mxu0 %vm412_vm0, %v1504_v6  ;;  %v1471_v14 = vunpack.c.l.bf16 %v1591_v3  ;;  %v1606_v19 = vld [vmem:[%s1837_s27 + $0xb0] sm:$0xff]   ;;  %v1468_v20 = vunpack.c.h.bf16 %v1590_v18  ;;  %v1467_v26 = vunpack.c.l.bf16 %v1590_v18  ;;  %v1605_v31 = vld [vmem:[%s1837_s27 + $0xa8] sm:$0xff]  }
  0x13   : > { %v1536_v11 = vunpack.c.h.bf16 %v1607_v9  ;;  %1656 = vmatprep.subr.msk.mxu1 %vm412_vm0, %v1568_v8  ;;  %v1535_v15 = vunpack.c.l.bf16 %v1607_v9  ;;  %v1532_v21 = vunpack.c.h.bf16 %v1606_v19  ;;  %v1531_v27 = vunpack.c.l.bf16 %v1606_v19  ;;  %v1596_v36 = vld [vmem:[%s1837_s27 + $0x60] sm:$0xff]   ;;  %v1595_v48 = vld [vmem:[%s1837_s27 + $0x58] sm:$0xff]   ;;  %v1594_v60 = vld [vmem:[%s1837_s27 + $0x50] sm:$0xff]  }
  0x14   : > { %1621 = vmatpush3.xpose.msk.msra.mxu0 %vm412_vm0, %v1472_v10  ;;  %v1496_v28 = vunpack.c.h.bf16 %v1597_v24  ;;  %v1560_v29 = vunpack.c.h.bf16 %v1613_v25  ;;  %v1464_v32 = vunpack.c.h.bf16 %v1589_v30  ;;  %v1528_v33 = vunpack.c.h.bf16 %v1605_v31  ;;  %v1612_v37 = vld [vmem:[%s1837_s27 + $0xe0] sm:$0xff]   ;;  %v1611_v49 = vld [vmem:[%s1837_s27 + $0xd8] sm:$0xff]   ;;  %v1610_v61 = vld [vmem:[%s1837_s27 + $0xd0] sm:$0xff]  }
  0x15   : > { %1657 = vmatpush3.xpose.msk.msra.mxu1 %vm412_vm0, %v1536_v11  ;;  %1622 = vmatprep.subr.msk.mxu0 %vm412_vm0, %v1503_v5  ;;  %v1495_v34 = vunpack.c.l.bf16 %v1597_v24  ;;  %v1559_v35 = vunpack.c.l.bf16 %v1613_v25  ;;  %v1463_v38 = vunpack.c.l.bf16 %v1589_v30  ;;  %v1527_v39 = vunpack.c.l.bf16 %v1605_v31  ;;  %v1588_v42 = vld [vmem:[%s1837_s27 + $0x20] sm:$0xff]   ;;  %v1587_v54 = vld [vmem:[%s1837_s27 + $0x18] sm:$0xff]   ;;  %v1586_v2 = vld [vmem:[%s1837_s27 + $0x10] sm:$0xff]  }
  0x16   : > { %1658 = vmatprep.subr.msk.mxu1 %vm412_vm0, %v1567_v7  ;;  %v1492_v40 = vunpack.c.h.bf16 %v1596_v36  ;;  %v1556_v41 = vunpack.c.h.bf16 %v1612_v37  ;;  %v1604_v43 = vld [vmem:[%s1837_s27 + $0xa0] sm:$0xff]   ;;  %v1460_v44 = vunpack.c.h.bf16 %v1588_v42  ;;  %v1491_v46 = vunpack.c.l.bf16 %v1596_v36  ;;  %v1603_v55 = vld [vmem:[%s1837_s27 + $0x98] sm:$0xff]   ;;  %v1602_v3 = vld [vmem:[%s1837_s27 + $0x90] sm:$0xff]  }
  0x17   : > { %v1524_v45 = vunpack.c.h.bf16 %v1604_v43  ;;  %v1555_v47 = vunpack.c.l.bf16 %v1612_v37  ;;  %v1459_v50 = vunpack.c.l.bf16 %v1588_v42  ;;  %v1523_v51 = vunpack.c.l.bf16 %v1604_v43  ;;  %v1593_v9 = vld [vmem:[%s1837_s27 + $0x48] sm:$0xff]   ;;  %v407_v37 = vld [vmem:[%s1832_s24 + $0x4] sm:$0x1] }
  0x18   : > { %1623 = vmatpush3.xpose.msk.msra.mxu0 %vm412_vm0, %v1471_v14  ;;  %v1488_v52 = vunpack.c.h.bf16 %v1595_v48  ;;  %v1552_v53 = vunpack.c.h.bf16 %v1611_v49  ;;  %v1456_v56 = vunpack.c.h.bf16 %v1587_v54  ;;  %v1520_v57 = vunpack.c.h.bf16 %v1603_v55  ;;  %v1609_v10 = vld [vmem:[%s1837_s27 + $0xc8] sm:$0xff]  }
  0x19   : > { %1659 = vmatpush3.xpose.msk.msra.mxu1 %vm412_vm0, %v1535_v15  ;;  %1624 = vmatprep.subr.msk.mxu0 %vm412_vm0, %v1500_v16  ;;  %v1487_v58 = vunpack.c.l.bf16 %v1595_v48  ;;  %v1551_v59 = vunpack.c.l.bf16 %v1611_v49  ;;  %v1455_v62 = vunpack.c.l.bf16 %v1587_v54  ;;  %v1519_v63 = vunpack.c.l.bf16 %v1603_v55  ;;  %v1585_v15 = vld [vmem:[%s1837_s27 + $0x8] sm:$0xff]   ;;  %v410_v49 = vld [vmem:[%s256_s6] sm:$0xf] }
  0x1a   : > { %1660 = vmatprep.subr.msk.mxu1 %vm412_vm0, %v1564_v17  ;;  %v1484_v0 = vunpack.c.h.bf16 %v1594_v60  ;;  %v1548_v1 = vunpack.c.h.bf16 %v1610_v61  ;;  %v1452_v5 = vunpack.c.h.bf16 %v1586_v2  ;;  %v1516_v6 = vunpack.c.h.bf16 %v1602_v3  ;;  %v1601_v16 = vld [vmem:[%s1837_s27 + $0x88] sm:$0xff]  }
  0x1b   : > { %v1483_v7 = vunpack.c.l.bf16 %v1594_v60  ;;  %v1547_v8 = vunpack.c.l.bf16 %v1610_v61  ;;  %v1451_v11 = vunpack.c.l.bf16 %v1586_v2  ;;  %v1515_v12 = vunpack.c.l.bf16 %v1602_v3  ;;  %v1617_v43 = vld [vmem:[%s1837_s27 + $0x108] sm:$0xff]  }
  0x1c   : > { %1625 = vmatpush3.xpose.msk.msra.mxu0 %vm412_vm0, %v1468_v20  ;;  %v1480_v13 = vunpack.c.h.bf16 %v1593_v9  ;;  %v1544_v14 = vunpack.c.h.bf16 %v1609_v10  ;;  %v1448_v17 = vunpack.c.h.bf16 %v1585_v15  ;;  %v1512_v18 = vunpack.c.h.bf16 %v1601_v16 }
  0x1d   : > { %1661 = vmatpush3.xpose.msk.msra.mxu1 %vm412_vm0, %v1532_v21  ;;  %1626 = vmatprep.subr.msk.mxu0 %vm412_vm0, %v1499_v22  ;;  %v1479_v19 = vunpack.c.l.bf16 %v1593_v9  ;;  %v1543_v20 = vunpack.c.l.bf16 %v1609_v10  ;;  %v1592_v21 = vld [vmem:[%s1837_s27 + $0x40] sm:$0xff]   ;;  %v1511_v24 = vunpack.c.l.bf16 %v1601_v16  ;;  %v1784_v48 = vmov 0.0  }
  0x1e   : > { %1662 = vmatprep.subr.msk.mxu1 %vm412_vm0, %v1563_v23  ;;  %v1608_v22 = vld [vmem:[%s1837_s27 + $0xc0] sm:$0xff]   ;;  %v1447_v23 = vunpack.c.l.bf16 %v1585_v15  ;;  %v1476_v25 = vunpack.c.h.bf16 %v1592_v21  ;;  %v1475_v31 = vunpack.c.l.bf16 %v1592_v21 }
  0x20   : > { %1627 = vmatpush3.xpose.msk.msra.mxu0 %vm412_vm0, %v1467_v26  ;;  %v1540_v26 = vunpack.c.h.bf16 %v1608_v22 }
  0x21   : > { %1663 = vmatpush3.xpose.msk.msra.mxu1 %vm412_vm0, %v1531_v27  ;;  %1628 = vmatprep.subr.msk.mxu0 %vm412_vm0, %v1496_v28  ;;  %v1442_v27 = vld [vmem:[%s1837_s27] sm:$0xff]  }
  0x22   : > { %1664 = vmatprep.subr.msk.mxu1 %vm412_vm0, %v1560_v29  ;;  %v1600_v28 = vld [vmem:[%s1837_s27 + $0x80] sm:$0xff]   ;;  %v1444_v29 = vunpack.c.h.bf16 %v1442_v27 }
  0x23   : > { %v1508_v30 = vunpack.c.h.bf16 %v1600_v28 }
  0x24   : > { %1629 = vmatpush3.xpose.msk.msra.mxu0 %vm412_vm0, %v1464_v32  ;;  %v1539_v32 = vunpack.c.l.bf16 %v1608_v22 }
  0x25   : > { %1665 = vmatpush3.xpose.msk.msra.mxu1 %vm412_vm0, %v1528_v33  ;;  %1630 = vmatprep.subr.msk.mxu0 %vm412_vm0, %v1495_v34  ;;  %v1619_v33 = vld [vmem:[%s1837_s27 + $0x118] sm:$0xff]   ;;  %v1443_v34 = vunpack.c.l.bf16 %v1442_v27 }
  0x26   : > { %1666 = vmatprep.subr.msk.mxu1 %vm412_vm0, %v1559_v35  ;;  %v1507_v35 = vunpack.c.l.bf16 %v1600_v28  ;;  %v1584_v36 = vunpack.c.h.bf16 %v1619_v33 }
  0x28   : > { %1631 = vmatpush3.xpose.msk.msra.mxu0 %vm412_vm0, %v1463_v38  ;;  %v409_v38 = vunpack.c.l.bf16 %v407_v37 }
  0x29   : > { %1667 = vmatpush3.xpose.msk.msra.mxu1 %vm412_vm0, %v1527_v39  ;;  %1632 = vmatprep.subr.msk.mxu0 %vm412_vm0, %v1492_v40  ;;  %v1583_v39 = vunpack.c.l.bf16 %v1619_v33  ;;  %v1618_v40 = vld [vmem:[%s1837_s27 + $0x110] sm:$0xff]  }
  0x2a   : > { %1668 = vmatprep.subr.msk.mxu1 %vm412_vm0, %v1556_v41  ;;  %v1580_v41 = vunpack.c.h.bf16 %v1618_v40  ;;  %v1579_v42 = vunpack.c.l.bf16 %v1618_v40 }
  0x2c   : > { %1633 = vmatpush3.xpose.msk.msra.mxu0 %vm412_vm0, %v1460_v44  ;;  %v1576_v44 = vunpack.c.h.bf16 %v1617_v43 }
  0x2d   : > { %1669 = vmatpush3.xpose.msk.msra.mxu1 %vm412_vm0, %v1524_v45  ;;  %1634 = vmatprep.subr.msk.mxu0 %vm412_vm0, %v1491_v46  ;;  %v1575_v45 = vunpack.c.l.bf16 %v1617_v43  ;;  %v1616_v46 = vld [vmem:[%s1837_s27 + $0x100] sm:$0xff]  }
  0x2e   : > { %1670 = vmatprep.subr.msk.mxu1 %vm412_vm0, %v1555_v47  ;;  %v1571_v47 = vunpack.c.l.bf16 %v1616_v46 }
  0x30   : > { %1635 = vmatpush3.xpose.msk.msra.mxu0 %vm412_vm0, %v1459_v50  ;;  %v411_v50 = vunpack.c.l.bf16 %v410_v49 }
  0x31   : > { %1671 = vmatpush3.xpose.msk.msra.mxu1 %vm412_vm0, %v1523_v51  ;;  %1636 = vmatprep.subr.msk.mxu0 %vm412_vm0, %v1488_v52  ;;  %v945_v51 = vld [vmem:[%s2024_s3] sm:$0xff] }
  0x32   : > { %1672 = vmatprep.subr.msk.mxu1 %vm412_vm0, %v1552_v53 }
  0x34   : > { %1637 = vmatpush3.xpose.msk.msra.mxu0 %vm412_vm0, %v1456_v56 }
  0x35   : > { %1673 = vmatpush3.xpose.msk.msra.mxu1 %vm412_vm0, %v1520_v57  ;;  %1638 = vmatprep.subr.msk.mxu0 %vm412_vm0, %v1487_v58 }
  0x36   : > { %1674 = vmatprep.subr.msk.mxu1 %vm412_vm0, %v1551_v59 }
  0x38   : > { %1639 = vmatpush3.xpose.msk.msra.mxu0 %vm412_vm0, %v1455_v62 }
  0x39   : > { %1675 = vmatpush3.xpose.msk.msra.mxu1 %vm412_vm0, %v1519_v63  ;;  %1640 = vmatprep.subr.msk.mxu0 %vm412_vm0, %v1484_v0 }
  0x3a   : > { %1676 = vmatprep.subr.msk.mxu1 %vm412_vm0, %v1548_v1 }
  0x3c   : > { %1641 = vmatpush3.xpose.msk.msra.mxu0 %vm412_vm0, %v1452_v5 }
  0x3d   : > { %1677 = vmatpush3.xpose.msk.msra.mxu1 %vm412_vm0, %v1516_v6  ;;  %1642 = vmatprep.subr.msk.mxu0 %vm412_vm0, %v1483_v7 }
  0x3e   : > { %1678 = vmatprep.subr.msk.mxu1 %vm412_vm0, %v1547_v8 }
  0x40   : > { %1643 = vmatpush3.xpose.msk.msra.mxu0 %vm412_vm0, %v1451_v11 }
  0x41   : > { %1679 = vmatpush3.xpose.msk.msra.mxu1 %vm412_vm0, %v1515_v12  ;;  %1644 = vmatprep.subr.msk.mxu0 %vm412_vm0, %v1480_v13 }
  0x42   : > { %1680 = vmatprep.subr.msk.mxu1 %vm412_vm0, %v1544_v14 }
  0x44   : > { %1645 = vmatpush3.xpose.msk.msra.mxu0 %vm412_vm0, %v1448_v17 }
  0x45   : > { %1681 = vmatpush3.xpose.msk.msra.mxu1 %vm412_vm0, %v1512_v18  ;;  %1646 = vmatprep.subr.msk.mxu0 %vm412_vm0, %v1479_v19 }
  0x46   : > { %1682 = vmatprep.subr.msk.mxu1 %vm412_vm0, %v1543_v20 }
  0x48   : > { %1647 = vmatpush3.xpose.msk.msra.mxu0 %vm412_vm0, %v1447_v23 }
  0x49   : > { %1683 = vmatpush3.xpose.msk.msra.mxu1 %vm412_vm0, %v1511_v24  ;;  %1648 = vmatprep.subr.msk.mxu0 %vm412_vm0, %v1476_v25 }
  0x4a   : > { %1684 = vmatprep.subr.msk.mxu1 %vm412_vm0, %v1540_v26 }
  0x4c   : > { %1649 = vmatpush3.xpose.msk.msra.mxu0 %vm412_vm0, %v1444_v29 }
  0x4d   : > { %1685 = vmatpush3.xpose.msk.msra.mxu1 %vm412_vm0, %v1508_v30  ;;  %1650 = vmatprep.subr.msk.mxu0 %vm412_vm0, %v1475_v31 }
  0x4e   : > { %1686 = vmatprep.subr.msk.mxu1 %vm412_vm0, %v1539_v32 }
  0x50   : > { %1651 = vmatpush3.xpose.msk.msra.mxu0 %vm412_vm0, %v1443_v34 }
  0x51   : > { %1687 = vmatpush3.xpose.msk.msra.mxu1 %vm412_vm0, %v1507_v35  ;;  %1707 = vmatprep.subr.msk.mxu0 %vm412_vm0, %v1584_v36 }
  0x52   : > { %1726 = vmatprep.subr.mxu1 %v1784_v48 }
  0x53   : > { %1653 = vmatmul.mubr.msk.f32.vlgmr.msra.gmra.mxu0 %vm412_vm0, %v1843_v4 }
  0x54   : > { %1689 = vmatmul.mubr.msk.f32.vlgmr.msra.gmra.mxu1 %vm412_vm0, %v1843_v4  ;;  %1708 = vmatpush3.xpose.msk.msra.mxu0 %vm412_vm0, %v1584_v36 }
  0x55   : > { %1654 = vmatprep.mubr.msk.f32.mxu0 %vm412_vm0, %v409_v38  ;;  %1709 = vmatprep.subr.msk.mxu0 %vm412_vm0, %v1583_v39 }
  0x56   : > { %1690 = vmatprep.mubr.msk.f32.mxu1 %vm412_vm0, %v409_v38  ;;  %1727 = vmatpush3.msra.mxu1 %v411_v50 }
  0x57   : > { %1655 = vmatmul.mubr.msk.f32.gmra.mxu0 %vm412_vm0, %v409_v38 }
  0x58   : > { %1691 = vmatmul.mubr.msk.f32.gmra.mxu1 %vm412_vm0, %v409_v38  ;;  %1710 = vmatpush3.xpose.msk.msra.mxu0 %vm412_vm0, %v1583_v39 }
  0x59   : > { %1723 = vmatprep.mubr.msk.f32.mxu0 %vm412_vm0, %v1843_v4  ;;  %1711 = vmatprep.subr.msk.mxu0 %vm412_vm0, %v1580_v41  ;;  %v1572_v4 = vunpack.c.h.bf16 %v1616_v46 }
  0x5a   : > { %1728 = vmatprep.mubr.msk.f32.mxu1 %vm1785_vm1, %v1784_v48 }
  0x5c   : > { %1712 = vmatpush3.xpose.msk.msra.mxu0 %vm412_vm0, %v1580_v41  ;;  %1729 = vmatmul.mubr.msk.f32.vlgmr.msra.gmra.mxu1 %vm946_vm2, %v945_v51 }
  0x5d   : > { %1713 = vmatprep.subr.msk.mxu0 %vm412_vm0, %v1579_v42  ;;  %1109 = vmatprep.mubr.f32.mxu1 %v1784_v48 }
  0x60   : > { %1714 = vmatpush3.xpose.msk.msra.mxu0 %vm412_vm0, %v1579_v42 }
  0x61   : > { %1715 = vmatprep.subr.msk.mxu0 %vm412_vm0, %v1576_v44 }
  0x64   : > { %1716 = vmatpush3.xpose.msk.msra.mxu0 %vm412_vm0, %v1576_v44 }
  0x65   : > { %1717 = vmatprep.subr.msk.mxu0 %vm412_vm0, %v1575_v45 }
  0x68   : > { %1718 = vmatpush3.xpose.msk.msra.mxu0 %vm412_vm0, %v1575_v45 }
  0x69   : > { %1719 = vmatprep.subr.msk.mxu0 %vm412_vm0, %v1572_v4 }
  0x6c   : > { %1720 = vmatpush3.xpose.msk.msra.mxu0 %vm412_vm0, %v1572_v4 }
  0x6d   : > { %1721 = vmatprep.subr.msk.mxu0 %vm412_vm0, %v1571_v47 }
  0x70   : > { %1722 = vmatpush3.xpose.msk.msra.mxu0 %vm412_vm0, %v1571_v47 }
  0x73   : > { %1724 = vmatmul.mubr.msk.f32.vlgmr.msra.gmra.mxu0 %vm412_vm0, %v409_v38 }
 0x113   : > { %v701_v52 = vpop.f32.mrf.mxu0 }
 0x114   : > { %v778_v53 = vpop.f32.mrf.mxu1 }
 0x115   : > { %v703_v54 = vpop.f32.mrf.mxu0  ;;  %v864_v3 = vmax.f32 %v701_v52, %v778_v53 }
 0x116   : > { %v780_v55 = vpop.f32.mrf.mxu1 }
 0x117   : > { %v707_v56 = vpop.f32.mrf.mxu0  ;;  %v865_v11 = vmax.f32 %v703_v54, %v780_v55 }
 0x118   : > { %v784_v57 = vpop.f32.mrf.mxu1  ;;  %v873_v60 = vsel %vm872_vm3, %v707_v56, -inf }
 0x119   : > { %v709_v58 = vpop.f32.mrf.mxu0  ;;  %v875_v61 = vsel %vm872_vm3, %v784_v57, -inf }
 0x11a   : > { %v786_v59 = vpop.f32.mrf.mxu1  ;;  %v874_v62 = vsel %vm872_vm3, %v709_v58, -inf  ;;  %v876_v0 = vmax.f32 %v873_v60, %v875_v61  ;;  %v1020_v61 = vld [vmem:[%s2025_s4] sm:$0xff] }
 0x11b   : > { %v877_v63 = vsel %vm872_vm3, %v786_v59, -inf }
 0x11c   : > { %v878_v6 = vmax.f32 %v874_v62, %v877_v63  ;;  %v1786_v62 = vmov 0  }
 0x11d   : > { %1751 = vset.pattern.permute.xlu0 %v1786_v62 }
 0x133   : > { %v1725_v1 = vpop.f32.mrf.mxu0 }
 0x134   : > { %v880_v2 = vsel %vm879_vm4, %v1725_v1, -inf }
 0x135   : > { %v855_v5 = vpop.f32.mrf.mxu0  ;;  %v881_v7 = vmax.f32 %v876_v0, %v880_v2 }
 0x136   : > { %v867_v8 = vsel %vm866_vm5, %v855_v5, -inf }
 0x137   : > { %v868_v9 = vmax.f32 %v864_v3, %v867_v8  ;;  %v882_v10 = vmax.f32 %v881_v7, %v878_v6 }
 0x139   : > { %883 = vmax.xlane.f32.xlu0 %v882_v10  ;;  %v869_v12 = vmax.f32 %v868_v9, %v865_v11 }
 0x13d   : > { %870 = vmax.xlane.f32.xlu0 %v869_v12 }
 0x153   : > { %1023 = vperm.xlu0 %1751, %v1020_v61  }
 0x1c2   : > { %v884_v13 = vpop.xlane.xlu0 %883 }
 0x1c3   : > { %v890_v14 = vsub.f32 %v707_v56, %v884_v13  ;;  %v891_v15 = vsub.f32 %v709_v58, %v884_v13  ;;  %v892_v16 = vsub.f32 %v784_v57, %v884_v13  ;;  %v893_v17 = vsub.f32 %v786_v59, %v884_v13  ;;  %v1016_v59 = vpop.f32.mrf.mxu1 }
 0x1c4   : > { %v894_v18 = vsub.f32 %v1725_v1, %v884_v13 }
 0x1c5   : > { %v905_v19 = vmul.f32 1.442695, %v890_v14  ;;  %v907_v20 = vmul.f32 1.442695, %v891_v15  ;;  %v909_v21 = vmul.f32 1.442695, %v892_v16  ;;  %v1730_v60 = vpop.f32.mrf.mxu1 }
 0x1c6   : > { %v911_v22 = vmul.f32 1.442695, %v893_v17  ;;  %v913_v23 = vmul.f32 1.442695, %v894_v18  ;;  %v871_v24 = vpop.xlane.xlu0 %870 }
 0x1c7   : > { %1752 = vpow2.f32 %v905_v19  ;;  %v885_v25 = vsub.f32 %v701_v52, %v871_v24  ;;  %v886_v26 = vsub.f32 %v703_v54, %v871_v24  ;;  %v887_v27 = vsub.f32 %v778_v53, %v871_v24 }
 0x1c8   : > { %1754 = vpow2.f32 %v907_v20  ;;  %v889_v28 = vsub.f32 %v855_v5, %v871_v24  ;;  %v888_v29 = vsub.f32 %v780_v55, %v871_v24 }
 0x1c9   : > { %1756 = vpow2.f32 %v909_v21  ;;  %v895_v30 = vmul.f32 1.442695, %v885_v25  ;;  %v897_v31 = vmul.f32 1.442695, %v886_v26  ;;  %v899_v32 = vmul.f32 1.442695, %v887_v27 }
 0x1ca   : > { %1758 = vpow2.f32 %v911_v22  ;;  %v903_v33 = vmul.f32 1.442695, %v889_v28  ;;  %v901_v34 = vmul.f32 1.442695, %v888_v29 }
 0x1cb   : > { %1760 = vpow2.f32 %v913_v23 }
 0x1cc   : > { %1762 = vpow2.f32 %v895_v30 }
 0x1cd   : > { %1764 = vpow2.f32 %v897_v31 }
 0x1ce   : > { %1766 = vpow2.f32 %v899_v32  ;;  %v1024_v14 = vpop.permute.xlu0 %1023 }
 0x1cf   : > { %1768 = vpow2.f32 %v903_v33 }
 0x1d0   : > { %1770 = vpow2.f32 %v901_v34 }
 0x1d4   : > { %v1753_v35 = vpop.eup %1752 }
 0x1d5   : > { %v1755_v36 = vpop.eup %1754  ;;  %v922_v37 = vsel %vm872_vm3, %v1753_v35, 0.0 }
 0x1d6   : > { %v1757_v38 = vpop.eup %1756  ;;  %v923_v39 = vsel %vm872_vm3, %v1755_v36, 0.0 }
 0x1d7   : > { %v1759_v40 = vpop.eup %1758  ;;  %v924_v41 = vadd.f32 %v923_v39, %v922_v37  ;;  %v925_v43 = vsel %vm872_vm3, %v1757_v38, 0.0 }
 0x1d8   : > { %v1761_v42 = vpop.eup %1760  ;;  %v927_v4 = vsel %vm872_vm3, %v1759_v40, 0.0 }
 0x1d9   : > { %v1763_v44 = vpop.eup %1762  ;;  %v926_v45 = vadd.f32 %v925_v43, %v924_v41  ;;  %v929_v51 = vsel %vm879_vm4, %v1761_v42, 0.0 }
 0x1da   : > { %v1765_v46 = vpop.eup %1764 }
 0x1db   : > { %v928_v47 = vadd.f32 %v927_v4, %v926_v45  ;;  %v915_v49 = vadd.f32 %v1765_v46, %v1763_v44  ;;  %v1767_v50 = vpop.eup %1766 }
 0x1dc   : > { %v1769_v52 = vpop.eup %1768 }
 0x1dd   : > { %v930_v53 = vadd.f32 %v929_v51, %v928_v47  ;;  %v916_v54 = vadd.f32 %v1767_v50, %v915_v49  ;;  %v1771_v55 = vpop.eup %1770  ;;  %v918_v57 = vsel %vm866_vm5, %v1769_v52, 0.0 }
 0x1df   : > { %931 = vadd.xlane.f32.xlu1 %v930_v53  ;;  %v917_v56 = vadd.f32 %v1771_v55, %v916_v54 }
 0x1e1   : > { %v919_v58 = vadd.f32 %v918_v57, %v917_v56 }
 0x1e3   : > { %920 = vadd.xlane.f32.xlu1 %v919_v58 }
 0x268   : > { %v932_v63 = vpop.xlane.xlu1 %931 }
 0x269   : > { %1772 = vrcp.f32 %v932_v63 }
 0x26c   : > { %v921_v0 = vpop.xlane.xlu1 %920 }
 0x26d   : > { %1774 = vrcp.f32 %v921_v0 }
 0x276   : > { %v1773_v1 = vpop.eup %1772 }
 0x277   : > { %v941_v2 = vmul.f32 %v1773_v1, %v1755_v36  ;;  %v940_v3 = vmul.f32 %v1773_v1, %v1753_v35  ;;  %v943_v8 = vmul.f32 %v1773_v1, %v1759_v40  ;;  %v942_v9 = vmul.f32 %v1773_v1, %v1757_v38 }
 0x278   : > { %v944_v12 = vmul.f32 %v1773_v1, %v1761_v42 }
 0x279   : > { %1430 = vmatprep.subr.msk.mxu1 %vm872_vm3, %v941_v2 }
 0x27a   : > { %v1775_v5 = vpop.eup %1774  ;;  %1431 = vmatpush1.msk.msra.mxu1 %vm872_vm3, %v940_v3 }
 0x27b   : > { %v936_v6 = vmul.f32 %v1775_v5, %v1765_v46  ;;  %v935_v7 = vmul.f32 %v1775_v5, %v1763_v44  ;;  %v938_v10 = vmul.f32 %v1775_v5, %v1771_v55  ;;  %v937_v11 = vmul.f32 %v1775_v5, %v1767_v50 }
 0x27c   : > { %v939_v13 = vmul.f32 %v1775_v5, %v1769_v52 }
 0x27d   : > { %1075 = vmatprep.subr.mxu1 %v936_v6 }
 0x27e   : > { %1076 = vmatpush1.msra.mxu1 %v935_v7 }
 0x27f   : > { %1432 = vmatmul.mubr.msk.f32.vlgmr.msra.gmra.mxu1 %vm1026_vm6, %v1016_v59  ;;  %1433 = vmatprep.subr.msk.mxu1 %vm872_vm3, %v943_v8 }
 0x280   : > { %1434 = vmatpush1.msk.msra.mxu1 %vm872_vm3, %v942_v9  ;;  %1180 = vmatprep.mubr.f32.mxu1 %v1784_v48 }
 0x281   : > { %1146 = vmatprep.subr.mxu1 %v938_v10 }
 0x282   : > { %1147 = vmatpush1.msra.mxu1 %v937_v11 }
 0x283   : > { %1435 = vmatmul.mubr.msk.f32.vlgmr.msra.gmra.mxu1 %vm1026_vm6, %v1016_v59  ;;  %1731 = vmatprep.subr.mxu1 %v1784_v48 }
 0x284   : > { %1732 = vmatpush3.msk.msra.mxu1 %vm872_vm3, %v944_v12  ;;  %1735 = vmatprep.mubr.msk.f32.mxu1 %vm1785_vm1, %v1784_v48 }
 0x285   : > { %1733 = vmatprep.subr.mxu1 %v1784_v48 }
 0x286   : > { %1734 = vmatpush3.msra.mxu1 %v939_v13 }
 0x287   : > { %1736 = vmatmul.mubr.msk.f32.vlgmr.msra.gmra.mxu1 %vm1026_vm6, %v1016_v59 }
 0x33f   : > { %v1111_v15 = vpop.f32.mrf.mxu1 }
 0x340   : > { %v1112_v16 = vadd.f32 %v1111_v15, %v1024_v14 }
 0x341   : > { %v1113_v17 = vpop.f32.mrf.mxu1 }
 0x342   : > { %1257 = vst [vmem:[%s261_s14] sm:$0xff] %v1112_v16  ;;  %v1114_v18 = vadd.f32 %v1113_v17, %v1024_v14 }
 0x343   : > { %v1182_v19 = vpop.f32.mrf.mxu1 }
 0x344   : > { %1258 = vst [vmem:[%s261_s14 + $0x8] sm:$0xff] %v1114_v18  ;;  %v1183_v20 = vadd.f32 %v1182_v19, %v1024_v14 }
 0x345   : > { %v1184_v21 = vpop.f32.mrf.mxu1 }
 0x346   : > { %1259 = vst [vmem:[%s261_s14 + $0x10] sm:$0xff] %v1183_v20  ;;  %v1185_v48 = vadd.f32 %v1184_v21, %v1024_v14 }
 0x347   : > { %v1253_v22 = vpop.f32.mrf.mxu1 }
 0x348   : > { %1260 = vst [vmem:[%s261_s14 + $0x18] sm:$0xff] %v1185_v48  ;;  %v1254_v23 = vadd.f32 %v1253_v22, %v1024_v14 }
 0x349   : > { %v1737_v24 = vpop.f32.mrf.mxu1 }
 0x34a   : > { %1261 = vst.msk [vmem:[%s261_s14 + $0x20] sm:$0xff] %vm866_vm5, %v1254_v23 }
 0x34b PF: > { %s15_s18 = sadd.s32 1, %s1782_s18  }
 0x34c   : > { %p12_p4 = scmp.ge.s32.totalorder %s15_s18, 4  }
 0x34e   :  { %14 = sbr.rel (!%p12_p4) target bundleno = 1 (0x1), region = 76 }

</bundles_post_ra>
